<compile_context>
chip_gen: v6e
topology: v6e:2x2x1
jax: 0.10.0
libtpu: 0.0.40
codegen_flags: <defaults>
</compile_context>

<pallas_src>
import jax
import jax.numpy as jnp
import numpy as np
from jax.experimental import pallas as pl
from jax.experimental.pallas import tpu as pltpu


# ----------------------------- config (small, consistent with the module) ----
VOCAB_SIZE = 32
EMBEDDING_DIM = 16
HIDDEN_DIM = 32          # cat(conv1, conv2) -> 2*HIDDEN_DIM = 64 real channels
NUM_LAYERS = 4
KERNEL_SIZE = 5
KERNEL_SIZE2 = 3
NUM_CLASSES = 12
CONV3_OUT = 256

SEQ_LEN = 16             # tokens per sequence
BATCH = 16               # independent sequences (vmapped module forward)
BLK = 8                  # sequences per grid block -> BLK*SEQ_LEN = 128 MXU rows

CPAD = 128               # channel padding (lane-dense f32 tiles, fills 128-wide MXU)
PAD = (KERNEL_SIZE - 1) // 2


# ----------------------------- kernel ----------------------------------------
def cnn_classifier_kernel(tok_ref, emb_ref, w0_ref, b0_ref, wc_ref, bc_ref,
                          w3_ref, b3_ref, wfc_ref, bfc_ref, out_ref, xpad_ref):
    BLKk, L = tok_ref.shape
    V = emb_ref.shape[0]
    C = xpad_ref.shape[-1]                      # CPAD
    R = BLKk * L
    K = KERNEL_SIZE

    # Zero the padded-activation scratch (halo rows + padded channels stay 0).
    xpad_ref[...] = jnp.zeros_like(xpad_ref)

    # ---- embedding lookup as one-hot (R, V) @ (V, CPAD) matmul --------------
    # (out-of-range token ids silently give a zero embedding, unlike torch)
    tok = tok_ref[...]                                              # (BLK, L) i32
    iota = jax.lax.broadcasted_iota(jnp.int32, (BLKk, L, V), 2)
    onehot = (iota == tok[:, :, None]).astype(jnp.bfloat16).reshape(R, V)
    x = jnp.dot(onehot, emb_ref[...], preferred_element_type=jnp.float32)
    xpad_ref[:, PAD:PAD + L, :] = x.reshape(BLKk, L, C)

    def conv_relu(w_bf16, b_f32):
        # im2col: (R, K*C) built from K statically-shifted views of the scratch,
        # then a single MXU matmul per layer (contraction = K*CPAD = 640).
        cols = [xpad_ref[:, j:j + L, :].reshape(R, C) for j in range(K)]
        im = jnp.concatenate(cols, axis=-1).astype(jnp.bfloat16)
        y = jnp.dot(im, w_bf16, preferred_element_type=jnp.float32) + b_f32
        return jnp.maximum(y, 0.0)

    # ---- fused conv1(k=5) || conv2(k=3) -> ReLU (dropout == identity) -------
    h = conv_relu(w0_ref[...], b0_ref[...])                         # (R, C)
    xpad_ref[:, PAD:PAD + L, :] = h.reshape(BLKk, L, C)

    # ---- 4 stacked convs (2H -> 2H, k=5, channel-padded), ReLU each ---------
    for li in range(NUM_LAYERS):                                    # static unroll
        h = conv_relu(wc_ref[li], bc_ref[li])
        xpad_ref[:, PAD:PAD + L, :] = h.reshape(BLKk, L, C)

    # ---- conv3 (-> 256, k=5), ReLU ------------------------------------------
    h = conv_relu(w3_ref[...], b3_ref[...])                         # (R, 256)

    # ---- fc + log_softmax over classes (eval branch of the module) ----------
    logits = jnp.dot(h.astype(jnp.bfloat16), wfc_ref[...],
                     preferred_element_type=jnp.float32) + bfc_ref[...]
    m = jnp.max(logits, axis=-1, keepdims=True)
    lse = jnp.log(jnp.sum(jnp.exp(logits - m), axis=-1, keepdims=True)) + m
    out_ref[...] = (logits - lse).reshape(BLKk, L, NUM_CLASSES)


# ----------------------------- wrapper ----------------------------------------
def cnn_classifier_forward(tokens, prep):
    """tokens: (B, L) int32 token ids. Returns (B, L, NUM_CLASSES) log-probs."""
    B, L = tokens.shape
    assert B % BLK == 0, "batch must be a multiple of BLK"
    n_blocks = B // BLK
    R = BLK * L

    weights = (prep["emb"], prep["w0"], prep["b0"], prep["wc"], prep["bc"],
               prep["w3"], prep["b3"], prep["wfc"], prep["bfc"])

    def resident(arr):
        nd = arr.ndim
        return pl.BlockSpec(arr.shape, lambda b, _n=nd: (0,) * _n)   # VMEM-resident

    in_specs = ([pl.BlockSpec((BLK, L), lambda b: (b, 0))]
                + [resident(w) for w in weights])
    out_specs = pl.BlockSpec((BLK, L, NUM_CLASSES), lambda b: (b, 0, 0))

    flops_blk = (2 * R * VOCAB_SIZE * CPAD
                 + (1 + NUM_LAYERS) * 2 * R * (KERNEL_SIZE * CPAD) * CPAD
                 + 2 * R * (KERNEL_SIZE * CPAD) * CONV3_OUT
                 + 2 * R * CONV3_OUT * NUM_CLASSES)
    bytes_acc = (sum(int(a.size) * a.dtype.itemsize for a in weights)
                 + int(tokens.size) * tokens.dtype.itemsize
                 + B * L * NUM_CLASSES * 4)
    cost = pl.CostEstimate(flops=int(n_blocks * flops_blk),
                           transcendentals=int(n_blocks * R * NUM_CLASSES),
                           bytes_accessed=int(bytes_acc))

    return pl.pallas_call(
        cnn_classifier_kernel,
        out_shape=jax.ShapeDtypeStruct((B, L, NUM_CLASSES), jnp.float32),
        grid=(n_blocks,),
        in_specs=in_specs,
        out_specs=out_specs,
        scratch_shapes=[pltpu.VMEM((BLK, L + 2 * PAD, CPAD), jnp.float32)],
        compiler_params=pltpu.CompilerParams(
            dimension_semantics=("parallel",)),      # shards batch blocks on v7x
        cost_estimate=cost,
    )(tokens, *weights)


# ----------------------------- params -----------------------------------------
def init_raw_params(key):
    """Deterministic weights in PyTorch layouts."""
    ks = jax.random.split(key, 11)
    H, H2, E = HIDDEN_DIM, HIDDEN_DIM * 2, EMBEDDING_DIM

    def rnd(k, shape, scale):
        return jax.random.normal(k, shape, jnp.float32) * scale

    return dict(
        emb=rnd(ks[0], (VOCAB_SIZE, E), 0.1),
        w1=rnd(ks[1], (H, E, KERNEL_SIZE), 0.1),   b1=rnd(ks[2], (H,), 0.1),
        w2=rnd(ks[3], (H, E, KERNEL_SIZE2), 0.1),  b2=rnd(ks[4], (H,), 0.1),
        wc=rnd(ks[5], (NUM_LAYERS, H2, H2, KERNEL_SIZE), 0.05),
        bc=rnd(ks[6], (NUM_LAYERS, H2), 0.05),
        w3=rnd(ks[7], (CONV3_OUT, H2, KERNEL_SIZE), 0.05),
        b3=rnd(ks[8], (CONV3_OUT,), 0.05),
        wfc=rnd(ks[9], (NUM_CLASSES, CONV3_OUT), 0.05),
        bfc=rnd(ks[10], (NUM_CLASSES,), 0.05),
    )


def prepare_params(raw):
    """Fuse conv1||conv2, pad channels to CPAD, flatten taps for im2col, cast bf16."""
    H, H2, E = HIDDEN_DIM, HIDDEN_DIM * 2, EMBEDDING_DIM
    K, K2 = KERNEL_SIZE, KERNEL_SIZE2

    emb = jnp.zeros((VOCAB_SIZE, CPAD), jnp.float32).at[:, :E].set(raw["emb"])

    def taps(w_pt):                                   # (Cout, Cin, K) -> (K, Cin, Cout)
        return jnp.transpose(w_pt, (2, 1, 0))

    # fused conv1 || conv2 (conv2 k=3 taps centered inside the k=5 window)
    w0 = jnp.zeros((K, CPAD, CPAD), jnp.float32)
    w0 = w0.at[:, :E, :H].set(taps(raw["w1"]))
    off = (K - K2) // 2
    w0 = w0.at[off:off + K2, :E, H:H2].set(taps(raw["w2"]))
    b0 = jnp.zeros((1, CPAD), jnp.float32)
    b0 = b0.at[0, :H].set(raw["b1"]).at[0, H:H2].set(raw["b2"])

    wc = jnp.zeros((NUM_LAYERS, K, CPAD, CPAD), jnp.float32)
    wc = wc.at[:, :, :H2, :H2].set(jnp.transpose(raw["wc"], (0, 3, 2, 1)))
    bc = jnp.zeros((NUM_LAYERS, 1, CPAD), jnp.float32).at[:, 0, :H2].set(raw["bc"])

    w3 = jnp.zeros((K, CPAD, CONV3_OUT), jnp.float32)
    w3 = w3.at[:, :H2, :].set(taps(raw["w3"]))
    b3 = raw["b3"].reshape(1, CONV3_OUT)

    wfc = jnp.transpose(raw["wfc"], (1, 0))           # (256, num_classes)
    bfc = raw["bfc"].reshape(1, NUM_CLASSES)

    bf = jnp.bfloat16
    return dict(
        emb=emb.astype(bf),
        w0=w0.reshape(K * CPAD, CPAD).astype(bf),               b0=b0,
        wc=wc.reshape(NUM_LAYERS, K * CPAD, CPAD).astype(bf),   bc=bc,
        w3=w3.reshape(K * CPAD, CONV3_OUT).astype(bf),          b3=b3,
        wfc=wfc.astype(bf),                                     bfc=bfc,
    )


# ----------------------------- references --------------------------------------
def reference_forward_prep(tokens, prep):
    """Pure-JAX reference using the SAME prepared (fused/padded/bf16) weights."""
    B, L = tokens.shape
    K = KERNEL_SIZE
    x = jnp.take(prep["emb"], tokens, axis=0).astype(jnp.float32)      # (B, L, CPAD)

    def conv(h, w, b):
        C = h.shape[-1]
        hp = jnp.pad(h, ((0, 0), (PAD, PAD), (0, 0)))
        im = jnp.concatenate([hp[:, j:j + L, :] for j in range(K)], axis=-1)
        y = jnp.dot(im.reshape(B * L, K * C).astype(jnp.bfloat16), w,
                    preferred_element_type=jnp.float32).reshape(B, L, -1)
        return jnp.maximum(y + b, 0.0)

    h = conv(x, prep["w0"], prep["b0"])
    for li in range(NUM_LAYERS):
        h = conv(h, prep["wc"][li], prep["bc"][li])
    h = conv(h, prep["w3"], prep["b3"])
    logits = jnp.dot(h.reshape(B * L, CONV3_OUT).astype(jnp.bfloat16), prep["wfc"],
                     preferred_element_type=jnp.float32) + prep["bfc"]
    logits = logits.reshape(B, L, NUM_CLASSES)
    m = jnp.max(logits, axis=-1, keepdims=True)
    return logits - (jnp.log(jnp.sum(jnp.exp(logits - m), axis=-1, keepdims=True)) + m)


def reference_forward_f32(tokens, raw):
    """Full-precision reference with torch-layout weights (module semantics)."""
    def one_seq(tok):
        L = tok.shape[0]
        x = raw["emb"][tok]                                     # (L, E)

        def conv(xin, w_pt, b):                                 # w_pt (Cout, Cin, K)
            Kk = w_pt.shape[2]
            p = (Kk - 1) // 2
            xp = jnp.pad(xin, ((p, p), (0, 0)))
            t = jnp.transpose(w_pt, (2, 1, 0))
            return sum(xp[j:j + L] @ t[j] for j in range(Kk)) + b

        h = jnp.maximum(jnp.concatenate(
            [conv(x, raw["w1"], raw["b1"]), conv(x, raw["w2"], raw["b2"])], axis=1), 0.0)
        for li in range(NUM_LAYERS):
            h = jnp.maximum(conv(h, raw["wc"][li], raw["bc"][li]), 0.0)
        h = jnp.maximum(conv(h, raw["w3"], raw["b3"]), 0.0)
        logits = h @ raw["wfc"].T + raw["bfc"]
        return jax.nn.log_softmax(logits, axis=-1)

    return jax.vmap(one_seq)(tokens)


# ----------------------------- main ---------------------------------------------
if __name__ == "__main__":
    key = jax.random.PRNGKey(0)
    k_tok, k_par = jax.random.split(key)
    tokens = jax.random.randint(k_tok, (BATCH, SEQ_LEN), 0, VOCAB_SIZE,
                                dtype=jnp.int32)
    raw = init_raw_params(k_par)
    prep = prepare_params(raw)

    out = cnn_classifier_forward(tokens, prep)
    out = jax.block_until_ready(out)
    assert out.shape == (BATCH, SEQ_LEN, NUM_CLASSES)

    # tight check vs. a reference doing identical (bf16-operand) math
    ref_prep = reference_forward_prep(tokens, prep)
    np.testing.assert_allclose(np.asarray(out), np.asarray(ref_prep),
                               rtol=2e-3, atol=2e-3)

    # loose check vs. full-f32 torch-semantics reference (bf16 quantization slack)
    ref_f32 = reference_forward_f32(tokens, raw)
    np.testing.assert_allclose(np.asarray(out), np.asarray(ref_f32),
                               rtol=0, atol=5e-2)

    print("KERNEL_OK")
</pallas_src>

<mosaic_0001>
module attributes {stable_mosaic.version = 11 : i64} {
  func.func @cnn_classifier_kernel(%arg0: i32, %arg1: memref<8x16xi32, #tpu.memory_space<vmem>>, %arg2: memref<32x128xbf16, #tpu.memory_space<vmem>>, %arg3: memref<640x128xbf16, #tpu.memory_space<vmem>>, %arg4: memref<1x128xf32, #tpu.memory_space<vmem>>, %arg5: memref<4x640x128xbf16, #tpu.memory_space<vmem>>, %arg6: memref<4x1x128xf32, #tpu.memory_space<vmem>>, %arg7: memref<640x256xbf16, #tpu.memory_space<vmem>>, %arg8: memref<1x256xf32, #tpu.memory_space<vmem>>, %arg9: memref<256x12xbf16, #tpu.memory_space<vmem>>, %arg10: memref<1x12xf32, #tpu.memory_space<vmem>>, %arg11: memref<8x16x12xf32, #tpu.memory_space<vmem>>, %arg12: memref<8x20x128xf32, #tpu.memory_space<vmem>>) attributes {dimension_semantics = [#tpu.dimension_semantics<parallel>], iteration_bounds = array<i64: 2>, scalar_prefetch = 0 : i64, scratch_operands = 1 : i64, tpu.core_type = #tpu.core_type<tc>, window_params = [{transform_indices = @transform_0, window_bounds = array<i64: 8, 16>}, {pipeline_mode = #tpu.pipeline_mode<synchronous>, transform_indices = @transform_1, window_bounds = array<i64: 32, 128>}, {pipeline_mode = #tpu.pipeline_mode<synchronous>, transform_indices = @transform_2, window_bounds = array<i64: 640, 128>}, {pipeline_mode = #tpu.pipeline_mode<synchronous>, transform_indices = @transform_3, window_bounds = array<i64: 1, 128>}, {pipeline_mode = #tpu.pipeline_mode<synchronous>, transform_indices = @transform_4, window_bounds = array<i64: 4, 640, 128>}, {pipeline_mode = #tpu.pipeline_mode<synchronous>, transform_indices = @transform_5, window_bounds = array<i64: 4, 1, 128>}, {pipeline_mode = #tpu.pipeline_mode<synchronous>, transform_indices = @transform_6, window_bounds = array<i64: 640, 256>}, {pipeline_mode = #tpu.pipeline_mode<synchronous>, transform_indices = @transform_7, window_bounds = array<i64: 1, 256>}, {pipeline_mode = #tpu.pipeline_mode<synchronous>, transform_indices = @transform_8, window_bounds = array<i64: 256, 12>}, {pipeline_mode = #tpu.pipeline_mode<synchronous>, transform_indices = @transform_9, window_bounds = array<i64: 1, 12>}, {transform_indices = @transform_10, window_bounds = array<i64: 8, 16, 12>}]} {
    %cst = arith.constant 0.000000e+00 : f32
    %0 = vector.broadcast %cst : f32 to vector<8x20x128xf32>
    %c0 = arith.constant 0 : index
    %c0_0 = arith.constant 0 : index
    %c0_1 = arith.constant 0 : index
    %1 = vector.load %arg12[%c0, %c0_0, %c0_1] : memref<8x20x128xf32, #tpu.memory_space<vmem>>, vector<8x20x128xf32>
    tpu.vector_store %arg12[%c0, %c0_0, %c0_1], %0 {strides = array<i32>} : memref<8x20x128xf32, #tpu.memory_space<vmem>>, vector<8x20x128xf32>,
    %c0_2 = arith.constant 0 : index
    %c0_3 = arith.constant 0 : index
    %2 = vector.load %arg1[%c0_2, %c0_3] : memref<8x16xi32, #tpu.memory_space<vmem>>, vector<8x16xi32>
    %3 = tpu.iota {dimensions = array<i32: 2>} : vector<8x16x32xi32>
    %4 = vector.shape_cast %2 : vector<8x16xi32> to vector<8x16x1xi32>
    %5 = vector.broadcast %4 : vector<8x16x1xi32> to vector<8x16x32xi32>
    %6 = arith.cmpi eq, %3, %5 : vector<8x16x32xi32>
    %7 = arith.extui %6 : vector<8x16x32xi1> to vector<8x16x32xi32>
    %8 = arith.sitofp %7 : vector<8x16x32xi32> to vector<8x16x32xf32>
    %9 = arith.truncf %8 : vector<8x16x32xf32> to vector<8x16x32xbf16>
    %10 = vector.shape_cast %9 : vector<8x16x32xbf16> to vector<128x32xbf16>
    %c0_4 = arith.constant 0 : index
    %c0_5 = arith.constant 0 : index
    %11 = vector.load %arg2[%c0_4, %c0_5] : memref<32x128xbf16, #tpu.memory_space<vmem>>, vector<32x128xbf16>
    %cst_6 = arith.constant dense<0.000000e+00> : vector<128x128xf32>
    %12 = tpu.matmul %10, %11, %cst_6 {dimension_numbers = #tpu.dot_dimension_numbers<[1], [0], [0], [1], [0, 0, 1, 1], [], []>} : vector<128x32xbf16>, vector<32x128xbf16>, vector<128x128xf32> -> vector<128x128xf32>
    %13 = vector.shape_cast %12 : vector<128x128xf32> to vector<8x16x128xf32>
    %c0_7 = arith.constant 0 : index
    %c2 = arith.constant 2 : index
    %c0_8 = arith.constant 0 : index
    %14 = vector.load %arg12[%c0_7, %c2, %c0_8] : memref<8x20x128xf32, #tpu.memory_space<vmem>>, vector<8x16x128xf32>
    tpu.vector_store %arg12[%c0_7, %c2, %c0_8], %13 {strides = array<i32>} : memref<8x20x128xf32, #tpu.memory_space<vmem>>, vector<8x16x128xf32>,
    %c0_9 = arith.constant 0 : index
    %c0_10 = arith.constant 0 : index
    %15 = vector.load %arg3[%c0_9, %c0_10] : memref<640x128xbf16, #tpu.memory_space<vmem>>, vector<640x128xbf16>
    %c0_11 = arith.constant 0 : index
    %c0_12 = arith.constant 0 : index
    %16 = vector.load %arg4[%c0_11, %c0_12] : memref<1x128xf32, #tpu.memory_space<vmem>>, vector<1x128xf32>
    %c0_13 = arith.constant 0 : index
    %c0_14 = arith.constant 0 : index
    %c0_15 = arith.constant 0 : index
    %17 = vector.load %arg12[%c0_13, %c0_14, %c0_15] : memref<8x20x128xf32, #tpu.memory_space<vmem>>, vector<8x16x128xf32>
    %18 = vector.shape_cast %17 : vector<8x16x128xf32> to vector<128x128xf32>
    %c0_16 = arith.constant 0 : index
    %c1 = arith.constant 1 : index
    %c0_17 = arith.constant 0 : index
    %19 = vector.load %arg12[%c0_16, %c1, %c0_17] : memref<8x20x128xf32, #tpu.memory_space<vmem>>, vector<8x16x128xf32>
    %20 = vector.shape_cast %19 : vector<8x16x128xf32> to vector<128x128xf32>
    %c0_18 = arith.constant 0 : index
    %c2_19 = arith.constant 2 : index
    %c0_20 = arith.constant 0 : index
    %21 = vector.load %arg12[%c0_18, %c2_19, %c0_20] : memref<8x20x128xf32, #tpu.memory_space<vmem>>, vector<8x16x128xf32>
    %22 = vector.shape_cast %21 : vector<8x16x128xf32> to vector<128x128xf32>
    %c0_21 = arith.constant 0 : index
    %c3 = arith.constant 3 : index
    %c0_22 = arith.constant 0 : index
    %23 = vector.load %arg12[%c0_21, %c3, %c0_22] : memref<8x20x128xf32, #tpu.memory_space<vmem>>, vector<8x16x128xf32>
    %24 = vector.shape_cast %23 : vector<8x16x128xf32> to vector<128x128xf32>
    %c0_23 = arith.constant 0 : index
    %c4 = arith.constant 4 : index
    %c0_24 = arith.constant 0 : index
    %25 = vector.load %arg12[%c0_23, %c4, %c0_24] : memref<8x20x128xf32, #tpu.memory_space<vmem>>, vector<8x16x128xf32>
    %26 = vector.shape_cast %25 : vector<8x16x128xf32> to vector<128x128xf32>
    %27 = tpu.concatenate %18, %20, %22, %24, %26 in 1 : vector<128x128xf32>, vector<128x128xf32>, vector<128x128xf32>, vector<128x128xf32>, vector<128x128xf32> -> vector<128x640xf32>
    %28 = arith.truncf %27 : vector<128x640xf32> to vector<128x640xbf16>
    %cst_25 = arith.constant dense<0.000000e+00> : vector<128x128xf32>
    %29 = tpu.matmul %28, %15, %cst_25 {dimension_numbers = #tpu.dot_dimension_numbers<[1], [0], [0], [1], [0, 0, 1, 1], [], []>} : vector<128x640xbf16>, vector<640x128xbf16>, vector<128x128xf32> -> vector<128x128xf32>
    %30 = vector.broadcast %16 : vector<1x128xf32> to vector<128x128xf32>
    %31 = arith.addf %29, %30 : vector<128x128xf32>
    %cst_26 = arith.constant 0.000000e+00 : f32
    %32 = vector.broadcast %cst_26 : f32 to vector<128x128xf32>
    %33 = arith.maximumf %31, %32 : vector<128x128xf32>
    %34 = vector.shape_cast %33 : vector<128x128xf32> to vector<8x16x128xf32>
    %c0_27 = arith.constant 0 : index
    %c2_28 = arith.constant 2 : index
    %c0_29 = arith.constant 0 : index
    %35 = vector.load %arg12[%c0_27, %c2_28, %c0_29] : memref<8x20x128xf32, #tpu.memory_space<vmem>>, vector<8x16x128xf32>
    tpu.vector_store %arg12[%c0_27, %c2_28, %c0_29], %34 {strides = array<i32>} : memref<8x20x128xf32, #tpu.memory_space<vmem>>, vector<8x16x128xf32>,
    %c0_30 = arith.constant 0 : index
    %c0_31 = arith.constant 0 : index
    %c0_32 = arith.constant 0 : index
    %36 = vector.load %arg5[%c0_30, %c0_31, %c0_32] : memref<4x640x128xbf16, #tpu.memory_space<vmem>>, vector<1x640x128xbf16>
    %37 = vector.shape_cast %36 : vector<1x640x128xbf16> to vector<640x128xbf16>
    %c0_33 = arith.constant 0 : index
    %c0_34 = arith.constant 0 : index
    %c0_35 = arith.constant 0 : index
    %38 = vector.load %arg6[%c0_33, %c0_34, %c0_35] : memref<4x1x128xf32, #tpu.memory_space<vmem>>, vector<1x1x128xf32>
    %39 = vector.shape_cast %38 : vector<1x1x128xf32> to vector<1x128xf32>
    %c0_36 = arith.constant 0 : index
    %c0_37 = arith.constant 0 : index
    %c0_38 = arith.constant 0 : index
    %40 = vector.load %arg12[%c0_36, %c0_37, %c0_38] : memref<8x20x128xf32, #tpu.memory_space<vmem>>, vector<8x16x128xf32>
    %41 = vector.shape_cast %40 : vector<8x16x128xf32> to vector<128x128xf32>
    %c0_39 = arith.constant 0 : index
    %c1_40 = arith.constant 1 : index
    %c0_41 = arith.constant 0 : index
    %42 = vector.load %arg12[%c0_39, %c1_40, %c0_41] : memref<8x20x128xf32, #tpu.memory_space<vmem>>, vector<8x16x128xf32>
    %43 = vector.shape_cast %42 : vector<8x16x128xf32> to vector<128x128xf32>
    %c0_42 = arith.constant 0 : index
    %c2_43 = arith.constant 2 : index
    %c0_44 = arith.constant 0 : index
    %44 = vector.load %arg12[%c0_42, %c2_43, %c0_44] : memref<8x20x128xf32, #tpu.memory_space<vmem>>, vector<8x16x128xf32>
    %45 = vector.shape_cast %44 : vector<8x16x128xf32> to vector<128x128xf32>
    %c0_45 = arith.constant 0 : index
    %c3_46 = arith.constant 3 : index
    %c0_47 = arith.constant 0 : index
    %46 = vector.load %arg12[%c0_45, %c3_46, %c0_47] : memref<8x20x128xf32, #tpu.memory_space<vmem>>, vector<8x16x128xf32>
    %47 = vector.shape_cast %46 : vector<8x16x128xf32> to vector<128x128xf32>
    %c0_48 = arith.constant 0 : index
    %c4_49 = arith.constant 4 : index
    %c0_50 = arith.constant 0 : index
    %48 = vector.load %arg12[%c0_48, %c4_49, %c0_50] : memref<8x20x128xf32, #tpu.memory_space<vmem>>, vector<8x16x128xf32>
    %49 = vector.shape_cast %48 : vector<8x16x128xf32> to vector<128x128xf32>
    %50 = tpu.concatenate %41, %43, %45, %47, %49 in 1 : vector<128x128xf32>, vector<128x128xf32>, vector<128x128xf32>, vector<128x128xf32>, vector<128x128xf32> -> vector<128x640xf32>
    %51 = arith.truncf %50 : vector<128x640xf32> to vector<128x640xbf16>
    %cst_51 = arith.constant dense<0.000000e+00> : vector<128x128xf32>
    %52 = tpu.matmul %51, %37, %cst_51 {dimension_numbers = #tpu.dot_dimension_numbers<[1], [0], [0], [1], [0, 0, 1, 1], [], []>} : vector<128x640xbf16>, vector<640x128xbf16>, vector<128x128xf32> -> vector<128x128xf32>
    %53 = vector.broadcast %39 : vector<1x128xf32> to vector<128x128xf32>
    %54 = arith.addf %52, %53 : vector<128x128xf32>
    %cst_52 = arith.constant 0.000000e+00 : f32
    %55 = vector.broadcast %cst_52 : f32 to vector<128x128xf32>
    %56 = arith.maximumf %54, %55 : vector<128x128xf32>
    %57 = vector.shape_cast %56 : vector<128x128xf32> to vector<8x16x128xf32>
    %c0_53 = arith.constant 0 : index
    %c2_54 = arith.constant 2 : index
    %c0_55 = arith.constant 0 : index
    %58 = vector.load %arg12[%c0_53, %c2_54, %c0_55] : memref<8x20x128xf32, #tpu.memory_space<vmem>>, vector<8x16x128xf32>
    tpu.vector_store %arg12[%c0_53, %c2_54, %c0_55], %57 {strides = array<i32>} : memref<8x20x128xf32, #tpu.memory_space<vmem>>, vector<8x16x128xf32>,
    %c1_56 = arith.constant 1 : index
    %c0_57 = arith.constant 0 : index
    %c0_58 = arith.constant 0 : index
    %59 = vector.load %arg5[%c1_56, %c0_57, %c0_58] : memref<4x640x128xbf16, #tpu.memory_space<vmem>>, vector<1x640x128xbf16>
    %60 = vector.shape_cast %59 : vector<1x640x128xbf16> to vector<640x128xbf16>
    %c1_59 = arith.constant 1 : index
    %c0_60 = arith.constant 0 : index
    %c0_61 = arith.constant 0 : index
    %61 = vector.load %arg6[%c1_59, %c0_60, %c0_61] : memref<4x1x128xf32, #tpu.memory_space<vmem>>, vector<1x1x128xf32>
    %62 = vector.shape_cast %61 : vector<1x1x128xf32> to vector<1x128xf32>
    %c0_62 = arith.constant 0 : index
    %c0_63 = arith.constant 0 : index
    %c0_64 = arith.constant 0 : index
    %63 = vector.load %arg12[%c0_62, %c0_63, %c0_64] : memref<8x20x128xf32, #tpu.memory_space<vmem>>, vector<8x16x128xf32>
    %64 = vector.shape_cast %63 : vector<8x16x128xf32> to vector<128x128xf32>
    %c0_65 = arith.constant 0 : index
    %c1_66 = arith.constant 1 : index
    %c0_67 = arith.constant 0 : index
    %65 = vector.load %arg12[%c0_65, %c1_66, %c0_67] : memref<8x20x128xf32, #tpu.memory_space<vmem>>, vector<8x16x128xf32>
    %66 = vector.shape_cast %65 : vector<8x16x128xf32> to vector<128x128xf32>
    %c0_68 = arith.constant 0 : index
    %c2_69 = arith.constant 2 : index
    %c0_70 = arith.constant 0 : index
    %67 = vector.load %arg12[%c0_68, %c2_69, %c0_70] : memref<8x20x128xf32, #tpu.memory_space<vmem>>, vector<8x16x128xf32>
    %68 = vector.shape_cast %67 : vector<8x16x128xf32> to vector<128x128xf32>
    %c0_71 = arith.constant 0 : index
    %c3_72 = arith.constant 3 : index
    %c0_73 = arith.constant 0 : index
    %69 = vector.load %arg12[%c0_71, %c3_72, %c0_73] : memref<8x20x128xf32, #tpu.memory_space<vmem>>, vector<8x16x128xf32>
    %70 = vector.shape_cast %69 : vector<8x16x128xf32> to vector<128x128xf32>
    %c0_74 = arith.constant 0 : index
    %c4_75 = arith.constant 4 : index
    %c0_76 = arith.constant 0 : index
    %71 = vector.load %arg12[%c0_74, %c4_75, %c0_76] : memref<8x20x128xf32, #tpu.memory_space<vmem>>, vector<8x16x128xf32>
    %72 = vector.shape_cast %71 : vector<8x16x128xf32> to vector<128x128xf32>
    %73 = tpu.concatenate %64, %66, %68, %70, %72 in 1 : vector<128x128xf32>, vector<128x128xf32>, vector<128x128xf32>, vector<128x128xf32>, vector<128x128xf32> -> vector<128x640xf32>
    %74 = arith.truncf %73 : vector<128x640xf32> to vector<128x640xbf16>
    %cst_77 = arith.constant dense<0.000000e+00> : vector<128x128xf32>
    %75 = tpu.matmul %74, %60, %cst_77 {dimension_numbers = #tpu.dot_dimension_numbers<[1], [0], [0], [1], [0, 0, 1, 1], [], []>} : vector<128x640xbf16>, vector<640x128xbf16>, vector<128x128xf32> -> vector<128x128xf32>
    %76 = vector.broadcast %62 : vector<1x128xf32> to vector<128x128xf32>
    %77 = arith.addf %75, %76 : vector<128x128xf32>
    %cst_78 = arith.constant 0.000000e+00 : f32
    %78 = vector.broadcast %cst_78 : f32 to vector<128x128xf32>
    %79 = arith.maximumf %77, %78 : vector<128x128xf32>
    %80 = vector.shape_cast %79 : vector<128x128xf32> to vector<8x16x128xf32>
    %c0_79 = arith.constant 0 : index
    %c2_80 = arith.constant 2 : index
    %c0_81 = arith.constant 0 : index
    %81 = vector.load %arg12[%c0_79, %c2_80, %c0_81] : memref<8x20x128xf32, #tpu.memory_space<vmem>>, vector<8x16x128xf32>
    tpu.vector_store %arg12[%c0_79, %c2_80, %c0_81], %80 {strides = array<i32>} : memref<8x20x128xf32, #tpu.memory_space<vmem>>, vector<8x16x128xf32>,
    %c2_82 = arith.constant 2 : index
    %c0_83 = arith.constant 0 : index
    %c0_84 = arith.constant 0 : index
    %82 = vector.load %arg5[%c2_82, %c0_83, %c0_84] : memref<4x640x128xbf16, #tpu.memory_space<vmem>>, vector<1x640x128xbf16>
    %83 = vector.shape_cast %82 : vector<1x640x128xbf16> to vector<640x128xbf16>
    %c2_85 = arith.constant 2 : index
    %c0_86 = arith.constant 0 : index
    %c0_87 = arith.constant 0 : index
    %84 = vector.load %arg6[%c2_85, %c0_86, %c0_87] : memref<4x1x128xf32, #tpu.memory_space<vmem>>, vector<1x1x128xf32>
    %85 = vector.shape_cast %84 : vector<1x1x128xf32> to vector<1x128xf32>
    %c0_88 = arith.constant 0 : index
    %c0_89 = arith.constant 0 : index
    %c0_90 = arith.constant 0 : index
    %86 = vector.load %arg12[%c0_88, %c0_89, %c0_90] : memref<8x20x128xf32, #tpu.memory_space<vmem>>, vector<8x16x128xf32>
    %87 = vector.shape_cast %86 : vector<8x16x128xf32> to vector<128x128xf32>
    %c0_91 = arith.constant 0 : index
    %c1_92 = arith.constant 1 : index
    %c0_93 = arith.constant 0 : index
    %88 = vector.load %arg12[%c0_91, %c1_92, %c0_93] : memref<8x20x128xf32, #tpu.memory_space<vmem>>, vector<8x16x128xf32>
    %89 = vector.shape_cast %88 : vector<8x16x128xf32> to vector<128x128xf32>
    %c0_94 = arith.constant 0 : index
    %c2_95 = arith.constant 2 : index
    %c0_96 = arith.constant 0 : index
    %90 = vector.load %arg12[%c0_94, %c2_95, %c0_96] : memref<8x20x128xf32, #tpu.memory_space<vmem>>, vector<8x16x128xf32>
    %91 = vector.shape_cast %90 : vector<8x16x128xf32> to vector<128x128xf32>
    %c0_97 = arith.constant 0 : index
    %c3_98 = arith.constant 3 : index
    %c0_99 = arith.constant 0 : index
    %92 = vector.load %arg12[%c0_97, %c3_98, %c0_99] : memref<8x20x128xf32, #tpu.memory_space<vmem>>, vector<8x16x128xf32>
    %93 = vector.shape_cast %92 : vector<8x16x128xf32> to vector<128x128xf32>
    %c0_100 = arith.constant 0 : index
    %c4_101 = arith.constant 4 : index
    %c0_102 = arith.constant 0 : index
    %94 = vector.load %arg12[%c0_100, %c4_101, %c0_102] : memref<8x20x128xf32, #tpu.memory_space<vmem>>, vector<8x16x128xf32>
    %95 = vector.shape_cast %94 : vector<8x16x128xf32> to vector<128x128xf32>
    %96 = tpu.concatenate %87, %89, %91, %93, %95 in 1 : vector<128x128xf32>, vector<128x128xf32>, vector<128x128xf32>, vector<128x128xf32>, vector<128x128xf32> -> vector<128x640xf32>
    %97 = arith.truncf %96 : vector<128x640xf32> to vector<128x640xbf16>
    %cst_103 = arith.constant dense<0.000000e+00> : vector<128x128xf32>
    %98 = tpu.matmul %97, %83, %cst_103 {dimension_numbers = #tpu.dot_dimension_numbers<[1], [0], [0], [1], [0, 0, 1, 1], [], []>} : vector<128x640xbf16>, vector<640x128xbf16>, vector<128x128xf32> -> vector<128x128xf32>
    %99 = vector.broadcast %85 : vector<1x128xf32> to vector<128x128xf32>
    %100 = arith.addf %98, %99 : vector<128x128xf32>
    %cst_104 = arith.constant 0.000000e+00 : f32
    %101 = vector.broadcast %cst_104 : f32 to vector<128x128xf32>
    %102 = arith.maximumf %100, %101 : vector<128x128xf32>
    %103 = vector.shape_cast %102 : vector<128x128xf32> to vector<8x16x128xf32>
    %c0_105 = arith.constant 0 : index
    %c2_106 = arith.constant 2 : index
    %c0_107 = arith.constant 0 : index
    %104 = vector.load %arg12[%c0_105, %c2_106, %c0_107] : memref<8x20x128xf32, #tpu.memory_space<vmem>>, vector<8x16x128xf32>
    tpu.vector_store %arg12[%c0_105, %c2_106, %c0_107], %103 {strides = array<i32>} : memref<8x20x128xf32, #tpu.memory_space<vmem>>, vector<8x16x128xf32>,
    %c3_108 = arith.constant 3 : index
    %c0_109 = arith.constant 0 : index
    %c0_110 = arith.constant 0 : index
    %105 = vector.load %arg5[%c3_108, %c0_109, %c0_110] : memref<4x640x128xbf16, #tpu.memory_space<vmem>>, vector<1x640x128xbf16>
    %106 = vector.shape_cast %105 : vector<1x640x128xbf16> to vector<640x128xbf16>
    %c3_111 = arith.constant 3 : index
    %c0_112 = arith.constant 0 : index
    %c0_113 = arith.constant 0 : index
    %107 = vector.load %arg6[%c3_111, %c0_112, %c0_113] : memref<4x1x128xf32, #tpu.memory_space<vmem>>, vector<1x1x128xf32>
    %108 = vector.shape_cast %107 : vector<1x1x128xf32> to vector<1x128xf32>
    %c0_114 = arith.constant 0 : index
    %c0_115 = arith.constant 0 : index
    %c0_116 = arith.constant 0 : index
    %109 = vector.load %arg12[%c0_114, %c0_115, %c0_116] : memref<8x20x128xf32, #tpu.memory_space<vmem>>, vector<8x16x128xf32>
    %110 = vector.shape_cast %109 : vector<8x16x128xf32> to vector<128x128xf32>
    %c0_117 = arith.constant 0 : index
    %c1_118 = arith.constant 1 : index
    %c0_119 = arith.constant 0 : index
    %111 = vector.load %arg12[%c0_117, %c1_118, %c0_119] : memref<8x20x128xf32, #tpu.memory_space<vmem>>, vector<8x16x128xf32>
    %112 = vector.shape_cast %111 : vector<8x16x128xf32> to vector<128x128xf32>
    %c0_120 = arith.constant 0 : index
    %c2_121 = arith.constant 2 : index
    %c0_122 = arith.constant 0 : index
    %113 = vector.load %arg12[%c0_120, %c2_121, %c0_122] : memref<8x20x128xf32, #tpu.memory_space<vmem>>, vector<8x16x128xf32>
    %114 = vector.shape_cast %113 : vector<8x16x128xf32> to vector<128x128xf32>
    %c0_123 = arith.constant 0 : index
    %c3_124 = arith.constant 3 : index
    %c0_125 = arith.constant 0 : index
    %115 = vector.load %arg12[%c0_123, %c3_124, %c0_125] : memref<8x20x128xf32, #tpu.memory_space<vmem>>, vector<8x16x128xf32>
    %116 = vector.shape_cast %115 : vector<8x16x128xf32> to vector<128x128xf32>
    %c0_126 = arith.constant 0 : index
    %c4_127 = arith.constant 4 : index
    %c0_128 = arith.constant 0 : index
    %117 = vector.load %arg12[%c0_126, %c4_127, %c0_128] : memref<8x20x128xf32, #tpu.memory_space<vmem>>, vector<8x16x128xf32>
    %118 = vector.shape_cast %117 : vector<8x16x128xf32> to vector<128x128xf32>
    %119 = tpu.concatenate %110, %112, %114, %116, %118 in 1 : vector<128x128xf32>, vector<128x128xf32>, vector<128x128xf32>, vector<128x128xf32>, vector<128x128xf32> -> vector<128x640xf32>
    %120 = arith.truncf %119 : vector<128x640xf32> to vector<128x640xbf16>
    %cst_129 = arith.constant dense<0.000000e+00> : vector<128x128xf32>
    %121 = tpu.matmul %120, %106, %cst_129 {dimension_numbers = #tpu.dot_dimension_numbers<[1], [0], [0], [1], [0, 0, 1, 1], [], []>} : vector<128x640xbf16>, vector<640x128xbf16>, vector<128x128xf32> -> vector<128x128xf32>
    %122 = vector.broadcast %108 : vector<1x128xf32> to vector<128x128xf32>
    %123 = arith.addf %121, %122 : vector<128x128xf32>
    %cst_130 = arith.constant 0.000000e+00 : f32
    %124 = vector.broadcast %cst_130 : f32 to vector<128x128xf32>
    %125 = arith.maximumf %123, %124 : vector<128x128xf32>
    %126 = vector.shape_cast %125 : vector<128x128xf32> to vector<8x16x128xf32>
    %c0_131 = arith.constant 0 : index
    %c2_132 = arith.constant 2 : index
    %c0_133 = arith.constant 0 : index
    %127 = vector.load %arg12[%c0_131, %c2_132, %c0_133] : memref<8x20x128xf32, #tpu.memory_space<vmem>>, vector<8x16x128xf32>
    tpu.vector_store %arg12[%c0_131, %c2_132, %c0_133], %126 {strides = array<i32>} : memref<8x20x128xf32, #tpu.memory_space<vmem>>, vector<8x16x128xf32>,
    %c0_134 = arith.constant 0 : index
    %c0_135 = arith.constant 0 : index
    %128 = vector.load %arg7[%c0_134, %c0_135] : memref<640x256xbf16, #tpu.memory_space<vmem>>, vector<640x256xbf16>
    %c0_136 = arith.constant 0 : index
    %c0_137 = arith.constant 0 : index
    %129 = vector.load %arg8[%c0_136, %c0_137] : memref<1x256xf32, #tpu.memory_space<vmem>>, vector<1x256xf32>
    %c0_138 = arith.constant 0 : index
    %c0_139 = arith.constant 0 : index
    %c0_140 = arith.constant 0 : index
    %130 = vector.load %arg12[%c0_138, %c0_139, %c0_140] : memref<8x20x128xf32, #tpu.memory_space<vmem>>, vector<8x16x128xf32>
    %131 = vector.shape_cast %130 : vector<8x16x128xf32> to vector<128x128xf32>
    %c0_141 = arith.constant 0 : index
    %c1_142 = arith.constant 1 : index
    %c0_143 = arith.constant 0 : index
    %132 = vector.load %arg12[%c0_141, %c1_142, %c0_143] : memref<8x20x128xf32, #tpu.memory_space<vmem>>, vector<8x16x128xf32>
    %133 = vector.shape_cast %132 : vector<8x16x128xf32> to vector<128x128xf32>
    %c0_144 = arith.constant 0 : index
    %c2_145 = arith.constant 2 : index
    %c0_146 = arith.constant 0 : index
    %134 = vector.load %arg12[%c0_144, %c2_145, %c0_146] : memref<8x20x128xf32, #tpu.memory_space<vmem>>, vector<8x16x128xf32>
    %135 = vector.shape_cast %134 : vector<8x16x128xf32> to vector<128x128xf32>
    %c0_147 = arith.constant 0 : index
    %c3_148 = arith.constant 3 : index
    %c0_149 = arith.constant 0 : index
    %136 = vector.load %arg12[%c0_147, %c3_148, %c0_149] : memref<8x20x128xf32, #tpu.memory_space<vmem>>, vector<8x16x128xf32>
    %137 = vector.shape_cast %136 : vector<8x16x128xf32> to vector<128x128xf32>
    %c0_150 = arith.constant 0 : index
    %c4_151 = arith.constant 4 : index
    %c0_152 = arith.constant 0 : index
    %138 = vector.load %arg12[%c0_150, %c4_151, %c0_152] : memref<8x20x128xf32, #tpu.memory_space<vmem>>, vector<8x16x128xf32>
    %139 = vector.shape_cast %138 : vector<8x16x128xf32> to vector<128x128xf32>
    %140 = tpu.concatenate %131, %133, %135, %137, %139 in 1 : vector<128x128xf32>, vector<128x128xf32>, vector<128x128xf32>, vector<128x128xf32>, vector<128x128xf32> -> vector<128x640xf32>
    %141 = arith.truncf %140 : vector<128x640xf32> to vector<128x640xbf16>
    %cst_153 = arith.constant dense<0.000000e+00> : vector<128x256xf32>
    %142 = tpu.matmul %141, %128, %cst_153 {dimension_numbers = #tpu.dot_dimension_numbers<[1], [0], [0], [1], [0, 0, 1, 1], [], []>} : vector<128x640xbf16>, vector<640x256xbf16>, vector<128x256xf32> -> vector<128x256xf32>
    %143 = vector.broadcast %129 : vector<1x256xf32> to vector<128x256xf32>
    %144 = arith.addf %142, %143 : vector<128x256xf32>
    %cst_154 = arith.constant 0.000000e+00 : f32
    %145 = vector.broadcast %cst_154 : f32 to vector<128x256xf32>
    %146 = arith.maximumf %144, %145 : vector<128x256xf32>
    %147 = arith.truncf %146 : vector<128x256xf32> to vector<128x256xbf16>
    %c0_155 = arith.constant 0 : index
    %c0_156 = arith.constant 0 : index
    %148 = vector.load %arg9[%c0_155, %c0_156] : memref<256x12xbf16, #tpu.memory_space<vmem>>, vector<256x12xbf16>
    %cst_157 = arith.constant dense<0.000000e+00> : vector<128x12xf32>
    %149 = tpu.matmul %147, %148, %cst_157 {dimension_numbers = #tpu.dot_dimension_numbers<[1], [0], [0], [1], [0, 0, 1, 1], [], []>} : vector<128x256xbf16>, vector<256x12xbf16>, vector<128x12xf32> -> vector<128x12xf32>
    %c0_158 = arith.constant 0 : index
    %c0_159 = arith.constant 0 : index
    %150 = vector.load %arg10[%c0_158, %c0_159] : memref<1x12xf32, #tpu.memory_space<vmem>>, vector<1x12xf32>
    %151 = vector.broadcast %150 : vector<1x12xf32> to vector<128x12xf32>
    %152 = arith.addf %149, %151 : vector<128x12xf32>
    %cst_160 = arith.constant dense<0xFF800000> : vector<128xf32>
    %153 = vector.multi_reduction <maximumf>, %152, %cst_160 [1] : vector<128x12xf32> to vector<128xf32>
    %154 = vector.shape_cast %153 : vector<128xf32> to vector<128x1xf32>
    %155 = vector.broadcast %154 : vector<128x1xf32> to vector<128x12xf32>
    %156 = arith.subf %152, %155 : vector<128x12xf32>
    %157 = math.exp %156 : vector<128x12xf32>
    %cst_161 = arith.constant dense<0.000000e+00> : vector<128xf32>
    %158 = vector.multi_reduction <add>, %157, %cst_161 [1] : vector<128x12xf32> to vector<128xf32>
    %159 = vector.shape_cast %158 : vector<128xf32> to vector<128x1xf32>
    %160 = math.log %159 : vector<128x1xf32>
    %161 = arith.addf %160, %154 : vector<128x1xf32>
    %162 = vector.broadcast %161 : vector<128x1xf32> to vector<128x12xf32>
    %163 = arith.subf %152, %162 : vector<128x12xf32>
    %164 = vector.shape_cast %163 : vector<128x12xf32> to vector<8x16x12xf32>
    %c0_162 = arith.constant 0 : index
    %c0_163 = arith.constant 0 : index
    %c0_164 = arith.constant 0 : index
    %165 = vector.load %arg11[%c0_162, %c0_163, %c0_164] : memref<8x16x12xf32, #tpu.memory_space<vmem>>, vector<8x16x12xf32>
    tpu.vector_store %arg11[%c0_162, %c0_163, %c0_164], %164 {strides = array<i32>} : memref<8x16x12xf32, #tpu.memory_space<vmem>>, vector<8x16x12xf32>,
    return
  }
  func.func @transform_0(%arg0: i32) -> (i32, i32) {
    %c0_i32 = arith.constant 0 : i32
    %c0_i32_0 = arith.constant 0 : i32
    return %arg0, %c0_i32 : i32, i32
  }
  func.func @transform_1(%arg0: i32) -> (i32, i32) {
    %c0_i32 = arith.constant 0 : i32
    %c0_i32_0 = arith.constant 0 : i32
    %c0_i32_1 = arith.constant 0 : i32
    return %c0_i32, %c0_i32_0 : i32, i32
  }
  func.func @transform_2(%arg0: i32) -> (i32, i32) {
    %c0_i32 = arith.constant 0 : i32
    %c0_i32_0 = arith.constant 0 : i32
    %c0_i32_1 = arith.constant 0 : i32
    return %c0_i32, %c0_i32_0 : i32, i32
  }
  func.func @transform_3(%arg0: i32) -> (i32, i32) {
    %c0_i32 = arith.constant 0 : i32
    %c0_i32_0 = arith.constant 0 : i32
    %c0_i32_1 = arith.constant 0 : i32
    return %c0_i32, %c0_i32_0 : i32, i32
  }
  func.func @transform_4(%arg0: i32) -> (i32, i32, i32) {
    %c0_i32 = arith.constant 0 : i32
    %c0_i32_0 = arith.constant 0 : i32
    %c0_i32_1 = arith.constant 0 : i32
    %c0_i32_2 = arith.constant 0 : i32
    return %c0_i32, %c0_i32_0, %c0_i32_1 : i32, i32, i32
  }
  func.func @transform_5(%arg0: i32) -> (i32, i32, i32) {
    %c0_i32 = arith.constant 0 : i32
    %c0_i32_0 = arith.constant 0 : i32
    %c0_i32_1 = arith.constant 0 : i32
    %c0_i32_2 = arith.constant 0 : i32
    return %c0_i32, %c0_i32_0, %c0_i32_1 : i32, i32, i32
  }
  func.func @transform_6(%arg0: i32) -> (i32, i32) {
    %c0_i32 = arith.constant 0 : i32
    %c0_i32_0 = arith.constant 0 : i32
    %c0_i32_1 = arith.constant 0 : i32
    return %c0_i32, %c0_i32_0 : i32, i32
  }
  func.func @transform_7(%arg0: i32) -> (i32, i32) {
    %c0_i32 = arith.constant 0 : i32
    %c0_i32_0 = arith.constant 0 : i32
    %c0_i32_1 = arith.constant 0 : i32
    return %c0_i32, %c0_i32_0 : i32, i32
  }
  func.func @transform_8(%arg0: i32) -> (i32, i32) {
    %c0_i32 = arith.constant 0 : i32
    %c0_i32_0 = arith.constant 0 : i32
    %c0_i32_1 = arith.constant 0 : i32
    return %c0_i32, %c0_i32_0 : i32, i32
  }
  func.func @transform_9(%arg0: i32) -> (i32, i32) {
    %c0_i32 = arith.constant 0 : i32
    %c0_i32_0 = arith.constant 0 : i32
    %c0_i32_1 = arith.constant 0 : i32
    return %c0_i32, %c0_i32_0 : i32, i32
  }
  func.func @transform_10(%arg0: i32) -> (i32, i32, i32) {
    %c0_i32 = arith.constant 0 : i32
    %c0_i32_0 = arith.constant 0 : i32
    %c0_i32_1 = arith.constant 0 : i32
    return %arg0, %c0_i32, %c0_i32_0 : i32, i32, i32
  }
}

</mosaic_0001>

<bundles_post_ra>
// kernel: tpu_custom_call.1
= control target key start
LH: loop header
LB: loop body
LE: loop exit
PB: predicated region body
PF: predicated region fallthrough
CT: control target
= control target key end

     0   :  { %15 = vsyncpa [#allocation4], 0  ;;  %s9953_s0 = inlined_call_operand.vmem [shape: s32[16,16], index: 0, kind: input, shape index: {}]   ;;  %s9954_s1 = inlined_call_operand.vmem [shape: bf16[32,128], index: 1, kind: input, shape index: {}]   ;;  %s9955_s2 = inlined_call_operand.hbm [shape: bf16[640,128], index: 2, kind: input, shape index: {}]   ;;  %s9956_s3 = inlined_call_operand.vmem [shape: f32[1,128], index: 3, kind: input, shape index: {}]   ;;  %s9957_s4 = inlined_call_operand.hbm [shape: bf16[4,640,128], index: 4, kind: input, shape index: {}]   ;;  %s9958_s5 = inlined_call_operand.vmem [shape: f32[4,1,128], index: 5, kind: input, shape index: {}]   ;;  %s9959_s6 = inlined_call_operand.hbm [shape: bf16[640,256], index: 6, kind: input, shape index: {}]   ;;  %s9960_s7 = inlined_call_operand.vmem [shape: f32[1,256], index: 7, kind: input, shape index: {}]   ;;  %s9961_s8 = inlined_call_operand.vmem [shape: bf16[256,12], index: 8, kind: input, shape index: {}]   ;;  %s9962_s9 = inlined_call_operand.vmem [shape: f32[1,12], index: 9, kind: input, shape index: {}]   ;;  %s9963_s10 = inlined_call_operand.vmem [shape: f32[16,16,12], index: 10, kind: output, shape index: {}]  }
   0x1   :  { %16 = vsyncpa [#allocation6], 0  ;;  %s8076_s13 = smov 0  }
   0x2 LB: > { %s8082_s14 = sadd.s32 4294967295, %s8010_s13   ;;  %p6133_p0 = scmp.ge.s32.totalorder %s8010_s13, 1  ;;  %s8010_s13 = sphi %s8076_s13, %s22_s13  }
   0x3   : > { %p268_p1 = scmp.lt.s32.totalorder %s8010_s13, 3  ;;  %p7492_p2 = scmp.eq.s32.totalorder %s8082_s14, 0 }
   0x4   : > { %s8012_s16 = smov [#allocation5]   ;;  %s8013_s18 = smov [#allocation3]  }
   0x5   : > { %p8087_p3 = pnand %p6133_p0, %p268_p1  ;;  %s299_s17 = sshll.u32 %s8012_s16, 4  ;;  %s300_s17 = int_to_ptr.vmem [resolvable:$true] %s299_s17 }
   0x6   : > { %s283_s19 = sshll.u32 %s8013_s18, 4  ;;  %s8014_s21 = smov [#allocation7]   ;;  %s8093_s19 = int_to_ptr.vmem [resolvable:$true] %s283_s19 }
   0x7   : > { %p7482_p4 = pneg %p8087_p3  ;;  %s315_s22 = sshll.u32 %s8014_s21, 4  ;;  %s8101_s22 = int_to_ptr.vmem [resolvable:$true] %s315_s22 }
   0x8   : > { %s7929_s23 = scalar_lea.vmem %s300_s17, 20480  ;;  %p7937_p10 = scmp.lt.s32.totalorder %s300_s17, %s300_s17 }
   0x9   : > { %p8097_p5 = pnand %p7492_p2, %p7482_p4  ;;  %p7930_p7 = scmp.ne.s32.totalorder %s300_s17, %s7929_s23 }
   0xa   : > { %p7938_p11 = scmp.lt.s32.totalorder %s7929_s23, %s7929_s23 }
   0xb   : > { %p7920_p6 = pneg %p8097_p5 }
   0xc   : > { %p7939_p12 = por %p7938_p11, %p7937_p10 }
   0xd   : > { %p7932_p8 = pnand %p7930_p7, %p7920_p6 }
   0xf   : > { %p7933_p9 = pneg %p7932_p8 }
  0x11   : > { %p7940_p13 = pnand %p7939_p12, %p7933_p9 }
  0x13   : > { %7943 = shalt.err (!%p7940_p13)
}
  0x14   : > { %s8015_s24 = smov 64   ;;  %s8016_s25 = smov 4  }
  0x15   : > { %7488 = dma.hbm_to_vmem [thread:$0]  (!%p8097_p5), %s9957_s4, 20480, %s300_s17, [#allocation6], %s8015_s24, %s8015_s24, %s8016_s25  }
  0x16   : > { %s7955_s28 = scalar_lea.vmem %s8093_s19, 5120  ;;  %p7963_p7 = scmp.lt.s32.totalorder %s8093_s19, %s8093_s19 }
  0x17   : > { %p7956_p0 = scmp.ne.s32.totalorder %s8093_s19, %s7955_s28  ;;  %p7964_p8 = scmp.lt.s32.totalorder %s7955_s28, %s7955_s28 }
  0x19   : > { %p7958_p1 = pnand %p7956_p0, %p7920_p6  ;;  %p7965_p9 = por %p7964_p8, %p7963_p7 }
  0x1b   : > { %p7959_p4 = pneg %p7958_p1 }
  0x1d   : > { %p7966_p10 = pnand %p7965_p9, %p7959_p4 }
  0x1f   : > { %7969 = shalt.err (!%p7966_p10)
}
  0x20   : > { %7485 = dma.hbm_to_vmem [thread:$0]  (!%p8097_p5), %s9955_s2, 5120, %s8093_s19, [#allocation4], %s8015_s24, %s8015_s24, %s8016_s25  }
  0x21   : > { %s7981_s11 = scalar_lea.vmem %s8101_s22, 10240  ;;  %p7989_p0 = scmp.lt.s32.totalorder %s8101_s22, %s8101_s22 }
  0x22   : > { %p7982_p11 = scmp.ne.s32.totalorder %s8101_s22, %s7981_s11  ;;  %p7990_p1 = scmp.lt.s32.totalorder %s7981_s11, %s7981_s11 }
  0x24   : > { %p7984_p12 = pnand %p7982_p11, %p7920_p6  ;;  %p7991_p4 = por %p7990_p1, %p7989_p0 }
  0x26   : > { %p7985_p13 = pneg %p7984_p12 }
  0x28   : > { %p7992_p7 = pnand %p7991_p4, %p7985_p13 }
  0x2a   : > { %7995 = shalt.err (!%p7992_p7)
}
  0x2b   : > { %s8017_s12 = smov 128   ;;  %s8018_s16 = smov 8  }
  0x2c   : > { %7491 = dma.hbm_to_vmem [thread:$0]  (!%p8097_p5), %s9959_s6, 10240, %s8101_s22, [#allocation6], %s8017_s12, %s8017_s12, %s8018_s16  }
  0x2d   : > { %347 = sbr.rel (%p8087_p3) target bundleno = 2621 (0xa3d), region = 60 }
  0x32   : > { %8001 = dma.done.wait (%p7492_p2), [#allocation4], 5120  }
  0x33   : > { %8003 = vsyncadd (%p7492_p2), [#allocation4], 4294962176 }
  0x34   : > { %8005 = dma.done.wait (%p7492_p2), [#allocation6], 30720  }
  0x35   : > { %8007 = vsyncadd (%p7492_p2), [#allocation6], 4294936576  ;;  %p393_p6 = scmp.lt.s32.totalorder %s8082_s14, 1  ;;  %v430_v0 = vlaneseq  ;;  %v8019_v1 = vmov 0.0   ;;  %v7515_v12 = vld [vmem:[%s9954_s1 + $0x8] sm:$0xff]   ;;  %v7516_v14 = vld [vmem:[%s9954_s1] sm:$0xff]  }
  0x36   : > { %405 = vst [vmem:[#allocation2] sm:$0xff] %v8019_v1  ;;  %406 = vst [vmem:[#allocation2 + $0x8] sm:$0xff] %v8019_v1  ;;  %7274 = vmatprep.subr.bf16.mxu0 %v7515_v12  ;;  %v7517_v21 = vld [vmem:[#allocation3 + $0x78] sm:$0xff]   ;;  %v7519_v24 = vld [vmem:[#allocation3 + $0x70] sm:$0xff]   ;;  %vm592_vm0 = vcmask 261120  }
  0x37   : > { %407 = vst [vmem:[#allocation2 + $0x10] sm:$0xf] %v8019_v1  ;;  %408 = vst [vmem:[#allocation2 + $0x18] sm:$0xff] %v8019_v1  ;;  %s394_s15 = scalar_select %p393_p6, %s8082_s14, 1  ;;  %v8178_v2 = vshrl.u32 %v430_v0, 7  ;;  %7275 = vmatpush3.bf16.msra.mxu0 %v7515_v12  ;;  %v7518_v22 = vld [vmem:[#allocation3 + $0x38] sm:$0xff]   ;;  %7454 = vmatprep.subr.bf16.mxu1 %v7517_v21 }
  0x38   : > { %409 = vst [vmem:[#allocation2 + $0x20] sm:$0xff] %v8019_v1  ;;  %410 = vst [vmem:[#allocation2 + $0x28] sm:$0xf] %v8019_v1  ;;  %7276 = vmatprep.subr.bf16.mxu0 %v7516_v14  ;;  %v8202_v23 = vand.u32 127, %v430_v0  ;;  %v7520_v25 = vld [vmem:[#allocation3 + $0x30] sm:$0xff]   ;;  %7462 = vmatpush3.bf16.msra.mxu1 %v7518_v22  ;;  %v7521_v27 = vld [vmem:[#allocation3 + $0x68] sm:$0xff]  }
  0x39   : > { %411 = vst [vmem:[#allocation2 + $0x30] sm:$0xff] %v8019_v1  ;;  %412 = vst [vmem:[#allocation2 + $0x38] sm:$0xff] %v8019_v1  ;;  %s6142_s19 = sshll.u32 %s394_s15, 3  ;;  %v9964_v3 = vsub.s32 1, %v8178_v2  ;;  %v9965_v4 = vsub.s32 0, %v8178_v2  ;;  %v456_v6 = vsub.s32 2, %v8178_v2  ;;  %7455 = vmatprep.subr.bf16.mxu1 %v7519_v24 }
  0x3a   : > { %413 = vst [vmem:[#allocation2 + $0x40] sm:$0xf] %v8019_v1  ;;  %414 = vst [vmem:[#allocation2 + $0x48] sm:$0xff] %v8019_v1  ;;  %s396_s22 = scalar_lea.vmem %s9953_s0, %s6142_s19  ;;  %v467_v7 = vsub.s32 3, %v8178_v2  ;;  %v478_v8 = vsub.s32 4, %v8178_v2  ;;  %v489_v11 = vsub.s32 5, %v8178_v2 }
  0x3b   : > { %415 = vst [vmem:[#allocation2 + $0x50] sm:$0xff] %v8019_v1  ;;  %416 = vst [vmem:[#allocation2 + $0x58] sm:$0xf] %v8019_v1  ;;  %v429_v5 = vld [vmem:[%s396_s22] sm:$0xff]  ;;  %v500_v13 = vsub.s32 6, %v8178_v2  ;;  %7277 = vmatpush3.bf16.msra.mxu0 %v7516_v14  ;;  %v511_v20 = vsub.s32 7, %v8178_v2 }
  0x3c   : > { %417 = vst [vmem:[#allocation2 + $0x60] sm:$0xff] %v8019_v1  ;;  %418 = vst [vmem:[#allocation2 + $0x68] sm:$0xff] %v8019_v1  ;;  %v446_v9 = vrot.slane %v429_v5, %v9964_v3  ;;  %v435_v10 = vrot.slane %v429_v5, %v9965_v4  ;;  %v457_v15 = vrot.slane %v429_v5, %v456_v6  ;;  %6490 = vmatprep.subr.bf16.mxu0 %v7517_v21  ;;  %v7522_v28 = vld [vmem:[#allocation3 + $0x28] sm:$0xff]   ;;  %v7523_v29 = vld [vmem:[#allocation3 + $0x60] sm:$0xff]   ;;  %s6143_s19 = sshll.u32 %s8082_s14, 3 }
  0x3d   : > { %419 = vst [vmem:[#allocation2 + $0x70] sm:$0xf] %v8019_v1  ;;  %420 = vst [vmem:[#allocation2 + $0x78] sm:$0xff] %v8019_v1  ;;  %v468_v16 = vrot.slane %v429_v5, %v467_v7  ;;  %v479_v17 = vrot.slane %v429_v5, %v478_v8  ;;  %v490_v18 = vrot.slane %v429_v5, %v489_v11  ;;  %7463 = vmatpush3.bf16.msra.mxu1 %v7520_v25  ;;  %v7524_v30 = vld [vmem:[#allocation3 + $0x20] sm:$0xff]   ;;  %v7525_v11 = vld [vmem:[#allocation3 + $0x58] sm:$0xff]   ;;  %p398_p2 = scmp.lt.s32.totalorder %s6143_s19, 15 }
  0x3e   : > { %421 = vst [vmem:[#allocation2 + $0x80] sm:$0xff] %v8019_v1  ;;  %422 = vst [vmem:[#allocation2 + $0x88] sm:$0xf] %v8019_v1  ;;  %448 = vbcast.lane.b32.xlu1 %v446_v9, 256  ;;  %437 = vbcast.lane.b32.xlu0 %v435_v10, 256  ;;  %v501_v19 = vrot.slane %v429_v5, %v500_v13  ;;  %v512_v26 = vrot.slane %v429_v5, %v511_v20  ;;  %v7917_v58 = vld [vmem:[#allocation2] sm:$0xff] }
  0x3f   : > { %423 = vst [vmem:[#allocation2 + $0x90] sm:$0xff] %v8019_v1  ;;  %424 = vst [vmem:[#allocation2 + $0x98] sm:$0xff] %v8019_v1  ;;  %7456 = vmatprep.subr.bf16.mxu1 %v7521_v27  ;;  %v7526_v12 = vld [vmem:[#allocation3 + $0x18] sm:$0xff]   ;;  %v7527_v13 = vld [vmem:[#allocation3 + $0x50] sm:$0xff]   ;;  %s10020_s19 = smov (!%p398_p2, %s6143_s19), 15 }
  0x40   : > { %425 = vst [vmem:[#allocation2 + $0xa0] sm:$0xf] %v8019_v1  ;;  %426 = vst [vmem:[#allocation2 + $0xa8] sm:$0xff] %v8019_v1  ;;  %v7528_v14 = vld [vmem:[#allocation3 + $0x10] sm:$0xff]   ;;  %v8238_v20 = vld [vmem:[#allocation3 + $0x138] sm:$0xff]   ;;  %s6479_s20 = sshll.u32 %s10020_s19, 4 }
  0x41   : > { %427 = vst [vmem:[#allocation2 + $0xb0] sm:$0xff] %v8019_v1  ;;  %428 = vst [vmem:[#allocation2 + $0xb8] sm:$0xf] %v8019_v1  ;;  %7464 = vmatpush3.bf16.msra.mxu1 %v7522_v28  ;;  %s9885_s14 = scalar_lea.vmem %s9963_s10, %s6479_s20 }
  0x42   : > { %9973 = vst [vmem:[#allocation10_spill] sm:$0xff] %v8178_v2  ;;  %452 = vbcast.lane.b32.xlu1 %v446_v9, 264  ;;  %441 = vbcast.lane.b32.xlu0 %v435_v10, 264 }
  0x43   : > { %7457 = vmatprep.subr.bf16.mxu1 %v7523_v29 }
  0x45   : > { %7465 = vmatpush3.bf16.msra.mxu1 %v7524_v30 }
  0x46   : > { %463 = vbcast.lane.b32.xlu1 %v457_v15, 264  ;;  %459 = vbcast.lane.b32.xlu0 %v457_v15, 256  ;;  %v7529_v15 = vld [vmem:[#allocation3 + $0x48] sm:$0xff]  }
  0x47   : > { %7458 = vmatprep.subr.bf16.mxu1 %v7525_v11 }
  0x49   : > { %7466 = vmatpush3.bf16.msra.mxu1 %v7526_v12 }
  0x4a   : > { %474 = vbcast.lane.b32.xlu1 %v468_v16, 264  ;;  %470 = vbcast.lane.b32.xlu0 %v468_v16, 256  ;;  %v7530_v16 = vld [vmem:[#allocation3 + $0x8] sm:$0xff]  }
  0x4b   : > { %7459 = vmatprep.subr.bf16.mxu1 %v7527_v13 }
  0x4d   : > { %7467 = vmatpush3.bf16.msra.mxu1 %v7528_v14 }
  0x4e   : > { %485 = vbcast.lane.b32.xlu1 %v479_v17, 264  ;;  %481 = vbcast.lane.b32.xlu0 %v479_v17, 256  ;;  %v7531_v17 = vld [vmem:[#allocation3 + $0x40] sm:$0xff]  }
  0x4f   : > { %7460 = vmatprep.subr.bf16.mxu1 %v7529_v15 }
  0x51   : > { %7468 = vmatpush3.bf16.msra.mxu1 %v7530_v16 }
  0x52   : > { %496 = vbcast.lane.b32.xlu1 %v490_v18, 264  ;;  %492 = vbcast.lane.b32.xlu0 %v490_v18, 256  ;;  %v7532_v18 = vld [vmem:[#allocation3] sm:$0xff]  }
  0x53   : > { %7461 = vmatprep.subr.bf16.mxu1 %v7531_v17 }
  0x55   : > { %7469 = vmatpush3.bf16.msra.mxu1 %v7532_v18 }
  0x56   : > { %507 = vbcast.lane.b32.xlu1 %v501_v19, 264  ;;  %503 = vbcast.lane.b32.xlu0 %v501_v19, 256  ;;  %v7533_v19 = vld [vmem:[#allocation3 + $0xf8] sm:$0xff]  }
  0x57   : > { %7294 = vmatprep.subr.bf16.mxu1 %v8238_v20 }
  0x5a   : > { %518 = vbcast.lane.b32.xlu1 %v512_v26, 264  ;;  %514 = vbcast.lane.b32.xlu0 %v512_v26, 256 }
  0xb0   : > { %v449_v31 = vpop.permute.xlu1 %448  ;;  %v438_v32 = vpop.permute.xlu0 %437 }
  0xb1   : > { %vm522_vm1 = vcmp.eq.s32.totalorder %v8202_v23, %v449_v31  ;;  %vm520_vm2 = vcmp.eq.s32.totalorder %v8202_v23, %v438_v32 }
  0xb2   : > { %v6148_v33 = vsel %vm522_vm1, 1.0, %v8019_v1  ;;  %v6146_v34 = vsel %vm520_vm2, 1.0, %v8019_v1 }
  0xb4   : > { %v453_v35 = vpop.permute.xlu1 %452  ;;  %v442_v36 = vpop.permute.xlu0 %441 }
  0xb5   : > { %vm523_vm3 = vcmp.eq.s32.totalorder %v8202_v23, %v453_v35  ;;  %vm521_vm4 = vcmp.eq.s32.totalorder %v8202_v23, %v442_v36  ;;  %v7534_v36 = vld [vmem:[#allocation3 + $0xb8] sm:$0xff]  }
  0xb6   : > { %v6149_v37 = vsel %vm523_vm3, 1.0, %v8019_v1  ;;  %v6147_v38 = vsel %vm521_vm4, 1.0, %v8019_v1 }
  0xb7   : > { %v569_v39 = vpack.c.bf16 %v6149_v37, %v6148_v33  ;;  %v568_v40 = vpack.c.bf16 %v6147_v38, %v6146_v34 }
  0xb8   : > { %v464_v41 = vpop.permute.xlu1 %463  ;;  %v460_v42 = vpop.permute.xlu0 %459 }
  0xb9   : > { %vm525_vm5 = vcmp.eq.s32.totalorder %v8202_v23, %v464_v41  ;;  %7278 = vmatprep.mubr.msk.bf16.mxu0 %vm592_vm0, %v568_v40  ;;  %vm524_vm6 = vcmp.eq.s32.totalorder %v8202_v23, %v460_v42  ;;  %v7536_v42 = vld [vmem:[#allocation3 + $0xb0] sm:$0xff]  }
  0xba   : > { %v6151_v43 = vsel %vm525_vm5, 1.0, %v8019_v1  ;;  %v6150_v44 = vsel %vm524_vm6, 1.0, %v8019_v1  ;;  %7279 = vmatmul.mubr.msk.bf16.vlgmr.msra.gmra.mxu0 %vm592_vm0, %v569_v39  ;;  %v7535_v39 = vld [vmem:[#allocation3 + $0xf0] sm:$0xff]  }
  0xbb   : > { %v570_v45 = vpack.c.bf16 %v6151_v43, %v6150_v44  ;;  %6491 = vmatpush3.bf16.msra.mxu0 %v7518_v22  ;;  %v7537_v44 = vld [vmem:[#allocation3 + $0xe8] sm:$0xff]  }
  0xbc   : > { %v475_v46 = vpop.permute.xlu1 %474  ;;  %v471_v47 = vpop.permute.xlu0 %470  ;;  %6492 = vmatprep.subr.bf16.mxu0 %v7519_v24 }
  0xbd   : > { %vm527_vm7 = vcmp.eq.s32.totalorder %v8202_v23, %v475_v46  ;;  %vm526_vm8 = vcmp.eq.s32.totalorder %v8202_v23, %v471_v47  ;;  %7282 = vmatprep.mubr.msk.bf16.mxu0 %vm592_vm0, %v570_v45 }
  0xbe   : > { %v6153_v48 = vsel %vm527_vm7, 1.0, %v8019_v1  ;;  %v6152_v49 = vsel %vm526_vm8, 1.0, %v8019_v1 }
  0xbf   : > { %v571_v50 = vpack.c.bf16 %v6153_v48, %v6152_v49  ;;  %6493 = vmatpush3.bf16.msra.mxu0 %v7520_v25 }
  0xc0   : > { %v486_v51 = vpop.permute.xlu1 %485  ;;  %v482_v52 = vpop.permute.xlu0 %481  ;;  %6494 = vmatprep.subr.bf16.mxu0 %v7521_v27 }
  0xc1   : > { %vm529_vm9 = vcmp.eq.s32.totalorder %v8202_v23, %v486_v51  ;;  %vm528_vm10 = vcmp.eq.s32.totalorder %v8202_v23, %v482_v52 }
  0xc2   : > { %v6155_v53 = vsel %vm529_vm9, 1.0, %v8019_v1  ;;  %v6154_v54 = vsel %vm528_vm10, 1.0, %v8019_v1  ;;  %7283 = vmatmul.mubr.msk.bf16.gmra.mxu0 %vm592_vm0, %v571_v50  ;;  %v7538_v50 = vld [vmem:[#allocation3 + $0xa8] sm:$0xff]  }
  0xc3   : > { %v572_v55 = vpack.c.bf16 %v6155_v53, %v6154_v54  ;;  %6495 = vmatpush3.bf16.msra.mxu0 %v7522_v28  ;;  %v7539_v54 = vld [vmem:[#allocation3 + $0xe0] sm:$0xff]  }
  0xc4   : > { %v497_v56 = vpop.permute.xlu1 %496  ;;  %v493_v57 = vpop.permute.xlu0 %492  ;;  %6496 = vmatprep.subr.bf16.mxu0 %v7523_v29 }
  0xc5   : > { %vm531_vm11 = vcmp.eq.s32.totalorder %v8202_v23, %v497_v56  ;;  %vm530_vm12 = vcmp.eq.s32.totalorder %v8202_v23, %v493_v57  ;;  %7286 = vmatprep.mubr.msk.bf16.mxu0 %vm592_vm0, %v572_v55  ;;  %v7540_v57 = vld [vmem:[#allocation3 + $0xa0] sm:$0xff]  }
  0xc6   : > { %v6157_v59 = vsel %vm531_vm11, 1.0, %v7917_v58  ;;  %v6156_v60 = vsel %vm530_vm12, 1.0, %v7917_v58 }
  0xc7   : > { %v573_v61 = vpack.c.bf16 %v6157_v59, %v6156_v60  ;;  %6497 = vmatpush3.bf16.msra.mxu0 %v7524_v30  ;;  %v7542_v59 = vld [vmem:[#allocation3 + $0xd8] sm:$0xff]  }
  0xc8   : > { %v508_v62 = vpop.permute.xlu1 %507  ;;  %v504_v63 = vpop.permute.xlu0 %503  ;;  %6498 = vmatprep.subr.bf16.mxu0 %v7525_v11 }
  0xc9   : > { %vm533_vm13 = vcmp.eq.s32.totalorder %v8202_v23, %v508_v62  ;;  %vm532_vm14 = vcmp.eq.s32.totalorder %v8202_v23, %v504_v63 }
  0xca   : > { %7287 = vmatmul.mubr.msk.bf16.gmra.mxu0 %vm592_vm0, %v573_v61  ;;  %v6159_v0 = vsel %vm533_vm13, 1.0, %v7917_v58  ;;  %v6158_v1 = vsel %vm532_vm14, 1.0, %v7917_v58 }
  0xcb   : > { %v574_v5 = vpack.c.bf16 %v6159_v0, %v6158_v1  ;;  %6499 = vmatpush3.bf16.msra.mxu0 %v7526_v12 }
  0xcc   : > { %v519_v6 = vpop.permute.xlu1 %518  ;;  %v515_v7 = vpop.permute.xlu0 %514  ;;  %6500 = vmatprep.subr.bf16.mxu0 %v7527_v13  ;;  %v7543_v13 = vld [vmem:[#allocation3 + $0x98] sm:$0xff]  }
  0xcd   : > { %vm535_vm15 = vcmp.eq.s32.totalorder %v8202_v23, %v519_v6  ;;  %vm534_vm1 = vcmp.eq.s32.totalorder %v8202_v23, %v515_v7  ;;  %7290 = vmatprep.mubr.msk.bf16.mxu0 %vm592_vm0, %v574_v5 }
  0xce   : > { %v6161_v8 = vsel %vm535_vm15, 1.0, %v7917_v58  ;;  %v6160_v9 = vsel %vm534_vm1, 1.0, %v7917_v58 }
  0xcf   : > { %v575_v10 = vpack.c.bf16 %v6161_v8, %v6160_v9  ;;  %6501 = vmatpush3.bf16.msra.mxu0 %v7528_v14 }
  0xd0   : > { %6502 = vmatprep.subr.bf16.mxu0 %v7529_v15 }
  0xd2   : > { %7291 = vmatmul.mubr.msk.bf16.gmra.mxu0 %vm592_vm0, %v575_v10  ;;  %vm5817_vm0 = vcmask 97280  }
  0xd3   : > { %6503 = vmatpush3.bf16.msra.mxu0 %v7530_v16  ;;  %v7544_v16 = vld [vmem:[#allocation3 + $0x130] sm:$0xff]  }
  0xd4   : > { %6504 = vmatprep.subr.bf16.mxu0 %v7531_v17  ;;  %v7545_v17 = vld [vmem:[#allocation3 + $0xd0] sm:$0xff]  }
  0xd7   : > { %6505 = vmatpush3.bf16.msra.mxu0 %v7532_v18 }
  0xd8   : > { %6554 = vmatprep.subr.bf16.mxu0 %v7533_v19  ;;  %v7546_v19 = vld [vmem:[#allocation3 + $0x90] sm:$0xff]  }
 0x17a   : > { %v8241_v21 = vpop.f32.mrf.mxu0 }
 0x17b   : > { %716 = vst [vmem:[#allocation2 + $0x1a] sm:$0xff] %v8241_v21 }
 0x17c   : > { %v8244_v22 = vpop.f32.mrf.mxu0 }
 0x17d   : > { %714 = vst [vmem:[#allocation2 + $0x2] sm:$0xff] %v8244_v22 }
 0x17e   : > { %v8247_v23 = vpop.f32.mrf.mxu0 }
 0x17f   : > { %717 = vst [vmem:[#allocation2 + $0x22] sm:$0xff] %v8247_v23 }
 0x180   : > { %v8250_v24 = vpop.f32.mrf.mxu0 }
 0x181   : > { %715 = vst [vmem:[#allocation2 + $0xa] sm:$0xff] %v8250_v24 }
 0x182   : > { %v8253_v25 = vpop.f32.mrf.mxu0  ;;  %v829_v38 = vld [vmem:[#allocation2 + $0x19] sm:$0xff] }
 0x183   : > { %720 = vst [vmem:[#allocation2 + $0x4a] sm:$0xff] %v8253_v25  ;;  %v813_v49 = vld [vmem:[#allocation2 + $0x18] sm:$0xff] }
 0x184   : > { %v8256_v26 = vpop.f32.mrf.mxu0  ;;  %v827_v28 = vld [vmem:[#allocation2 + $0x1] sm:$0xff] }
 0x185   : > { %718 = vst [vmem:[#allocation2 + $0x32] sm:$0xff] %v8256_v26  ;;  %v811_v29 = vld [vmem:[#allocation2] sm:$0xff] }
 0x186   : > { %v8259_v27 = vpop.f32.mrf.mxu0  ;;  %v830_v33 = vld [vmem:[#allocation2 + $0x21] sm:$0xff] }
 0x187   : > { %721 = vst [vmem:[#allocation2 + $0x52] sm:$0xff] %v8259_v27  ;;  %v897_v40 = vpack.c.bf16 %v830_v33, %v829_v38  ;;  %v814_v45 = vld [vmem:[#allocation2 + $0x20] sm:$0xff]  ;;  %v7548_v33 = vld [vmem:[#allocation3 + $0xc8] sm:$0xff]  }
 0x188   : > { %v812_v30 = vld [vmem:[#allocation2 + $0x8] sm:$0xff]  ;;  %v8262_v31 = vpop.f32.mrf.mxu0  ;;  %v896_v52 = vpack.c.bf16 %v814_v45, %v813_v49  ;;  %v7550_v45 = vld [vmem:[#allocation3 + $0x120] sm:$0xff]  }
 0x189   : > { %v828_v32 = vld [vmem:[#allocation2 + $0x9] sm:$0xff]  ;;  %719 = vst [vmem:[#allocation2 + $0x3a] sm:$0xff] %v8262_v31  ;;  %v891_v35 = vpack.c.bf16 %v812_v30, %v811_v29 }
 0x18a   : > { %v892_v34 = vpack.c.bf16 %v828_v32, %v827_v28  ;;  %v8265_v37 = vpop.f32.mrf.mxu0  ;;  %v833_v12 = vld [vmem:[#allocation2 + $0x49] sm:$0xff] }
 0x18b   : > { %724 = vst [vmem:[#allocation2 + $0x7a] sm:$0xff] %v8265_v37  ;;  %v7547_v28 = vld [vmem:[#allocation3 + $0x128] sm:$0xff]  }
 0x18c   : > { %1209 = vmatprep.mubr.bf16.mxu0 %v892_v34  ;;  %v8268_v41 = vpop.f32.mrf.mxu0  ;;  %v831_v53 = vld [vmem:[#allocation2 + $0x31] sm:$0xff] }
 0x18d   : > { %1210 = vmatmul.mubr.bf16.vlgmr.msra.gmra.mxu0 %v891_v35  ;;  %722 = vst [vmem:[#allocation2 + $0x62] sm:$0xff] %v8268_v41  ;;  %v815_v8 = vld [vmem:[#allocation2 + $0x30] sm:$0xff]  ;;  %v859_v35 = vld [vmem:[#allocation2 + $0x3] sm:$0xff] }
 0x18e   : > { %1217 = vmatprep.mubr.bf16.mxu0 %v897_v40  ;;  %6555 = vmatpush3.bf16.msra.mxu0 %v7534_v36  ;;  %v8271_v43 = vpop.f32.mrf.mxu0  ;;  %v834_v62 = vld [vmem:[#allocation2 + $0x51] sm:$0xff]  ;;  %v817_v36 = vld [vmem:[#allocation2 + $0x48] sm:$0xff] }
 0x18f   : > { %6556 = vmatprep.subr.bf16.mxu0 %v7535_v39  ;;  %725 = vst [vmem:[#allocation2 + $0x82] sm:$0xff] %v8271_v43  ;;  %v918_v46 = vpack.c.bf16 %v8271_v43, %v8265_v37  ;;  %v907_v14 = vpack.c.bf16 %v834_v62, %v833_v12  ;;  %v818_v30 = vld [vmem:[#allocation2 + $0x50] sm:$0xff]  ;;  %v893_v62 = vpack.c.bf16 %v8250_v24, %v8244_v22  ;;  %v7556_v24 = vld [vmem:[#allocation3 + $0x100] sm:$0xff]   ;;  %v7562_v37 = vld [vmem:[#allocation5 + $0x28] sm:$0xff]  }
 0x190   : > { %v8276_v47 = vpop.f32.mrf.mxu0  ;;  %v832_v48 = vld [vmem:[#allocation2 + $0x39] sm:$0xff]  ;;  %v860_v40 = vld [vmem:[#allocation2 + $0xb] sm:$0xff]  ;;  %v898_v22 = vpack.c.bf16 %v8247_v23, %v8241_v21  ;;  %v903_v21 = vpack.c.bf16 %v8262_v31, %v8256_v26 }
 0x191   : > { %723 = vst [vmem:[#allocation2 + $0x6a] sm:$0xff] %v8276_v47  ;;  %v902_v55 = vpack.c.bf16 %v832_v48, %v831_v53  ;;  %v816_v61 = vld [vmem:[#allocation2 + $0x38] sm:$0xff]  ;;  %v7551_v48 = vld [vmem:[#allocation3 + $0xc0] sm:$0xff]   ;;  %v894_v49 = vpack.c.bf16 %v860_v40, %v859_v35 }
 0x192   : > { %6557 = vmatpush3.bf16.msra.mxu0 %v7536_v42  ;;  %v8279_v51 = vpop.f32.mrf.mxu0  ;;  %v901_v11 = vpack.c.bf16 %v816_v61, %v815_v8  ;;  %v837_v15 = vld [vmem:[#allocation2 + $0x79] sm:$0xff] }
 0x193   : > { %6558 = vmatprep.subr.bf16.mxu0 %v7537_v44  ;;  %728 = vst [vmem:[#allocation2 + $0xaa] sm:$0xff] %v8279_v51  ;;  %v821_v38 = vld [vmem:[#allocation2 + $0x78] sm:$0xff]  ;;  %v7549_v44 = vld [vmem:[#allocation3 + $0x88] sm:$0xff]   ;;  %v7563_v43 = vld [vmem:[#allocation5 + $0x60] sm:$0xff]  }
 0x194   : > { %v8282_v56 = vpop.f32.mrf.mxu0  ;;  %v835_v60 = vld [vmem:[#allocation2 + $0x61] sm:$0xff]  ;;  %v882_v35 = vld [vmem:[#allocation2 + $0x54] sm:$0xff] }
 0x195   : > { %1218 = vmatmul.mubr.bf16.gmra.mxu0 %v896_v52  ;;  %726 = vst [vmem:[#allocation2 + $0x92] sm:$0xff] %v8282_v56  ;;  %v819_v5 = vld [vmem:[#allocation2 + $0x60] sm:$0xff]  ;;  %v7553_v52 = vld [vmem:[#allocation3 + $0x118] sm:$0xff]  }
 0x196   : > { %1225 = vmatprep.mubr.bf16.mxu0 %v902_v55  ;;  %6559 = vmatpush3.bf16.msra.mxu0 %v7538_v50  ;;  %v8285_v58 = vpop.f32.mrf.mxu0  ;;  %v838_v10 = vld [vmem:[#allocation2 + $0x81] sm:$0xff] }
 0x197   : > { %6560 = vmatprep.subr.bf16.mxu0 %v7539_v54  ;;  %729 = vst [vmem:[#allocation2 + $0xb2] sm:$0xff] %v8285_v58  ;;  %v928_v63 = vpack.c.bf16 %v8285_v58, %v8279_v51  ;;  %v917_v18 = vpack.c.bf16 %v838_v10, %v837_v15  ;;  %v822_v32 = vld [vmem:[#allocation2 + $0x80] sm:$0xff]  ;;  %v7571_v51 = vld [vmem:[#allocation5 + $0x50] sm:$0xff]   ;;  %v7573_v58 = vld [vmem:[#allocation5 + $0xe8] sm:$0xff]  }
 0x198   : > { %v8290_v0 = vpop.f32.mrf.mxu0  ;;  %v836_v1 = vld [vmem:[#allocation2 + $0x69] sm:$0xff]  ;;  %v916_v42 = vpack.c.bf16 %v822_v32, %v821_v38  ;;  %v7552_v50 = vld [vmem:[#allocation3 + $0x80] sm:$0xff]  }
 0x199   : > { %v820_v6 = vld [vmem:[#allocation2 + $0x68] sm:$0xff]  ;;  %727 = vst [vmem:[#allocation2 + $0x9a] sm:$0xff] %v8290_v0  ;;  %v912_v7 = vpack.c.bf16 %v836_v1, %v835_v60  ;;  %v861_v55 = vld [vmem:[#allocation2 + $0x1b] sm:$0xff]  ;;  %v7554_v1 = vld [vmem:[#allocation3 + $0x110] sm:$0xff]  }
 0x19a   : > { %6561 = vmatpush3.bf16.msra.mxu0 %v7540_v57  ;;  %v911_v9 = vpack.c.bf16 %v820_v6, %v819_v5  ;;  %v841_v57 = vld [vmem:[#allocation2 + $0xa9] sm:$0xff]  ;;  %v864_v12 = vld [vmem:[#allocation2 + $0x3b] sm:$0xff] }
 0x19b   : > { %6562 = vmatprep.subr.bf16.mxu0 %v7542_v59  ;;  %1241 = vmatprep.mubr.bf16.mxu1 %v912_v7  ;;  %v862_v60 = vld [vmem:[#allocation2 + $0x23] sm:$0xff]  ;;  %v884_v38 = vld [vmem:[#allocation2 + $0x6c] sm:$0xff] }
 0x19c   : > { %1242 = vmatmul.mubr.bf16.vlgmr.msra.gmra.mxu1 %v911_v9  ;;  %v839_v29 = vld [vmem:[#allocation2 + $0x91] sm:$0xff]  ;;  %v899_v6 = vpack.c.bf16 %v862_v60, %v861_v55  ;;  %v7555_v7 = vld [vmem:[#allocation3 + $0x108] sm:$0xff]   ;;  %v885_v26 = vld [vmem:[#allocation2 + $0x7c] sm:$0xff] }
 0x19d   : > { %1226 = vmatmul.mubr.bf16.gmra.mxu0 %v901_v11  ;;  %7295 = vmatpush3.bf16.msra.mxu1 %v8238_v20  ;;  %v906_v20 = vpack.c.bf16 %v818_v30, %v817_v36  ;;  %v823_v53 = vld [vmem:[#allocation2 + $0x90] sm:$0xff]  ;;  %v825_v8 = vld [vmem:[#allocation2 + $0xa8] sm:$0xff] }
 0x19e   : > { %1233 = vmatprep.mubr.bf16.mxu0 %v907_v14  ;;  %1249 = vmatprep.mubr.bf16.mxu1 %v917_v18  ;;  %v842_v59 = vld [vmem:[#allocation2 + $0xb1] sm:$0xff]  ;;  %v875_v10 = vld [vmem:[#allocation2 + $0x4] sm:$0xff] }
 0x19f   : > { %6563 = vmatpush3.bf16.msra.mxu0 %v7543_v13  ;;  %7296 = vmatprep.subr.bf16.mxu1 %v7544_v16  ;;  %v927_v5 = vpack.c.bf16 %v842_v59, %v841_v57  ;;  %v826_v9 = vld [vmem:[#allocation2 + $0xb0] sm:$0xff]  ;;  %v878_v18 = vld [vmem:[#allocation2 + $0x24] sm:$0xff] }
 0x1a0   : > { %6564 = vmatprep.subr.bf16.mxu0 %v7545_v17  ;;  %v840_v34 = vld [vmem:[#allocation2 + $0x99] sm:$0xff]  ;;  %v876_v13 = vld [vmem:[#allocation2 + $0xc] sm:$0xff]  ;;  %v926_v14 = vpack.c.bf16 %v826_v9, %v825_v8  ;;  %v883_v36 = vld [vmem:[#allocation2 + $0x64] sm:$0xff] }
 0x1a1   : > { %7297 = vmatpush3.bf16.msra.mxu1 %v7544_v16  ;;  %v922_v39 = vpack.c.bf16 %v840_v34, %v839_v29  ;;  %v824_v54 = vld [vmem:[#allocation2 + $0x98] sm:$0xff]  ;;  %v895_v16 = vpack.c.bf16 %v876_v13, %v875_v10  ;;  %v865_v29 = vld [vmem:[#allocation2 + $0x4b] sm:$0xff] }
 0x1a2   : > { %7298 = vmatprep.subr.bf16.mxu1 %v7547_v28  ;;  %v921_v61 = vpack.c.bf16 %v824_v54, %v823_v53  ;;  %v863_v11 = vld [vmem:[#allocation2 + $0x33] sm:$0xff]  ;;  %v877_v17 = vld [vmem:[#allocation2 + $0x1c] sm:$0xff]  ;;  %v868_v40 = vld [vmem:[#allocation2 + $0x6b] sm:$0xff]  ;;  %v913_v54 = vpack.c.bf16 %v8276_v47, %v8268_v41 }
 0x1a3   : > { %6565 = vmatpush3.bf16.msra.mxu0 %v7546_v19  ;;  %v904_v15 = vpack.c.bf16 %v864_v12, %v863_v11  ;;  %v879_v19 = vld [vmem:[#allocation2 + $0x34] sm:$0xff]  ;;  %v900_v32 = vpack.c.bf16 %v878_v18, %v877_v17  ;;  %v881_v34 = vld [vmem:[#allocation2 + $0x4c] sm:$0xff]  ;;  %v886_v31 = vld [vmem:[#allocation2 + $0x84] sm:$0xff] }
 0x1a4   : > { %6566 = vmatprep.subr.bf16.mxu0 %v7548_v33  ;;  %1250 = vmatmul.mubr.bf16.gmra.mxu1 %v916_v42  ;;  %v866_v30 = vld [vmem:[#allocation2 + $0x53] sm:$0xff]  ;;  %v908_v42 = vpack.c.bf16 %v8259_v27, %v8253_v25  ;;  %v920_v53 = vpack.c.bf16 %v886_v31, %v885_v26  ;;  %v872_v60 = vld [vmem:[#allocation2 + $0x9b] sm:$0xff]  ;;  %v873_v47 = vld [vmem:[#allocation2 + $0xab] sm:$0xff] }
 0x1a5   : > { %1234 = vmatmul.mubr.bf16.gmra.mxu0 %v906_v20  ;;  %7299 = vmatpush3.bf16.msra.mxu1 %v7547_v28  ;;  %v880_v28 = vld [vmem:[#allocation2 + $0x3c] sm:$0xff]  ;;  %v909_v33 = vpack.c.bf16 %v866_v30, %v865_v29  ;;  %v910_v20 = vpack.c.bf16 %v882_v35, %v881_v34  ;;  %v889_v25 = vld [vmem:[#allocation2 + $0xac] sm:$0xff]  ;;  %v890_v27 = vld [vmem:[#allocation2 + $0xb4] sm:$0xff] }
 0x1a6   : > { %1257 = vmatprep.mubr.bf16.mxu1 %v922_v39  ;;  %1306 = vmatprep.mubr.bf16.mxu0 %v894_v49  ;;  %v905_v23 = vpack.c.bf16 %v880_v28, %v879_v19  ;;  %v867_v39 = vld [vmem:[#allocation2 + $0x63] sm:$0xff]  ;;  %v871_v59 = vld [vmem:[#allocation2 + $0x93] sm:$0xff] }
 0x1a7   : > { %6567 = vmatpush3.bf16.msra.mxu0 %v7549_v44  ;;  %7300 = vmatprep.subr.bf16.mxu1 %v7550_v45  ;;  %v915_v44 = vpack.c.bf16 %v884_v38, %v883_v36  ;;  %v888_v49 = vld [vmem:[#allocation2 + $0x9c] sm:$0xff]  ;;  %v7560_v9 = vld [vmem:[#allocation5 + $0x30] sm:$0xff]   ;;  %v7561_v10 = vld [vmem:[#allocation5 + $0x68] sm:$0xff]  }
 0x1a8   : > { %6568 = vmatprep.subr.bf16.mxu0 %v7551_v48  ;;  %v887_v48 = vld [vmem:[#allocation2 + $0x94] sm:$0xff]  ;;  %v7577_v18 = vld [vmem:[#allocation5 + $0x48] sm:$0xff]   ;;  %v7588_v34 = vld [vmem:[#allocation5 + $0x80] sm:$0xff]  }
 0x1a9   : > { %7301 = vmatpush3.bf16.msra.mxu1 %v7550_v45  ;;  %v914_v45 = vpack.c.bf16 %v868_v40, %v867_v39  ;;  %v925_v55 = vpack.c.bf16 %v888_v49, %v887_v48  ;;  %v7558_v41 = vld [vmem:[#allocation5 + $0x38] sm:$0xff]   ;;  %v7569_v13 = vld [vmem:[#allocation5 + $0xf0] sm:$0xff]   ;;  %v7578_v29 = vld [vmem:[#allocation5 + $0x8] sm:$0xff]  }
 0x1aa   : > { %7302 = vmatprep.subr.bf16.mxu1 %v7553_v52  ;;  %v7565_v11 = vld [vmem:[#allocation5 + $0x58] sm:$0xff]   ;;  %v7581_v19 = vld [vmem:[#allocation5 + $0xd0] sm:$0xff]   ;;  %v7585_v30 = vld [vmem:[#allocation5 + $0xc8] sm:$0xff]  }
 0x1ab   : > { %6569 = vmatpush3.bf16.msra.mxu0 %v7552_v50  ;;  %v869_v50 = vld [vmem:[#allocation2 + $0x7b] sm:$0xff]  ;;  %v7582_v28 = vld [vmem:[#allocation5 + $0x90] sm:$0xff]  }
 0x1ac   : > { %1258 = vmatmul.mubr.bf16.gmra.mxu1 %v921_v61  ;;  %v7557_v61 = vld [vmem:[#allocation5 + $0x78] sm:$0xff]  }
 0x1ad   : > { %7303 = vmatpush3.bf16.msra.mxu1 %v7553_v52  ;;  %1265 = vmatprep.mubr.bf16.mxu1 %v927_v5  ;;  %v870_v52 = vld [vmem:[#allocation2 + $0x83] sm:$0xff]  ;;  %v874_v5 = vld [vmem:[#allocation2 + $0xb3] sm:$0xff] }
 0x1ae   : > { %1307 = vmatmul.mubr.bf16.vlgmr.msra.gmra.mxu0 %v893_v62  ;;  %7304 = vmatprep.subr.bf16.mxu1 %v7554_v1  ;;  %v919_v57 = vpack.c.bf16 %v870_v52, %v869_v50  ;;  %v930_v62 = vpack.c.bf16 %v890_v27, %v889_v25  ;;  %v929_v8 = vpack.c.bf16 %v874_v5, %v873_v47  ;;  %v7566_v12 = vld [vmem:[#allocation5 + $0x18] sm:$0xff]  }
 0x1af   : > { %1314 = vmatprep.mubr.bf16.mxu0 %v899_v6  ;;  %6634 = vmatprep.subr.bf16.mxu0 %v7557_v61  ;;  %v7559_v6 = vld [vmem:[#allocation5 + $0x70] sm:$0xff]   ;;  %v7580_v17 = vld [vmem:[#allocation5 + $0x98] sm:$0xff]  }
 0x1b0   : > { %6635 = vmatpush3.bf16.msra.mxu0 %v7558_v41  ;;  %v8312_v35 = vld [vmem:[#allocation5 + $0x138] sm:$0xff]  }
 0x1b1   : > { %7305 = vmatpush3.bf16.msra.mxu1 %v7554_v1  ;;  %v924_v1 = vpack.c.bf16 %v872_v60, %v871_v59  ;;  %6636 = vmatprep.subr.bf16.mxu0 %v7559_v6 }
 0x1b2   : > { %7306 = vmatprep.subr.bf16.mxu1 %v7555_v7 }
 0x1b4   : > { %1266 = vmatmul.mubr.bf16.gmra.mxu1 %v926_v14  ;;  %6637 = vmatpush3.bf16.msra.mxu0 %v7560_v9  ;;  %v7570_v14 = vld [vmem:[#allocation5 + $0xb0] sm:$0xff]  }
 0x1b5   : > { %7307 = vmatpush3.bf16.msra.mxu1 %v7555_v7  ;;  %7310 = vmatprep.mubr.bf16.mxu1 %v895_v16  ;;  %v923_v7 = vpack.c.bf16 %v8290_v0, %v8282_v56  ;;  %v7567_v56 = vld [vmem:[#allocation5 + $0xf8] sm:$0xff]  }
 0x1b6   : > { %1315 = vmatmul.mubr.bf16.gmra.mxu0 %v898_v22  ;;  %7308 = vmatprep.subr.bf16.mxu1 %v7556_v24  ;;  %v7568_v0 = vld [vmem:[#allocation5 + $0xb8] sm:$0xff]   ;;  %v7572_v22 = vld [vmem:[#allocation5 + $0x10] sm:$0xff]  }
 0x1b7   : > { %1322 = vmatprep.mubr.bf16.mxu0 %v904_v15  ;;  %6638 = vmatprep.subr.bf16.mxu0 %v7561_v10  ;;  %v7576_v15 = vld [vmem:[#allocation5 + $0xa0] sm:$0xff]   ;;  %v7579_v16 = vld [vmem:[#allocation5 + $0xd8] sm:$0xff]  }
 0x1b8   : > { %6639 = vmatpush3.bf16.msra.mxu0 %v7562_v37 }
 0x1b9   : > { %7309 = vmatpush3.bf16.msra.mxu1 %v7556_v24  ;;  %6640 = vmatprep.subr.bf16.mxu0 %v7563_v43  ;;  %v7575_v24 = vld [vmem:[#allocation5 + $0xe0] sm:$0xff]  }
 0x1ba   : > { %6698 = vmatprep.subr.bf16.mxu1 %v7567_v56 }
 0x1bc   : > { %7311 = vmatmul.mubr.bf16.vlgmr.msra.gmra.mxu1 %v900_v32  ;;  %v7586_v32 = vld [vmem:[#allocation5 + $0x88] sm:$0xff]  }
 0x1bd   : > { %7314 = vmatprep.mubr.bf16.mxu1 %v905_v23  ;;  %6699 = vmatpush3.bf16.msra.mxu1 %v7568_v0  ;;  %v7587_v23 = vld [vmem:[#allocation5 + $0xc0] sm:$0xff]  }
 0x1be   : > { %1323 = vmatmul.mubr.bf16.gmra.mxu0 %v903_v21  ;;  %6700 = vmatprep.subr.bf16.mxu1 %v7569_v13  ;;  %v7583_v21 = vld [vmem:[#allocation5 + $0x40] sm:$0xff]  }
 0x1bf   : > { %1330 = vmatprep.mubr.bf16.mxu0 %v909_v33  ;;  %v7584_v33 = vld [vmem:[#allocation5] sm:$0xff]  }
 0x1c0   : > { %v8350_v0 = vld [vmem:[%s9956_s3] ss:$0 sm:$0xff] }
 0x1c1   : > { %6701 = vmatpush3.bf16.msra.mxu1 %v7570_v14 }
 0x1c2   : > { %6702 = vmatprep.subr.bf16.mxu1 %v7573_v58 }
 0x1c4   : > { %7315 = vmatmul.mubr.bf16.gmra.mxu1 %v910_v20 }
 0x1c5   : > { %7318 = vmatprep.mubr.bf16.mxu1 %v915_v44 }
 0x1c6   : > { %1331 = vmatmul.mubr.bf16.gmra.mxu0 %v908_v42 }
 0x1c7   : > { %1338 = vmatprep.mubr.bf16.mxu0 %v914_v45 }
 0x1cc   : > { %7319 = vmatmul.mubr.bf16.gmra.mxu1 %v920_v53 }
 0x1cd   : > { %7322 = vmatprep.mubr.bf16.mxu1 %v925_v55 }
 0x1ce   : > { %1339 = vmatmul.mubr.bf16.gmra.mxu0 %v913_v54 }
 0x1cf   : > { %1346 = vmatprep.mubr.bf16.mxu0 %v919_v57 }
 0x1d4   : > { %7323 = vmatmul.mubr.bf16.gmra.mxu1 %v930_v62 }
 0x1d6   : > { %1347 = vmatmul.mubr.bf16.gmra.mxu0 %v918_v46  ;;  %v7564_v46 = vld [vmem:[#allocation5 + $0x20] sm:$0xff]  }
 0x1d7   : > { %1354 = vmatprep.mubr.bf16.mxu0 %v924_v1  ;;  %6641 = vmatpush3.bf16.msra.mxu0 %v7564_v46 }
 0x1d8   : > { %6642 = vmatprep.subr.bf16.mxu0 %v7565_v11 }
 0x1db   : > { %6643 = vmatpush3.bf16.msra.mxu0 %v7566_v12 }
 0x1dc   : > { %6644 = vmatprep.subr.bf16.mxu0 %v7571_v51 }
 0x1de   : > { %1355 = vmatmul.mubr.bf16.gmra.mxu0 %v923_v7 }
 0x1df   : > { %1362 = vmatprep.mubr.bf16.mxu0 %v929_v8  ;;  %6645 = vmatpush3.bf16.msra.mxu0 %v7572_v22 }
 0x1e0   : > { %6646 = vmatprep.subr.bf16.mxu0 %v7577_v18 }
 0x1e3   : > { %6647 = vmatpush3.bf16.msra.mxu0 %v7578_v29 }
 0x1e4   : > { %6648 = vmatprep.subr.bf16.mxu0 %v7583_v21 }
 0x1e6   : > { %1363 = vmatmul.mubr.bf16.gmra.mxu0 %v928_v63  ;;  %v7574_v63 = vld [vmem:[#allocation5 + $0xa8] sm:$0xff]  }
 0x1e7   : > { %6703 = vmatpush3.bf16.msra.mxu1 %v7574_v63  ;;  %6649 = vmatpush3.bf16.msra.mxu0 %v7584_v33 }
 0x1e8   : > { %6704 = vmatprep.subr.bf16.mxu1 %v7575_v24  ;;  %7326 = vmatprep.subr.bf16.mxu0 %v8312_v35 }
 0x1eb   : > { %6705 = vmatpush3.bf16.msra.mxu1 %v7576_v15 }
 0x1ec   : > { %6706 = vmatprep.subr.bf16.mxu1 %v7579_v16 }
 0x1ef   : > { %6707 = vmatpush3.bf16.msra.mxu1 %v7580_v17 }
 0x1f0   : > { %6708 = vmatprep.subr.bf16.mxu1 %v7581_v19 }
 0x1f3   : > { %6709 = vmatpush3.bf16.msra.mxu1 %v7582_v28 }
 0x1f4   : > { %6710 = vmatprep.subr.bf16.mxu1 %v7585_v30 }
 0x1f7   : > { %6711 = vmatpush3.bf16.msra.mxu1 %v7586_v32 }
 0x1f8   : > { %6712 = vmatprep.subr.bf16.mxu1 %v7587_v23 }
 0x1fb   : > { %6713 = vmatpush3.bf16.msra.mxu1 %v7588_v34 }
 0x24d   : > { %v6506_v36 = vpop.f32.mrf.mxu0 }
 0x24f   : > { %v6507_v38 = vpop.f32.mrf.mxu0 }
 0x250   : > { %v6508_v11 = vadd.f32 %v6507_v38, %v6506_v36 }
 0x251   : > { %v6509_v39 = vpop.f32.mrf.mxu0 }
 0x252   : > { %v1212_v15 = vadd.f32 %v6508_v11, %v8350_v0 }
 0x253   : > { %v6510_v40 = vpop.f32.mrf.mxu0 }
 0x254   : > { %v6511_v22 = vadd.f32 %v6510_v40, %v6509_v39 }
 0x255   : > { %v6512_v20 = vpop.f32.mrf.mxu0 }
 0x256   : > { %v1215_v23 = vadd.f32 %v6511_v22, %v8350_v0 }
 0x257   : > { %v6513_v42 = vpop.f32.mrf.mxu0 }
 0x258   : > { %v6514_v37 = vadd.f32 %v6513_v42, %v6512_v20 }
 0x259   : > { %v6515_v44 = vpop.f32.mrf.mxu0 }
 0x25a   : > { %v1220_v14 = vadd.f32 %v6514_v37, %v8350_v0 }
 0x25b   : > { %v6516_v45 = vpop.f32.mrf.mxu0 }
 0x25c   : > { %v8315_v31 = vpop.f32.mrf.mxu1  ;;  %v6517_v51 = vadd.f32 %v6516_v45, %v6515_v44 }
 0x25d   : > { %v6518_v26 = vpop.f32.mrf.mxu0 }
 0x25e   : > { %v8317_v49 = vpop.f32.mrf.mxu1  ;;  %v1223_v28 = vadd.f32 %v6517_v51, %v8350_v0 }
 0x25f   : > { %v6519_v48 = vpop.f32.mrf.mxu0 }
 0x260   : > { %v8319_v52 = vpop.f32.mrf.mxu1  ;;  %v6520_v34 = vadd.f32 %v6519_v48, %v6518_v26 }
 0x261   : > { %v6521_v50 = vpop.f32.mrf.mxu0 }
 0x262   : > { %v8321_v54 = vpop.f32.mrf.mxu1  ;;  %v1228_v26 = vadd.f32 %v6520_v34, %v8350_v0 }
 0x263   : > { %v6522_v53 = vpop.f32.mrf.mxu0 }
 0x264   : > { %v8323_v57 = vpop.f32.mrf.mxu1  ;;  %v6523_v48 = vadd.f32 %v6522_v53, %v6521_v50 }
 0x265   : > { %v6524_v55 = vpop.f32.mrf.mxu0 }
 0x266   : > { %v8325_v27 = vpop.f32.mrf.mxu1  ;;  %v1231_v22 = vadd.f32 %v6523_v48, %v8350_v0 }
 0x267   : > { %v6525_v25 = vpop.f32.mrf.mxu0 }
 0x268   : > { %v8329_v60 = vpop.f32.mrf.mxu1  ;;  %v6526_v11 = vadd.f32 %v6525_v25, %v6524_v55 }
 0x269   : > { %v8327_v59 = vpop.f32.mrf.mxu0 }
 0x26a   : > { %v8333_v62 = vpop.f32.mrf.mxu1 }
 0x26b   : > { %v8331_v61 = vpop.f32.mrf.mxu0 }
 0x26c   : > { %v8335_v1 = vpop.f32.mrf.mxu1  ;;  %v6529_v55 = vadd.f32 %v8331_v61, %v8327_v59 }
 0x26e   : > { %v6570_v41 = vpop.f32.mrf.mxu0  ;;  %v8337_v47 = vpop.f32.mrf.mxu1 }
 0x270   : > { %v6571_v5 = vpop.f32.mrf.mxu0  ;;  %v8339_v6 = vpop.f32.mrf.mxu1 }
 0x271   : > { %v6572_v58 = vadd.f32 %v6571_v5, %v6570_v41 }
 0x272   : > { %v6573_v7 = vpop.f32.mrf.mxu0  ;;  %v8341_v8 = vpop.f32.mrf.mxu1 }
 0x273   : > { %v1309_v21 = vadd.f32 %v6572_v58, %v1212_v15  ;;  %v1236_v15 = vadd.f32 %v6526_v11, %v8350_v0 }
 0x274   : > { %v6574_v9 = vpop.f32.mrf.mxu0  ;;  %v8343_v10 = vpop.f32.mrf.mxu1 }
 0x275   : > { %v6575_v29 = vadd.f32 %v6574_v9, %v6573_v7 }
 0x276   : > { %v6576_v43 = vpop.f32.mrf.mxu0  ;;  %v8345_v46 = vpop.f32.mrf.mxu1 }
 0x277   : > { %v1312_v5 = vadd.f32 %v6575_v29, %v1215_v23 }
 0x278   : > { %v6577_v56 = vpop.f32.mrf.mxu0  ;;  %v8352_v13 = vpop.f32.mrf.mxu1 }
 0x279   : > { %v6578_v12 = vadd.f32 %v6577_v56, %v6576_v43 }
 0x27a   : > { %v6579_v63 = vpop.f32.mrf.mxu0  ;;  %v8355_v24 = vpop.f32.mrf.mxu1 }
 0x27b   : > { %v1317_v17 = vadd.f32 %v6578_v12, %v1220_v14 }
 0x27c   : > { %v6580_v16 = vpop.f32.mrf.mxu0  ;;  %v7312_v19 = vpop.f32.mrf.mxu1 }
 0x27d   : > { %v6581_v18 = vadd.f32 %v6580_v16, %v6579_v63  ;;  %v8359_v32 = vadd.f32 %v7312_v19, %v1317_v17 }
 0x27e   : > { %v6582_v30 = vpop.f32.mrf.mxu0  ;;  %v1405_v33 = vpop.f32.mrf.mxu1 }
 0x27f   : > { %v1470_v36 = vmax.f32 %v8359_v32, 0.0  ;;  %v8363_v39 = vadd.f32 %v1405_v33, %v1309_v21  ;;  %v1320_v40 = vadd.f32 %v6581_v18, %v1223_v28  ;;  %v1239_v33 = vadd.f32 %v6529_v55, %v8350_v0  ;;  %v7590_v55 = vld [vmem:[#allocation5 + $0x130] sm:$0xff]  }
 0x280   : > { %v6583_v38 = vpop.f32.mrf.mxu0  ;;  %v7313_v20 = vpop.f32.mrf.mxu1 }
 0x281   : > { %1486 = vst [vmem:[#allocation2 + $0x1a] sm:$0xff] %v1470_v36  ;;  %v6584_v42 = vadd.f32 %v6583_v38, %v6582_v30  ;;  %v1468_v44 = vmax.f32 %v8363_v39, 0.0  ;;  %v8368_v41 = vadd.f32 %v7313_v20, %v1320_v40  ;;  %v6532_v30 = vadd.f32 %v8317_v49, %v8315_v31 }
 0x282   : > { %v6585_v45 = vpop.f32.mrf.mxu0  ;;  %v1408_v7 = vpop.f32.mrf.mxu1 }
 0x283   : > { %1484 = vst [vmem:[#allocation2 + $0x2] sm:$0xff] %v1468_v44  ;;  %v1471_v9 = vmax.f32 %v8368_v41, 0.0  ;;  %v1409_v43 = vadd.f32 %v1408_v7, %v1312_v5  ;;  %v1325_v58 = vadd.f32 %v6584_v42, %v1228_v26  ;;  %v1244_v48 = vadd.f32 %v6532_v30, %v8350_v0 }
 0x284   : > { %v6586_v37 = vpop.f32.mrf.mxu0  ;;  %v7316_v56 = vpop.f32.mrf.mxu1 }
 0x285   : > { %1487 = vst [vmem:[#allocation2 + $0x22] sm:$0xff] %v1471_v9  ;;  %v6587_v12 = vadd.f32 %v6586_v37, %v6585_v45  ;;  %v1469_v14 = vmax.f32 %v1409_v43, 0.0  ;;  %v6535_v37 = vadd.f32 %v8321_v54, %v8319_v52 }
 0x286   : > { %v6588_v51 = vpop.f32.mrf.mxu0  ;;  %v1421_v63 = vpop.f32.mrf.mxu1 }
 0x287   : > { %1485 = vst [vmem:[#allocation2 + $0xa] sm:$0xff] %v1469_v14  ;;  %v8377_v53 = vadd.f32 %v1421_v63, %v1325_v58  ;;  %v1328_v19 = vadd.f32 %v6587_v12, %v1231_v22  ;;  %v1663_v52 = vpack.c.bf16 %v1469_v14, %v1468_v44  ;;  %v1247_v39 = vadd.f32 %v6535_v37, %v8350_v0 }
 0x288   : > { %v6589_v50 = vpop.f32.mrf.mxu0  ;;  %v7317_v16 = vpop.f32.mrf.mxu1  ;;  %v1599_v54 = vld [vmem:[#allocation2 + $0x19] sm:$0xff] }
 0x289   : > { %v6590_v25 = vadd.f32 %v6589_v50, %v6588_v51  ;;  %v1472_v17 = vmax.f32 %v8377_v53, 0.0 }
 0x28a   : > { %v6591_v18 = vpop.f32.mrf.mxu0  ;;  %v1424_v29 = vpop.f32.mrf.mxu1  ;;  %v1597_v20 = vld [vmem:[#allocation2 + $0x1] sm:$0xff] }
 0x28b   : > { %v1333_v28 = vadd.f32 %v6590_v25, %v1236_v15  ;;  %1488 = vst [vmem:[#allocation2 + $0x32] sm:$0xff] %v1472_v17  ;;  %v8387_v23 = vadd.f32 %v1424_v29, %v1328_v19  ;;  %v1581_v42 = vld [vmem:[#allocation2] sm:$0xff] }
 0x28c   : > { %v6592_v21 = vpop.f32.mrf.mxu0  ;;  %v8392_v34 = vpop.f32.mrf.mxu1  ;;  %v1600_v45 = vld [vmem:[#allocation2 + $0x21] sm:$0xff] }
 0x28d   : > { %v8390_v59 = vadd.f32 %v7316_v56, %v1333_v28  ;;  %v6593_v61 = vadd.f32 %v6592_v21, %v6591_v18  ;;  %v1473_v38 = vmax.f32 %v8387_v23, 0.0  ;;  %v1631_v58 = vld [vmem:[#allocation2 + $0x1b] sm:$0xff]  ;;  %v1632_v63 = vld [vmem:[#allocation2 + $0x23] sm:$0xff]  ;;  %v1667_v18 = vpack.c.bf16 %v1600_v45, %v1599_v54 }
 0x28e   : > { %v6594_v40 = vpop.f32.mrf.mxu0  ;;  %v1598_v5 = vld [vmem:[#allocation2 + $0x9] sm:$0xff]  ;;  %v1437_v11 = vpop.f32.mrf.mxu1  ;;  %v1669_v29 = vpack.c.bf16 %v1632_v63, %v1631_v58 }
 0x28f   : > { %v1474_v31 = vmax.f32 %v8390_v59, 0.0  ;;  %v1336_v49 = vadd.f32 %v6593_v61, %v1239_v33  ;;  %v1629_v7 = vld [vmem:[#allocation2 + $0x3] sm:$0xff]  ;;  %v1630_v26 = vld [vmem:[#allocation2 + $0xb] sm:$0xff]  ;;  %1489 = vst [vmem:[#allocation2 + $0x3a] sm:$0xff] %v1473_v38  ;;  %v1662_v56 = vpack.c.bf16 %v1598_v5, %v1597_v20 }
 0x290   : > { %v6595_v43 = vpop.f32.mrf.mxu0  ;;  %v1664_v12 = vpack.c.bf16 %v1630_v26, %v1629_v7  ;;  %v1582_v51 = vld [vmem:[#allocation2 + $0x8] sm:$0xff]  ;;  %v8410_v30 = vpop.f32.mrf.mxu1  ;;  %v1583_v26 = vld [vmem:[#allocation2 + $0x18] sm:$0xff] }
 0x291   : > { %1490 = vst [vmem:[#allocation2 + $0x4a] sm:$0xff] %v1474_v31  ;;  %v8403_v22 = vadd.f32 %v7317_v16, %v1336_v49  ;;  %v6596_v50 = vadd.f32 %v6595_v43, %v6594_v40  ;;  %v1661_v15 = vpack.c.bf16 %v1582_v51, %v1581_v42  ;;  %1979 = vmatprep.mubr.bf16.mxu0 %v1662_v56  ;;  %v7591_v33 = vld [vmem:[#allocation5 + $0x128] sm:$0xff]   ;;  %v1584_v40 = vld [vmem:[#allocation2 + $0x20] sm:$0xff] }
 0x292   : > { %v6597_v25 = vpop.f32.mrf.mxu0  ;;  %2076 = vmatprep.mubr.bf16.mxu1 %v1664_v12  ;;  %v6538_v16 = vadd.f32 %v8325_v27, %v8323_v57  ;;  %v6541_v49 = vadd.f32 %v8333_v62, %v8329_v60  ;;  %v1440_v5 = vpop.f32.mrf.mxu1  ;;  %v1666_v43 = vpack.c.bf16 %v1584_v40, %v1583_v26  ;;  %v1601_v56 = vld [vmem:[#allocation2 + $0x31] sm:$0xff]  ;;  %v7592_v51 = vld [vmem:[#allocation5 + $0x120] sm:$0xff]   ;;  %v1673_v40 = vpack.c.bf16 %v1473_v38, %v1472_v17  ;;  %v7595_v26 = vld [vmem:[#allocation5 + $0x108] sm:$0xff]  }
 0x293   : > { %v1475_v19 = vmax.f32 %v8403_v22, 0.0  ;;  %v1341_v28 = vadd.f32 %v6596_v50, %v1244_v48  ;;  %1980 = vmatmul.mubr.bf16.vlgmr.msra.gmra.mxu0 %v1661_v15  ;;  %2077 = vmatmul.mubr.bf16.vlgmr.msra.gmra.mxu1 %v1663_v52  ;;  %v6544_v50 = vadd.f32 %v8337_v47, %v8335_v1 }
 0x294   : > { %v6598_v21 = vpop.f32.mrf.mxu0  ;;  %7327 = vmatpush3.bf16.msra.mxu0 %v8312_v35  ;;  %1987 = vmatprep.mubr.bf16.mxu0 %v1667_v18  ;;  %v1252_v45 = vadd.f32 %v6538_v16, %v8350_v0  ;;  %v8433_v15 = vpop.f32.mrf.mxu1  ;;  %v6547_v16 = vadd.f32 %v8341_v8, %v8339_v6 }
 0x295   : > { %1491 = vst [vmem:[#allocation2 + $0x52] sm:$0xff] %v1475_v19  ;;  %v8416_v44 = vadd.f32 %v1437_v11, %v1341_v28  ;;  %v6599_v14 = vadd.f32 %v6598_v21, %v6597_v25  ;;  %2084 = vmatprep.mubr.bf16.mxu1 %v1669_v29  ;;  %7328 = vmatprep.subr.bf16.mxu0 %v7590_v55 }
 0x296   : > { %v6600_v61 = vpop.f32.mrf.mxu0  ;;  %v1602_v20 = vld [vmem:[#allocation2 + $0x39] sm:$0xff]  ;;  %v1668_v11 = vpack.c.bf16 %v1471_v9, %v1470_v36  ;;  %v1255_v36 = vadd.f32 %v6541_v49, %v8350_v0  ;;  %v1260_v29 = vadd.f32 %v6544_v50, %v8350_v0  ;;  %v1453_v21 = vpop.f32.mrf.mxu1  ;;  %v1263_v17 = vadd.f32 %v6547_v16, %v8350_v0 }
 0x297   : > { %v1476_v57 = vmax.f32 %v8416_v44, 0.0  ;;  %v1344_v27 = vadd.f32 %v6599_v14, %v1247_v39  ;;  %v1633_v42 = vld [vmem:[#allocation2 + $0x33] sm:$0xff]  ;;  %v1634_v35 = vld [vmem:[#allocation2 + $0x3b] sm:$0xff]  ;;  %v1672_v60 = vpack.c.bf16 %v1602_v20, %v1601_v56 }
 0x298   : > { %v6601_v7 = vpop.f32.mrf.mxu0  ;;  %7329 = vmatpush3.bf16.msra.mxu0 %v7590_v55  ;;  %v1674_v62 = vpack.c.bf16 %v1634_v35, %v1633_v42  ;;  %v1586_v54 = vld [vmem:[#allocation2 + $0x38] sm:$0xff]  ;;  %v1585_v39 = vld [vmem:[#allocation2 + $0x30] sm:$0xff]  ;;  %v7325_v49 = vpop.f32.mrf.mxu1 }
 0x299   : > { %1492 = vst [vmem:[#allocation2 + $0x62] sm:$0xff] %v1476_v57  ;;  %v8424_v48 = vadd.f32 %v1440_v5, %v1344_v27  ;;  %v6602_v37 = vadd.f32 %v6601_v7, %v6600_v61  ;;  %7330 = vmatprep.subr.bf16.mxu0 %v7591_v33  ;;  %v7593_v55 = vld [vmem:[#allocation5 + $0x118] sm:$0xff]   ;;  %v1671_v61 = vpack.c.bf16 %v1586_v54, %v1585_v39  ;;  %v1603_v27 = vld [vmem:[#allocation2 + $0x49] sm:$0xff] }
 0x29a   : > { %v6603_v12 = vpop.f32.mrf.mxu0  ;;  %v7594_v42 = vld [vmem:[#allocation5 + $0x110] sm:$0xff]  }
 0x29b   : > { %v1477_v58 = vmax.f32 %v8424_v48, 0.0  ;;  %v1349_v63 = vadd.f32 %v6602_v37, %v1252_v45  ;;  %1988 = vmatmul.mubr.bf16.gmra.mxu0 %v1666_v43  ;;  %2085 = vmatmul.mubr.bf16.gmra.mxu1 %v1668_v11 }
 0x29c   : > { %v6604_v32 = vpop.f32.mrf.mxu0  ;;  %1995 = vmatprep.mubr.bf16.mxu0 %v1672_v60  ;;  %2092 = vmatprep.mubr.bf16.mxu1 %v1674_v62  ;;  %v1604_v25 = vld [vmem:[#allocation2 + $0x51] sm:$0xff]  ;;  %v1456_v60 = vpop.f32.mrf.mxu1 }
 0x29d   : > { %1493 = vst [vmem:[#allocation2 + $0x6a] sm:$0xff] %v1477_v58  ;;  %v8439_v41 = vadd.f32 %v8392_v34, %v1349_v63  ;;  %v6605_v9 = vadd.f32 %v6604_v32, %v6603_v12  ;;  %7331 = vmatpush3.bf16.msra.mxu0 %v7591_v33  ;;  %v1635_v18 = vld [vmem:[#allocation2 + $0x4b] sm:$0xff]  ;;  %v1636_v28 = vld [vmem:[#allocation2 + $0x53] sm:$0xff]  ;;  %v1677_v6 = vpack.c.bf16 %v1604_v25, %v1603_v27 }
 0x29e   : > { %v6606_v52 = vpop.f32.mrf.mxu0  ;;  %7332 = vmatprep.subr.bf16.mxu0 %v7592_v51  ;;  %v1679_v8 = vpack.c.bf16 %v1636_v28, %v1635_v18  ;;  %v1588_v7 = vld [vmem:[#allocation2 + $0x50] sm:$0xff]  ;;  %v6553_v12 = vadd.f32 %v8355_v24, %v8352_v13  ;;  %v7596_v24 = vld [vmem:[#allocation5 + $0x100] sm:$0xff]  }
 0x29f   : > { %v1478_v1 = vmax.f32 %v8439_v41, 0.0  ;;  %v1352_v47 = vadd.f32 %v6605_v9, %v1255_v36  ;;  %v1678_v36 = vpack.c.bf16 %v1475_v19, %v1474_v31 }
 0x2a0   : > { %v6607_v34 = vpop.f32.mrf.mxu0  ;;  %v1605_v9 = vld [vmem:[#allocation2 + $0x61] sm:$0xff]  ;;  %v1271_v59 = vadd.f32 %v6553_v12, %v8350_v0 }
 0x2a1   : > { %1494 = vst [vmem:[#allocation2 + $0x7a] sm:$0xff] %v1478_v1  ;;  %v8448_v14 = vadd.f32 %v8410_v30, %v1352_v47  ;;  %v6608_v33 = vadd.f32 %v6607_v34, %v6606_v52  ;;  %7333 = vmatpush3.bf16.msra.mxu0 %v7592_v51  ;;  %v6550_v30 = vadd.f32 %v8345_v46, %v8343_v10  ;;  %v1587_v51 = vld [vmem:[#allocation2 + $0x48] sm:$0xff]  ;;  %v1589_v34 = vld [vmem:[#allocation2 + $0x60] sm:$0xff] }
 0x2a2   : > { %v6609_v20 = vpop.f32.mrf.mxu0  ;;  %7334 = vmatprep.subr.bf16.mxu0 %v7593_v55  ;;  %v1676_v32 = vpack.c.bf16 %v1588_v7, %v1587_v51 }
 0x2a3   : > { %v1479_v35 = vmax.f32 %v8448_v14, 0.0  ;;  %v1357_v45 = vadd.f32 %v6608_v33, %v1260_v29  ;;  %1996 = vmatmul.mubr.bf16.gmra.mxu0 %v1671_v61  ;;  %2093 = vmatmul.mubr.bf16.gmra.mxu1 %v1673_v40  ;;  %v1268_v56 = vadd.f32 %v6550_v30, %v8350_v0  ;;  %v1683_v0 = vpack.c.bf16 %v1477_v58, %v1476_v57 }
 0x2a4   : > { %v6610_v53 = vpop.f32.mrf.mxu0  ;;  %2003 = vmatprep.mubr.bf16.mxu0 %v1677_v6  ;;  %2100 = vmatprep.mubr.bf16.mxu1 %v1679_v8  ;;  %v1606_v46 = vld [vmem:[#allocation2 + $0x69] sm:$0xff] }
 0x2a5   : > { %1495 = vst [vmem:[#allocation2 + $0x82] sm:$0xff] %v1479_v35  ;;  %v8460_v23 = vadd.f32 %v1453_v21, %v1357_v45  ;;  %v6611_v38 = vadd.f32 %v6610_v53, %v6609_v20  ;;  %7335 = vmatpush3.bf16.msra.mxu0 %v7593_v55  ;;  %v1637_v43 = vld [vmem:[#allocation2 + $0x63] sm:$0xff]  ;;  %v1638_v11 = vld [vmem:[#allocation2 + $0x6b] sm:$0xff]  ;;  %v1682_v54 = vpack.c.bf16 %v1606_v46, %v1605_v9 }
 0x2a6   : > { %v6612_v5 = vpop.f32.mrf.mxu0  ;;  %7336 = vmatprep.subr.bf16.mxu0 %v7594_v42  ;;  %v1684_v13 = vpack.c.bf16 %v1638_v11, %v1637_v43  ;;  %v1590_v19 = vld [vmem:[#allocation2 + $0x68] sm:$0xff]  ;;  %v1688_v44 = vpack.c.bf16 %v1479_v35, %v1478_v1 }
 0x2a7   : > { %v1480_v37 = vmax.f32 %v8460_v23, 0.0  ;;  %v1360_v10 = vadd.f32 %v6611_v38, %v1263_v17  ;;  %v1681_v33 = vpack.c.bf16 %v1590_v19, %v1589_v34  ;;  %v1645_v35 = vld [vmem:[#allocation2 + $0x4] sm:$0xff]  ;;  %v1646_v46 = vld [vmem:[#allocation2 + $0xc] sm:$0xff]  ;;  %v7597_v19 = vld [vmem:[#allocation5 + $0x1b8] sm:$0xff]  }
 0x2a8   : > { %v6613_v62 = vpop.f32.mrf.mxu0  ;;  %v1607_v61 = vld [vmem:[#allocation2 + $0x79] sm:$0xff]  ;;  %v1665_v12 = vpack.c.bf16 %v1646_v46, %v1645_v35  ;;  %v1648_v23 = vld [vmem:[#allocation2 + $0x24] sm:$0xff]  ;;  %v1654_v9 = vld [vmem:[#allocation2 + $0x6c] sm:$0xff]  ;;  %6778 = vmatprep.subr.bf16.mxu1 %v7597_v19 }
 0x2a9   : > { %1496 = vst [vmem:[#allocation2 + $0x92] sm:$0xff] %v1480_v37  ;;  %v8468_v63 = vadd.f32 %v1456_v60, %v1360_v10  ;;  %v6614_v50 = vadd.f32 %v6613_v62, %v6612_v5  ;;  %7337 = vmatpush3.bf16.msra.mxu0 %v7594_v42  ;;  %v1591_v45 = vld [vmem:[#allocation2 + $0x78] sm:$0xff]  ;;  %v7602_v34 = vld [vmem:[#allocation5 + $0x168] sm:$0xff]  }
 0x2aa   : > { %v6615_v52 = vpop.f32.mrf.mxu0  ;;  %7338 = vmatprep.subr.bf16.mxu0 %v7595_v26  ;;  %v1647_v60 = vld [vmem:[#allocation2 + $0x1c] sm:$0xff] }
 0x2ab   : > { %v1481_v55 = vmax.f32 %v8468_v63, 0.0  ;;  %v1365_v47 = vadd.f32 %v6614_v50, %v1268_v56  ;;  %2004 = vmatmul.mubr.bf16.gmra.mxu0 %v1676_v32  ;;  %2101 = vmatmul.mubr.bf16.gmra.mxu1 %v1678_v36  ;;  %v1650_v62 = vld [vmem:[#allocation2 + $0x3c] sm:$0xff]  ;;  %v1670_v51 = vpack.c.bf16 %v1648_v23, %v1647_v60  ;;  %v1651_v50 = vld [vmem:[#allocation2 + $0x4c] sm:$0xff]  ;;  %v1652_v32 = vld [vmem:[#allocation2 + $0x54] sm:$0xff] }
 0x2ac   : > { %v6616_v25 = vpop.f32.mrf.mxu0  ;;  %2011 = vmatprep.mubr.bf16.mxu0 %v1682_v54  ;;  %2108 = vmatprep.mubr.bf16.mxu1 %v1684_v13  ;;  %v1608_v29 = vld [vmem:[#allocation2 + $0x81] sm:$0xff] }
 0x2ad   : > { %1497 = vst [vmem:[#allocation2 + $0x9a] sm:$0xff] %v1481_v55  ;;  %v1462_v31 = vadd.f32 %v8433_v15, %v1365_v47  ;;  %v6617_v22 = vadd.f32 %v6616_v25, %v6615_v52  ;;  %7339 = vmatpush3.bf16.msra.mxu0 %v7595_v26  ;;  %v1639_v16 = vld [vmem:[#allocation2 + $0x7b] sm:$0xff]  ;;  %v1640_v21 = vld [vmem:[#allocation2 + $0x83] sm:$0xff]  ;;  %v1687_v15 = vpack.c.bf16 %v1608_v29, %v1607_v61  ;;  %v7599_v29 = vld [vmem:[#allocation5 + $0x1b0] sm:$0xff]  }
 0x2ae   : > { %7340 = vmatprep.subr.bf16.mxu0 %v7596_v24  ;;  %v1689_v40 = vpack.c.bf16 %v1640_v21, %v1639_v16  ;;  %v1592_v20 = vld [vmem:[#allocation2 + $0x80] sm:$0xff]  ;;  %v1693_v26 = vpack.c.bf16 %v1481_v55, %v1480_v37  ;;  %v1649_v37 = vld [vmem:[#allocation2 + $0x34] sm:$0xff]  ;;  %v1680_v52 = vpack.c.bf16 %v1652_v32, %v1651_v50  ;;  %v7601_v21 = vld [vmem:[#allocation5 + $0x1a8] sm:$0xff]  }
 0x2af   : > { %v1482_v18 = vmax.f32 %v1462_v31, 0.0  ;;  %v1368_v28 = vadd.f32 %v6617_v22, %v1271_v59  ;;  %v1686_v30 = vpack.c.bf16 %v1592_v20, %v1591_v45  ;;  %v1675_v63 = vpack.c.bf16 %v1650_v62, %v1649_v37  ;;  %v1653_v36 = vld [vmem:[#allocation2 + $0x64] sm:$0xff]  ;;  %v1655_v13 = vld [vmem:[#allocation2 + $0x7c] sm:$0xff]  ;;  %v7600_v16 = vld [vmem:[#allocation5 + $0x170] sm:$0xff]  }
 0x2b0   : > { %v1609_v57 = vld [vmem:[#allocation2 + $0x91] sm:$0xff]  ;;  %v1685_v54 = vpack.c.bf16 %v1654_v9, %v1653_v36 }
 0x2b1   : > { %1498 = vst [vmem:[#allocation2 + $0xaa] sm:$0xff] %v1482_v18  ;;  %v1465_v39 = vadd.f32 %v7325_v49, %v1368_v28  ;;  %7341 = vmatpush3.bf16.msra.mxu0 %v7596_v24  ;;  %v1593_v5 = vld [vmem:[#allocation2 + $0x90] sm:$0xff]  ;;  %v1656_v24 = vld [vmem:[#allocation2 + $0x84] sm:$0xff]  ;;  %v7598_v28 = vld [vmem:[#allocation5 + $0x178] sm:$0xff]  }
 0x2b2   : > { %v1690_v25 = vpack.c.bf16 %v1656_v24, %v1655_v13  ;;  %6779 = vmatpush3.bf16.msra.mxu1 %v7598_v28  ;;  %v7607_v61 = vld [vmem:[#allocation5 + $0x238] sm:$0xff]   ;;  %v7610_v20 = vld [vmem:[#allocation5 + $0x1f0] sm:$0xff]  }
 0x2b3   : > { %v1483_v27 = vmax.f32 %v1465_v39, 0.0  ;;  %2012 = vmatmul.mubr.bf16.gmra.mxu0 %v1681_v33  ;;  %2109 = vmatmul.mubr.bf16.gmra.mxu1 %v1683_v0  ;;  %v7603_v39 = vld [vmem:[#allocation5 + $0x1a0] sm:$0xff]   ;;  %v7605_v0 = vld [vmem:[#allocation5 + $0x198] sm:$0xff]   ;;  %v7612_v45 = vld [vmem:[#allocation5 + $0x150] sm:$0xff]  }
 0x2b4   : > { %2019 = vmatprep.mubr.bf16.mxu0 %v1687_v15  ;;  %2116 = vmatprep.mubr.bf16.mxu1 %v1689_v40  ;;  %v1610_v6 = vld [vmem:[#allocation2 + $0x99] sm:$0xff] }
 0x2b5   : > { %1499 = vst [vmem:[#allocation2 + $0xb2] sm:$0xff] %v1483_v27  ;;  %v1641_v8 = vld [vmem:[#allocation2 + $0x93] sm:$0xff]  ;;  %v1642_v42 = vld [vmem:[#allocation2 + $0x9b] sm:$0xff]  ;;  %v1692_v48 = vpack.c.bf16 %v1610_v6, %v1609_v57  ;;  %v1698_v56 = vpack.c.bf16 %v1483_v27, %v1482_v18  ;;  %6780 = vmatprep.subr.bf16.mxu1 %v7599_v29  ;;  %6842 = vmatprep.subr.bf16.mxu0 %v7607_v61 }
 0x2b6   : > { %v1694_v58 = vpack.c.bf16 %v1642_v42, %v1641_v8  ;;  %v1594_v49 = vld [vmem:[#allocation2 + $0x98] sm:$0xff]  ;;  %6781 = vmatpush3.bf16.msra.mxu1 %v7600_v16  ;;  %v7604_v33 = vld [vmem:[#allocation5 + $0x160] sm:$0xff]   ;;  %v7609_v27 = vld [vmem:[#allocation5 + $0x230] sm:$0xff]  }
 0x2b7   : > { %v1691_v7 = vpack.c.bf16 %v1594_v49, %v1593_v5  ;;  %v1657_v55 = vld [vmem:[#allocation2 + $0x94] sm:$0xff]  ;;  %v1658_v47 = vld [vmem:[#allocation2 + $0x9c] sm:$0xff]  ;;  %6782 = vmatprep.subr.bf16.mxu1 %v7601_v21  ;;  %v7613_v8 = vld [vmem:[#allocation5 + $0x228] sm:$0xff]  }
 0x2b8   : > { %v1611_v41 = vld [vmem:[#allocation2 + $0xa9] sm:$0xff]  ;;  %v1695_v59 = vpack.c.bf16 %v1658_v47, %v1657_v55  ;;  %v7608_v15 = vld [vmem:[#allocation5 + $0x1f8] sm:$0xff]  }
 0x2b9   : > { %v1595_v43 = vld [vmem:[#allocation2 + $0xa8] sm:$0xff]  ;;  %v7606_v40 = vld [vmem:[#allocation5 + $0x158] sm:$0xff]   ;;  %v7611_v6 = vld [vmem:[#allocation5 + $0x190] sm:$0xff]  }
 0x2ba   : > { %6783 = vmatpush3.bf16.msra.mxu1 %v7602_v34  ;;  %v7614_v42 = vld [vmem:[#allocation5 + $0x1e8] sm:$0xff]   ;;  %v7619_v57 = vld [vmem:[#allocation5 + $0x218] sm:$0xff]   ;;  %v7621_v49 = vld [vmem:[#allocation5 + $0x210] sm:$0xff]  }
 0x2bb   : > { %2020 = vmatmul.mubr.bf16.gmra.mxu0 %v1686_v30  ;;  %2117 = vmatmul.mubr.bf16.gmra.mxu1 %v1688_v44  ;;  %v7615_v30 = vld [vmem:[#allocation5 + $0x220] sm:$0xff]   ;;  %v7626_v5 = vld [vmem:[#allocation5 + $0x1c8] sm:$0xff]  }
 0x2bc   : > { %2027 = vmatprep.mubr.bf16.mxu0 %v1692_v48  ;;  %2124 = vmatprep.mubr.bf16.mxu1 %v1694_v58  ;;  %v1612_v53 = vld [vmem:[#allocation2 + $0xb1] sm:$0xff]  ;;  %v7616_v44 = vld [vmem:[#allocation5 + $0x1e0] sm:$0xff]   ;;  %v7617_v58 = vld [vmem:[#allocation5 + $0x188] sm:$0xff]  }
 0x2bd   : > { %v1643_v17 = vld [vmem:[#allocation2 + $0xab] sm:$0xff]  ;;  %v1644_v38 = vld [vmem:[#allocation2 + $0xb3] sm:$0xff]  ;;  %v1697_v10 = vpack.c.bf16 %v1612_v53, %v1611_v41  ;;  %6784 = vmatprep.subr.bf16.mxu1 %v7603_v39  ;;  %v7624_v41 = vld [vmem:[#allocation5 + $0x140] sm:$0xff]  }
 0x2be   : > { %v1699_v14 = vpack.c.bf16 %v1644_v38, %v1643_v17  ;;  %v1596_v1 = vld [vmem:[#allocation2 + $0xb0] sm:$0xff]  ;;  %6785 = vmatpush3.bf16.msra.mxu1 %v7604_v33  ;;  %v7620_v48 = vld [vmem:[#allocation5 + $0x1d8] sm:$0xff]   ;;  %v7618_v53 = vld [vmem:[#allocation5 + $0x148] sm:$0xff]  }
 0x2bf   : > { %v1696_v11 = vpack.c.bf16 %v1596_v1, %v1595_v43  ;;  %v1659_v31 = vld [vmem:[#allocation2 + $0xac] sm:$0xff]  ;;  %v1660_v22 = vld [vmem:[#allocation2 + $0xb4] sm:$0xff]  ;;  %6786 = vmatprep.subr.bf16.mxu1 %v7605_v0 }
 0x2c0   : > { %v1700_v18 = vpack.c.bf16 %v1660_v22, %v1659_v31  ;;  %v7622_v17 = vld [vmem:[#allocation5 + $0x1d0] sm:$0xff]   ;;  %v7625_v38 = vld [vmem:[#allocation5 + $0x208] sm:$0xff]  }
 0x2c2   : > { %6787 = vmatpush3.bf16.msra.mxu1 %v7606_v40 }
 0x2c3   : > { %2028 = vmatmul.mubr.bf16.gmra.mxu0 %v1691_v7  ;;  %2125 = vmatmul.mubr.bf16.gmra.mxu1 %v1693_v26  ;;  %v7623_v7 = vld [vmem:[#allocation5 + $0x180] sm:$0xff]  }
 0x2c4   : > { %2035 = vmatprep.mubr.bf16.mxu0 %v1697_v10  ;;  %2132 = vmatprep.mubr.bf16.mxu1 %v1699_v14  ;;  %v7627_v26 = vld [vmem:[#allocation5 + $0x200] sm:$0xff]   ;;  %v8487_v14 = vld [vmem:[#allocation5 + $0x278] sm:$0xff]  }
 0x2c5   : > { %6788 = vmatprep.subr.bf16.mxu1 %v7611_v6  ;;  %v7628_v10 = vld [vmem:[#allocation5 + $0x1c0] sm:$0xff]   ;;  %9974 = vst [vmem:[#allocation11_spill] sm:$0xff] %v8487_v14 }
 0x2c6   : > { %6789 = vmatpush3.bf16.msra.mxu1 %v7612_v45 }
 0x2c7   : > { %6790 = vmatprep.subr.bf16.mxu1 %v7617_v58 }
 0x2ca   : > { %6791 = vmatpush3.bf16.msra.mxu1 %v7618_v53 }
 0x2cb   : > { %2036 = vmatmul.mubr.bf16.gmra.mxu0 %v1696_v11  ;;  %2133 = vmatmul.mubr.bf16.gmra.mxu1 %v1698_v56 }
 0x2cc   : > { %7342 = vmatprep.mubr.bf16.mxu0 %v1665_v12  ;;  %6792 = vmatprep.subr.bf16.mxu1 %v7623_v7 }
 0x2ce   : > { %6793 = vmatpush3.bf16.msra.mxu1 %v7624_v41 }
 0x2cf   : > { %7358 = vmatprep.subr.bf16.mxu1 %v8487_v14 }
 0x2d3   : > { %7343 = vmatmul.mubr.bf16.vlgmr.msra.gmra.mxu0 %v1670_v51 }
 0x2d4   : > { %7346 = vmatprep.mubr.bf16.mxu0 %v1675_v63  ;;  %6843 = vmatpush3.bf16.msra.mxu0 %v7608_v15 }
 0x2d5   : > { %6844 = vmatprep.subr.bf16.mxu0 %v7609_v27 }
 0x2d8   : > { %6845 = vmatpush3.bf16.msra.mxu0 %v7610_v20 }
 0x2d9   : > { %6846 = vmatprep.subr.bf16.mxu0 %v7613_v8 }
 0x2db   : > { %7347 = vmatmul.mubr.bf16.gmra.mxu0 %v1680_v52 }
 0x2dc   : > { %7350 = vmatprep.mubr.bf16.mxu0 %v1685_v54  ;;  %6847 = vmatpush3.bf16.msra.mxu0 %v7614_v42 }
 0x2dd   : > { %6848 = vmatprep.subr.bf16.mxu0 %v7615_v30 }
 0x2e0   : > { %6849 = vmatpush3.bf16.msra.mxu0 %v7616_v44 }
 0x2e1   : > { %6850 = vmatprep.subr.bf16.mxu0 %v7619_v57 }
 0x2e3   : > { %7351 = vmatmul.mubr.bf16.gmra.mxu0 %v1690_v25 }
 0x2e4   : > { %7354 = vmatprep.mubr.bf16.mxu0 %v1695_v59  ;;  %6851 = vmatpush3.bf16.msra.mxu0 %v7620_v48 }
 0x2e5   : > { %6852 = vmatprep.subr.bf16.mxu0 %v7621_v49 }
 0x2e8   : > { %6853 = vmatpush3.bf16.msra.mxu0 %v7622_v17 }
 0x2e9   : > { %6854 = vmatprep.subr.bf16.mxu0 %v7625_v38 }
 0x2eb   : > { %7355 = vmatmul.mubr.bf16.gmra.mxu0 %v1700_v18 }
 0x2ec   : > { %6855 = vmatpush3.bf16.msra.mxu0 %v7626_v5  ;;  %v8555_v5 = vld [vmem:[%s9958_s5] ss:$0 sm:$0xff] }
 0x2ed   : > { %6856 = vmatprep.subr.bf16.mxu0 %v7627_v26 }
 0x2f0   : > { %6857 = vmatpush3.bf16.msra.mxu0 %v7628_v10 }
 0x353   : > { %v6650_v1 = vpop.f32.mrf.mxu0  ;;  %v8490_v35 = vpop.f32.mrf.mxu1 }
 0x355   : > { %v6651_v46 = vpop.f32.mrf.mxu0  ;;  %v8492_v43 = vpop.f32.mrf.mxu1 }
 0x356   : > { %v6652_v38 = vadd.f32 %v6651_v46, %v6650_v1  ;;  %v6716_v14 = vadd.f32 %v8492_v43, %v8490_v35 }
 0x357   : > { %v6653_v11 = vpop.f32.mrf.mxu0  ;;  %v8494_v56 = vpop.f32.mrf.mxu1 }
 0x358   : > { %v1982_v4 = vadd.f32 %v6652_v38, %v8555_v5 }
 0x359   : > { %v6654_v12 = vpop.f32.mrf.mxu0  ;;  %v8496_v60 = vpop.f32.mrf.mxu1 }
 0x35b   : > { %v6656_v23 = vpop.f32.mrf.mxu0  ;;  %v6720_v37 = vpop.f32.mrf.mxu1 }
 0x35d   : > { %v6657_v62 = vpop.f32.mrf.mxu0  ;;  %v6721_v51 = vpop.f32.mrf.mxu1 }
 0x35e   : > { %v6658_v53 = vadd.f32 %v6657_v62, %v6656_v23  ;;  %v6655_v23 = vadd.f32 %v6654_v12, %v6653_v11  ;;  %v6722_v62 = vadd.f32 %v6721_v51, %v6720_v37  ;;  %v2079_v11 = vadd.f32 %v6716_v14, %v1982_v4 }
 0x35f   : > { %v6659_v63 = vpop.f32.mrf.mxu0  ;;  %v6723_v50 = vpop.f32.mrf.mxu1  ;;  %v6719_v12 = vadd.f32 %v8496_v60, %v8494_v56 }
 0x360   : > { %v1990_v41 = vadd.f32 %v6658_v53, %v8555_v5 }
 0x361   : > { %v6660_v32 = vpop.f32.mrf.mxu0  ;;  %v6724_v36 = vpop.f32.mrf.mxu1 }
 0x362   : > { %v6661_v10 = vadd.f32 %v6660_v32, %v6659_v63  ;;  %v1985_v63 = vadd.f32 %v6655_v23, %v8555_v5  ;;  %v6725_v32 = vadd.f32 %v6724_v36, %v6723_v50 }
 0x363   : > { %v6662_v9 = vpop.f32.mrf.mxu0  ;;  %v8498_v52 = vpop.f32.mrf.mxu1 }
 0x364   : > { %v2082_v60 = vadd.f32 %v6719_v12, %v1985_v63 }
 0x365   : > { %v6663_v54 = vpop.f32.mrf.mxu0  ;;  %v8500_v13 = vpop.f32.mrf.mxu1 }
 0x366   : > { %v6728_v36 = vadd.f32 %v8500_v13, %v8498_v52 }
 0x367   : > { %v8502_v24 = vpop.f32.mrf.mxu0  ;;  %v8504_v55 = vpop.f32.mrf.mxu1 }
 0x369   : > { %v8506_v47 = vpop.f32.mrf.mxu0  ;;  %v8508_v25 = vpop.f32.mrf.mxu1 }
 0x36a   : > { %v6667_v50 = vadd.f32 %v8506_v47, %v8502_v24 }
 0x36b   : > { %v6668_v59 = vpop.f32.mrf.mxu0  ;;  %v6732_v31 = vpop.f32.mrf.mxu1 }
 0x36d   : > { %v6669_v22 = vpop.f32.mrf.mxu0  ;;  %v6733_v19 = vpop.f32.mrf.mxu1 }
 0x36e   : > { %v6670_v2 = vadd.f32 %v6669_v22, %v6668_v59  ;;  %v6734_v4 = vadd.f32 %v6733_v19, %v6732_v31  ;;  %v2001_v19 = vadd.f32 %v6667_v50, %v8555_v5 }
 0x36f   : > { %v6671_v18 = vpop.f32.mrf.mxu0  ;;  %v8510_v28 = vpop.f32.mrf.mxu1 }
 0x370   : > { %v2006_v37 = vadd.f32 %v6670_v2, %v8555_v5 }
 0x371   : > { %v6672_v29 = vpop.f32.mrf.mxu0  ;;  %v8512_v16 = vpop.f32.mrf.mxu1 }
 0x372   : > { %v6673_v35 = vadd.f32 %v6672_v29, %v6671_v18  ;;  %v6737_v52 = vadd.f32 %v8512_v16, %v8510_v28 }
 0x373   : > { %v8514_v21 = vpop.f32.mrf.mxu0  ;;  %v8516_v34 = vpop.f32.mrf.mxu1 }
 0x375   : > { %v8518_v39 = vpop.f32.mrf.mxu0  ;;  %v8520_v33 = vpop.f32.mrf.mxu1 }
 0x376   : > { %v6676_v13 = vadd.f32 %v8518_v39, %v8514_v21 }
 0x377   : > { %v8522_v0 = vpop.f32.mrf.mxu0  ;;  %v8524_v61 = vpop.f32.mrf.mxu1 }
 0x379   : > { %v8526_v15 = vpop.f32.mrf.mxu0  ;;  %v8528_v40 = vpop.f32.mrf.mxu1 }
 0x37b   : > { %v6680_v27 = vpop.f32.mrf.mxu0  ;;  %v8530_v20 = vpop.f32.mrf.mxu1 }
 0x37d   : > { %v6681_v6 = vpop.f32.mrf.mxu0  ;;  %v8534_v42 = vpop.f32.mrf.mxu1 }
 0x37e   : > { %v6682_v24 = vadd.f32 %v6681_v6, %v6680_v27 }
 0x37f   : > { %v8532_v8 = vpop.f32.mrf.mxu0  ;;  %v8540_v44 = vpop.f32.mrf.mxu1 }
 0x380   : > { %v2022_v21 = vadd.f32 %v6682_v24, %v8555_v5 }
 0x381   : > { %v8536_v45 = vpop.f32.mrf.mxu0  ;;  %v8546_v58 = vpop.f32.mrf.mxu1 }
 0x382   : > { %v6685_v23 = vadd.f32 %v8536_v45, %v8532_v8 }
 0x383   : > { %v8538_v30 = vpop.f32.mrf.mxu0  ;;  %v8557_v7 = vpop.f32.mrf.mxu1 }
 0x384   : > { %9977 = vst [vmem:[#allocation14_spill] sm:$0xff] %v8557_v7  ;;  %v1993_v7 = vadd.f32 %v6661_v10, %v8555_v5  ;;  %v6679_v10 = vadd.f32 %v8526_v15, %v8522_v0  ;;  %v2025_v45 = vadd.f32 %v6685_v23, %v8555_v5 }
 0x385   : > { %v8542_v57 = vpop.f32.mrf.mxu0  ;;  %v8565_v1 = vpop.f32.mrf.mxu1 }
 0x386   : > { %v2017_v8 = vadd.f32 %v6679_v10, %v8555_v5 }
 0x387   : > { %v8544_v48 = vpop.f32.mrf.mxu0  ;;  %v8578_v51 = vpop.f32.mrf.mxu1 }
 0x388   : > { %9975 = vst [vmem:[#allocation12_spill] sm:$0xff] %v8544_v48  ;;  %v6664_v48 = vadd.f32 %v6663_v54, %v6662_v9  ;;  %v2090_v9 = vadd.f32 %v6725_v32, %v1993_v7 }
 0x389   : > { %v8548_v49 = vpop.f32.mrf.mxu0  ;;  %v8593_v18 = vpop.f32.mrf.mxu1 }
 0x38a   : > { %9976 = vst [vmem:[#allocation13_spill] sm:$0xff] %v8548_v49  ;;  %v2087_v49 = vadd.f32 %v6722_v62, %v1990_v41  ;;  %v1998_v54 = vadd.f32 %v6664_v48, %v8555_v5  ;;  %v2103_v48 = vadd.f32 %v6734_v4, %v2006_v37  ;;  %v6731_v41 = vadd.f32 %v8508_v25, %v8504_v55 }
 0x38b   : > { %v8550_v17 = vpop.f32.mrf.mxu0  ;;  %v6756_v28 = vpop.f32.mrf.mxu1  ;;  %v2014_v55 = vadd.f32 %v6676_v13, %v8555_v5  ;;  %v6746_v25 = vadd.f32 %v8534_v42, %v8530_v20 }
 0x38c   : > { %v2095_v7 = vadd.f32 %v6728_v36, %v1998_v54  ;;  %v2098_v32 = vadd.f32 %v6731_v41, %v2001_v19  ;;  %v6749_v54 = vadd.f32 %v8546_v58, %v8540_v44 }
 0x38d   : > { %v8559_v26 = vpop.f32.mrf.mxu0  ;;  %v6757_v12 = vpop.f32.mrf.mxu1 }
 0x38f   : > { %v8562_v3 = vpop.f32.mrf.mxu0  ;;  %v9980_v41 = vld [vmem:[#allocation12_spill] sm:$0xff] }
 0x390   : > { %9978 = vst [vmem:[#allocation15_spill] sm:$0xff] %v8562_v3 }
 0x391   : > { %v8567_v46 = vpop.f32.mrf.mxu0  ;;  %v9981_v10 = vld [vmem:[#allocation13_spill] sm:$0xff] }
 0x392   : > { %v6691_v23 = vadd.f32 %v9981_v10, %v9980_v41  ;;  %v7633_v10 = vld [vmem:[#allocation5 + $0x258] sm:$0xff]  }
 0x393   : > { %v7344_v53 = vpop.f32.mrf.mxu0 }
 0x394   : > { %v8573_v3 = vadd.f32 %v7344_v53, %v2087_v49  ;;  %v2009_v49 = vadd.f32 %v6673_v35, %v8555_v5  ;;  %v2119_v35 = vadd.f32 %v6746_v25, %v2022_v21 }
 0x395   : > { %v2175_v59 = vpop.f32.mrf.mxu0 }
 0x396   : > { %v2240_v43 = vmax.f32 %v8573_v3, 0.0  ;;  %v8581_v22 = vadd.f32 %v2175_v59, %v2079_v11  ;;  %v2106_v53 = vadd.f32 %v6737_v52, %v2009_v49  ;;  %v6694_v11 = vadd.f32 %v8559_v26, %v8550_v17 }
 0x397   : > { %v7345_v14 = vpop.f32.mrf.mxu0  ;;  %v6740_v59 = vadd.f32 %v8520_v33, %v8516_v34  ;;  %v6688_v17 = vadd.f32 %v8542_v57, %v8538_v30  ;;  %v9979_v36 = vld [vmem:[#allocation15_spill] sm:$0xff]  ;;  %v2122_v30 = vadd.f32 %v6749_v54, %v2025_v45 }
 0x398   : > { %2256 = vst [vmem:[#allocation2 + $0x1a] sm:$0xff] %v2240_v43  ;;  %v2238_v2 = vmax.f32 %v8581_v22, 0.0  ;;  %v8589_v56 = vadd.f32 %v7345_v14, %v2090_v9  ;;  %v6743_v9 = vadd.f32 %v8528_v40, %v8524_v61  ;;  %v2038_v61 = vadd.f32 %v6694_v11, %v8555_v5  ;;  %v6759_v40 = vpop.f32.mrf.mxu1  ;;  %v9982_v11 = vld [vmem:[#allocation14_spill] sm:$0xff] }
 0x399   : > { %v2178_v29 = vpop.f32.mrf.mxu0  ;;  %v2111_v50 = vadd.f32 %v6740_v59, %v2014_v55  ;;  %v6697_v44 = vadd.f32 %v8567_v46, %v9979_v36  ;;  %v2030_v46 = vadd.f32 %v6688_v17, %v8555_v5  ;;  %v6758_v55 = vadd.f32 %v6757_v12, %v6756_v28  ;;  %v9983_v12 = vld [vmem:[#allocation11_spill] sm:$0xff] }
 0x39a   : > { %2254 = vst [vmem:[#allocation2 + $0x2] sm:$0xff] %v2238_v2  ;;  %v2241_v47 = vmax.f32 %v8589_v56, 0.0  ;;  %v8599_v31 = vadd.f32 %v2178_v29, %v2082_v60  ;;  %v2114_v49 = vadd.f32 %v6743_v9, %v2017_v8  ;;  %v6760_v59 = vpop.f32.mrf.mxu1  ;;  %v7631_v17 = vld [vmem:[#allocation5 + $0x268] sm:$0xff]   ;;  %v6755_v36 = vadd.f32 %v8593_v18, %v8578_v51 }
 0x39b   : > { %v7348_v38 = vpop.f32.mrf.mxu0  ;;  %v2135_v9 = vadd.f32 %v6758_v55, %v2038_v61 }
 0x39c   : > { %2257 = vst [vmem:[#allocation2 + $0x22] sm:$0xff] %v2241_v47  ;;  %v2239_v27 = vmax.f32 %v8599_v31, 0.0  ;;  %v8609_v6 = vadd.f32 %v7348_v38, %v2103_v48  ;;  %v2440_v51 = vpack.c.bf16 %v2241_v47, %v2240_v43 }
 0x39d   : > { %v2191_v16 = vpop.f32.mrf.mxu0 }
 0x39e   : > { %2255 = vst [vmem:[#allocation2 + $0xa] sm:$0xff] %v2239_v27  ;;  %v2244_v39 = vmax.f32 %v8609_v6, 0.0  ;;  %v8619_v62 = vadd.f32 %v2191_v16, %v2095_v7 }
 0x39f   : > { %v7349_v63 = vpop.f32.mrf.mxu0 }
 0x3a0   : > { %2260 = vst [vmem:[#allocation2 + $0x4a] sm:$0xff] %v2244_v39  ;;  %v2242_v0 = vmax.f32 %v8619_v62, 0.0  ;;  %v8627_v15 = vadd.f32 %v7349_v63, %v2106_v53  ;;  %v2435_v53 = vpack.c.bf16 %v2239_v27, %v2238_v2  ;;  %v2371_v63 = vld [vmem:[#allocation2 + $0x19] sm:$0xff]  ;;  %v2041_v2 = vadd.f32 %v6697_v44, %v8555_v5 }
 0x3a1   : > { %v2194_v37 = vpop.f32.mrf.mxu0  ;;  %v2369_v4 = vld [vmem:[#allocation2 + $0x1] sm:$0xff] }
 0x3a2   : > { %2258 = vst [vmem:[#allocation2 + $0x32] sm:$0xff] %v2242_v0  ;;  %v2245_v20 = vmax.f32 %v8627_v15, 0.0  ;;  %v8638_v42 = vadd.f32 %v2194_v37, %v2098_v32  ;;  %v2353_v14 = vld [vmem:[#allocation2] sm:$0xff]  ;;  %v7630_v32 = vld [vmem:[#allocation5 + $0x270] sm:$0xff]   ;;  %v6752_v37 = vadd.f32 %v8565_v1, %v9982_v11  ;;  %v2033_v1 = vadd.f32 %v6691_v23, %v8555_v5 }
 0x3a3   : > { %v7352_v26 = vpop.f32.mrf.mxu0  ;;  %v2372_v60 = vld [vmem:[#allocation2 + $0x21] sm:$0xff] }
 0x3a4   : > { %2261 = vst [vmem:[#allocation2 + $0x52] sm:$0xff] %v2245_v20  ;;  %v2243_v34 = vmax.f32 %v8638_v42, 0.0  ;;  %v8649_v33 = vadd.f32 %v7352_v26, %v2119_v35  ;;  %v2403_v52 = vld [vmem:[#allocation2 + $0x1b] sm:$0xff]  ;;  %v2404_v13 = vld [vmem:[#allocation2 + $0x23] sm:$0xff]  ;;  %v2439_v45 = vpack.c.bf16 %v2372_v60, %v2371_v63  ;;  %v6761_v26 = vadd.f32 %v6760_v59, %v6759_v40 }
 0x3a5   : > { %v2207_v58 = vpop.f32.mrf.mxu0  ;;  %v2370_v57 = vld [vmem:[#allocation2 + $0x9] sm:$0xff]  ;;  %v2441_v22 = vpack.c.bf16 %v2404_v13, %v2403_v52  ;;  %v2356_v60 = vld [vmem:[#allocation2 + $0x20] sm:$0xff] }
 0x3a6   : > { %v2401_v29 = vld [vmem:[#allocation2 + $0x3] sm:$0xff]  ;;  %v2402_v48 = vld [vmem:[#allocation2 + $0xb] sm:$0xff]  ;;  %2259 = vst [vmem:[#allocation2 + $0x3a] sm:$0xff] %v2243_v34  ;;  %v2248_v24 = vmax.f32 %v8649_v33, 0.0  ;;  %v8657_v31 = vadd.f32 %v2207_v58, %v2111_v50  ;;  %v2434_v19 = vpack.c.bf16 %v2370_v57, %v2369_v4  ;;  %v2138_v57 = vadd.f32 %v6761_v26, %v2041_v2 }
 0x3a7   : > { %v2436_v38 = vpack.c.bf16 %v2402_v48, %v2401_v29  ;;  %v2354_v7 = vld [vmem:[#allocation2 + $0x8] sm:$0xff]  ;;  %v7353_v16 = vpop.f32.mrf.mxu0  ;;  %v2355_v29 = vld [vmem:[#allocation2 + $0x18] sm:$0xff] }
 0x3a8   : > { %v2433_v21 = vpack.c.bf16 %v2354_v7, %v2353_v14  ;;  %2264 = vst [vmem:[#allocation2 + $0x7a] sm:$0xff] %v2248_v24  ;;  %v2246_v25 = vmax.f32 %v8657_v31, 0.0  ;;  %v8667_v8 = vadd.f32 %v7353_v16, %v2122_v30  ;;  %2751 = vmatprep.mubr.bf16.mxu1 %v2434_v19  ;;  %v2127_v14 = vadd.f32 %v6752_v37, %v2030_v46  ;;  %v7632_v46 = vld [vmem:[#allocation5 + $0x260] sm:$0xff]   ;;  %v2375_v55 = vld [vmem:[#allocation2 + $0x49] sm:$0xff] }
 0x3a9   : > { %2848 = vmatprep.mubr.bf16.mxu0 %v2436_v38  ;;  %v2210_v35 = vpop.f32.mrf.mxu0  ;;  %v2438_v19 = vpack.c.bf16 %v2356_v60, %v2355_v29  ;;  %v2373_v18 = vld [vmem:[#allocation2 + $0x31] sm:$0xff] }
 0x3aa   : > { %2752 = vmatmul.mubr.bf16.vlgmr.msra.gmra.mxu1 %v2433_v21  ;;  %2849 = vmatmul.mubr.bf16.vlgmr.msra.gmra.mxu0 %v2435_v53  ;;  %2262 = vst [vmem:[#allocation2 + $0x62] sm:$0xff] %v2246_v25  ;;  %v2249_v27 = vmax.f32 %v8667_v8, 0.0  ;;  %v8675_v28 = vadd.f32 %v2210_v35, %v2114_v49  ;;  %v2130_v49 = vadd.f32 %v6755_v36, %v2033_v1  ;;  %v2357_v53 = vld [vmem:[#allocation2 + $0x30] sm:$0xff]  ;;  %v7635_v35 = vld [vmem:[#allocation5 + $0x248] sm:$0xff]  }
 0x3ab   : > { %7359 = vmatpush3.bf16.msra.mxu1 %v9983_v12  ;;  %2759 = vmatprep.mubr.bf16.mxu1 %v2439_v45  ;;  %v7356_v54 = vpop.f32.mrf.mxu0  ;;  %v2376_v23 = vld [vmem:[#allocation2 + $0x51] sm:$0xff]  ;;  %v2359_v12 = vld [vmem:[#allocation2 + $0x48] sm:$0xff] }
 0x3ac   : > { %2856 = vmatprep.mubr.bf16.mxu0 %v2441_v22  ;;  %7360 = vmatprep.subr.bf16.mxu1 %v7630_v32  ;;  %2265 = vst [vmem:[#allocation2 + $0x82] sm:$0xff] %v2249_v27  ;;  %v2247_v50 = vmax.f32 %v8675_v28, 0.0  ;;  %v8682_v4 = vadd.f32 %v7356_v54, %v2135_v9  ;;  %v2407_v16 = vld [vmem:[#allocation2 + $0x4b] sm:$0xff]  ;;  %v2408_v21 = vld [vmem:[#allocation2 + $0x53] sm:$0xff]  ;;  %v2449_v45 = vpack.c.bf16 %v2376_v23, %v2375_v55  ;;  %v7636_v54 = vld [vmem:[#allocation5 + $0x240] sm:$0xff]  }
 0x3ad   : > { %v2223_v61 = vpop.f32.mrf.mxu0  ;;  %v2374_v44 = vld [vmem:[#allocation2 + $0x39] sm:$0xff]  ;;  %v2451_v11 = vpack.c.bf16 %v2408_v21, %v2407_v16  ;;  %v7634_v37 = vld [vmem:[#allocation5 + $0x250] sm:$0xff]   ;;  %v2460_v31 = vpack.c.bf16 %v2249_v27, %v2248_v24 }
 0x3ae   : > { %v2405_v5 = vld [vmem:[#allocation2 + $0x33] sm:$0xff]  ;;  %v2406_v58 = vld [vmem:[#allocation2 + $0x3b] sm:$0xff]  ;;  %2263 = vst [vmem:[#allocation2 + $0x6a] sm:$0xff] %v2247_v50  ;;  %v2252_v40 = vmax.f32 %v8682_v4, 0.0  ;;  %v8689_v30 = vadd.f32 %v2223_v61, %v2127_v14  ;;  %v2444_v52 = vpack.c.bf16 %v2374_v44, %v2373_v18 }
 0x3af   : > { %7361 = vmatpush3.bf16.msra.mxu1 %v7630_v32  ;;  %v7357_v48 = vpop.f32.mrf.mxu0  ;;  %v2446_v13 = vpack.c.bf16 %v2406_v58, %v2405_v5  ;;  %v2358_v47 = vld [vmem:[#allocation2 + $0x38] sm:$0xff]  ;;  %v2445_v32 = vpack.c.bf16 %v2243_v34, %v2242_v0  ;;  %v2360_v59 = vld [vmem:[#allocation2 + $0x50] sm:$0xff]  ;;  %v2450_v0 = vpack.c.bf16 %v2245_v20, %v2244_v39  ;;  %v2455_v39 = vpack.c.bf16 %v2247_v50, %v2246_v25 }
 0x3b0   : > { %7362 = vmatprep.subr.bf16.mxu1 %v7631_v17  ;;  %2268 = vst [vmem:[#allocation2 + $0xaa] sm:$0xff] %v2252_v40  ;;  %v2250_v38 = vmax.f32 %v8689_v30, 0.0  ;;  %v8698_v7 = vadd.f32 %v7357_v48, %v2138_v57  ;;  %v2443_v63 = vpack.c.bf16 %v2358_v47, %v2357_v53  ;;  %v2448_v42 = vpack.c.bf16 %v2360_v59, %v2359_v12  ;;  %v2379_v15 = vld [vmem:[#allocation2 + $0x79] sm:$0xff]  ;;  %v2418_v47 = vld [vmem:[#allocation2 + $0xc] sm:$0xff] }
 0x3b1   : > { %v2226_v41 = vpop.f32.mrf.mxu0  ;;  %v2377_v34 = vld [vmem:[#allocation2 + $0x61] sm:$0xff]  ;;  %v2363_v29 = vld [vmem:[#allocation2 + $0x78] sm:$0xff] }
 0x3b2   : > { %2760 = vmatmul.mubr.bf16.gmra.mxu1 %v2438_v19  ;;  %2857 = vmatmul.mubr.bf16.gmra.mxu0 %v2440_v51  ;;  %2266 = vst [vmem:[#allocation2 + $0x92] sm:$0xff] %v2250_v38  ;;  %v2253_v3 = vmax.f32 %v8698_v7, 0.0  ;;  %v8703_v43 = vadd.f32 %v2226_v41, %v2130_v49  ;;  %v2361_v6 = vld [vmem:[#allocation2 + $0x60] sm:$0xff]  ;;  %v2424_v55 = vld [vmem:[#allocation2 + $0x54] sm:$0xff] }
 0x3b3   : > { %2767 = vmatprep.mubr.bf16.mxu1 %v2444_v52  ;;  %2864 = vmatprep.mubr.bf16.mxu0 %v2446_v13  ;;  %v2380_v26 = vld [vmem:[#allocation2 + $0x81] sm:$0xff]  ;;  %v7637_v12 = vld [vmem:[#allocation5 + $0x2f8] sm:$0xff]  }
 0x3b4   : > { %7363 = vmatpush3.bf16.msra.mxu1 %v7631_v17  ;;  %2269 = vst [vmem:[#allocation2 + $0xb2] sm:$0xff] %v2253_v3  ;;  %v2251_v56 = vmax.f32 %v8703_v43, 0.0  ;;  %v2411_v14 = vld [vmem:[#allocation2 + $0x7b] sm:$0xff]  ;;  %v2412_v60 = vld [vmem:[#allocation2 + $0x83] sm:$0xff]  ;;  %v2459_v20 = vpack.c.bf16 %v2380_v26, %v2379_v15  ;;  %v2470_v30 = vpack.c.bf16 %v2253_v3, %v2252_v40  ;;  %6922 = vmatprep.subr.bf16.mxu0 %v7637_v12  ;;  %v7650_v15 = vld [vmem:[#allocation5 + $0x330] sm:$0xff]  }
 0x3b5   : > { %7364 = vmatprep.subr.bf16.mxu1 %v7632_v46  ;;  %v2378_v22 = vld [vmem:[#allocation2 + $0x69] sm:$0xff]  ;;  %v2461_v61 = vpack.c.bf16 %v2412_v60, %v2411_v14  ;;  %v2364_v44 = vld [vmem:[#allocation2 + $0x80] sm:$0xff]  ;;  %v7645_v14 = vld [vmem:[#allocation5 + $0x2d8] sm:$0xff]  }
 0x3b6   : > { %2267 = vst [vmem:[#allocation2 + $0x9a] sm:$0xff] %v2251_v56  ;;  %v2409_v2 = vld [vmem:[#allocation2 + $0x63] sm:$0xff]  ;;  %v2410_v62 = vld [vmem:[#allocation2 + $0x6b] sm:$0xff]  ;;  %v2454_v9 = vpack.c.bf16 %v2378_v22, %v2377_v34  ;;  %v2458_v48 = vpack.c.bf16 %v2364_v44, %v2363_v29  ;;  %v2465_v33 = vpack.c.bf16 %v2251_v56, %v2250_v38  ;;  %v2421_v56 = vld [vmem:[#allocation2 + $0x34] sm:$0xff] }
 0x3b7   : > { %v2456_v1 = vpack.c.bf16 %v2410_v62, %v2409_v2  ;;  %v2362_v17 = vld [vmem:[#allocation2 + $0x68] sm:$0xff]  ;;  %v2419_v38 = vld [vmem:[#allocation2 + $0x1c] sm:$0xff]  ;;  %v7639_v34 = vld [vmem:[#allocation5 + $0x2f0] sm:$0xff]  }
 0x3b8   : > { %7365 = vmatpush3.bf16.msra.mxu1 %v7632_v46  ;;  %v2453_v36 = vpack.c.bf16 %v2362_v17, %v2361_v6  ;;  %v2383_v8 = vld [vmem:[#allocation2 + $0xa9] sm:$0xff]  ;;  %v2422_v21 = vld [vmem:[#allocation2 + $0x3c] sm:$0xff] }
 0x3b9   : > { %7366 = vmatprep.subr.bf16.mxu1 %v7633_v10  ;;  %v2381_v25 = vld [vmem:[#allocation2 + $0x91] sm:$0xff]  ;;  %v2417_v41 = vld [vmem:[#allocation2 + $0x4] sm:$0xff]  ;;  %v2427_v40 = vld [vmem:[#allocation2 + $0x7c] sm:$0xff] }
 0x3ba   : > { %2768 = vmatmul.mubr.bf16.gmra.mxu1 %v2443_v63  ;;  %2865 = vmatmul.mubr.bf16.gmra.mxu0 %v2445_v32  ;;  %v2365_v52 = vld [vmem:[#allocation2 + $0x90] sm:$0xff]  ;;  %v2437_v16 = vpack.c.bf16 %v2418_v47, %v2417_v41  ;;  %v2420_v43 = vld [vmem:[#allocation2 + $0x24] sm:$0xff]  ;;  %v2447_v63 = vpack.c.bf16 %v2422_v21, %v2421_v56  ;;  %v7647_v60 = vld [vmem:[#allocation5 + $0x378] sm:$0xff]  }
 0x3bb   : > { %2775 = vmatprep.mubr.bf16.mxu1 %v2449_v45  ;;  %2872 = vmatprep.mubr.bf16.mxu0 %v2451_v11  ;;  %v2384_v19 = vld [vmem:[#allocation2 + $0xb1] sm:$0xff]  ;;  %v2442_v53 = vpack.c.bf16 %v2420_v43, %v2419_v38  ;;  %v2425_v45 = vld [vmem:[#allocation2 + $0x64] sm:$0xff] }
 0x3bc   : > { %7367 = vmatpush3.bf16.msra.mxu1 %v7633_v10  ;;  %v2415_v51 = vld [vmem:[#allocation2 + $0xab] sm:$0xff]  ;;  %v2416_v18 = vld [vmem:[#allocation2 + $0xb3] sm:$0xff]  ;;  %v2469_v24 = vpack.c.bf16 %v2384_v19, %v2383_v8  ;;  %v7643_v17 = vld [vmem:[#allocation5 + $0x2e0] sm:$0xff]  }
 0x3bd   : > { %7368 = vmatprep.subr.bf16.mxu1 %v7634_v37  ;;  %v2382_v5 = vld [vmem:[#allocation2 + $0x99] sm:$0xff]  ;;  %v2471_v27 = vpack.c.bf16 %v2416_v18, %v2415_v51  ;;  %v2368_v46 = vld [vmem:[#allocation2 + $0xb0] sm:$0xff]  ;;  %v2367_v10 = vld [vmem:[#allocation2 + $0xa8] sm:$0xff] }
 0x3be   : > { %v2413_v58 = vld [vmem:[#allocation2 + $0x93] sm:$0xff]  ;;  %v2414_v57 = vld [vmem:[#allocation2 + $0x9b] sm:$0xff]  ;;  %v2464_v28 = vpack.c.bf16 %v2382_v5, %v2381_v25  ;;  %v2468_v23 = vpack.c.bf16 %v2368_v46, %v2367_v10  ;;  %v2428_v7 = vld [vmem:[#allocation2 + $0x84] sm:$0xff] }
 0x3bf   : > { %v2466_v50 = vpack.c.bf16 %v2414_v57, %v2413_v58  ;;  %v2366_v49 = vld [vmem:[#allocation2 + $0x98] sm:$0xff]  ;;  %v2423_v32 = vld [vmem:[#allocation2 + $0x4c] sm:$0xff]  ;;  %v7644_v26 = vld [vmem:[#allocation5 + $0x2a0] sm:$0xff]  }
 0x3c0   : > { %7369 = vmatpush3.bf16.msra.mxu1 %v7634_v37  ;;  %v2463_v13 = vpack.c.bf16 %v2366_v49, %v2365_v52  ;;  %v2426_v11 = vld [vmem:[#allocation2 + $0x6c] sm:$0xff]  ;;  %v2452_v4 = vpack.c.bf16 %v2424_v55, %v2423_v32  ;;  %v2429_v3 = vld [vmem:[#allocation2 + $0x94] sm:$0xff]  ;;  %v2430_v59 = vld [vmem:[#allocation2 + $0x9c] sm:$0xff] }
 0x3c1   : > { %7370 = vmatprep.subr.bf16.mxu1 %v7635_v35  ;;  %v2457_v37 = vpack.c.bf16 %v2426_v11, %v2425_v45  ;;  %v2467_v22 = vpack.c.bf16 %v2430_v59, %v2429_v3  ;;  %v2431_v2 = vld [vmem:[#allocation2 + $0xac] sm:$0xff]  ;;  %v2432_v62 = vld [vmem:[#allocation2 + $0xb4] sm:$0xff]  ;;  %v7655_v58 = vld [vmem:[#allocation5 + $0x360] sm:$0xff]  }
 0x3c2   : > { %2776 = vmatmul.mubr.bf16.gmra.mxu1 %v2448_v42  ;;  %2873 = vmatmul.mubr.bf16.gmra.mxu0 %v2450_v0  ;;  %v2472_v42 = vpack.c.bf16 %v2432_v62, %v2431_v2  ;;  %v7638_v0 = vld [vmem:[#allocation5 + $0x2b8] sm:$0xff]   ;;  %v7654_v44 = vld [vmem:[#allocation5 + $0x328] sm:$0xff]   ;;  %v7652_v5 = vld [vmem:[#allocation5 + $0x290] sm:$0xff]  }
 0x3c3   : > { %2783 = vmatprep.mubr.bf16.mxu1 %v2454_v9  ;;  %2880 = vmatprep.mubr.bf16.mxu0 %v2456_v1  ;;  %v7640_v9 = vld [vmem:[#allocation5 + $0x2b0] sm:$0xff]   ;;  %v7641_v1 = vld [vmem:[#allocation5 + $0x2e8] sm:$0xff]   ;;  %v7648_v6 = vld [vmem:[#allocation5 + $0x338] sm:$0xff]  }
 0x3c4   : > { %7371 = vmatpush3.bf16.msra.mxu1 %v7635_v35  ;;  %v2462_v35 = vpack.c.bf16 %v2428_v7, %v2427_v40  ;;  %6923 = vmatpush3.bf16.msra.mxu0 %v7638_v0  ;;  %v7656_v57 = vld [vmem:[#allocation5 + $0x320] sm:$0xff]   ;;  %v7659_v29 = vld [vmem:[#allocation5 + $0x358] sm:$0xff]   ;;  %v7661_v25 = vld [vmem:[#allocation5 + $0x350] sm:$0xff]  }
 0x3c5   : > { %7372 = vmatprep.subr.bf16.mxu1 %v7636_v54  ;;  %6924 = vmatprep.subr.bf16.mxu0 %v7639_v34  ;;  %v7665_v49 = vld [vmem:[#allocation5 + $0x348] sm:$0xff]   ;;  %v7663_v51 = vld [vmem:[#allocation5 + $0x2c0] sm:$0xff]  }
 0x3c6   : > { %v7666_v19 = vld [vmem:[#allocation5 + $0x308] sm:$0xff]   ;;  %v7667_v18 = vld [vmem:[#allocation5 + $0x340] sm:$0xff]  }
 0x3c7   : > { %v7664_v52 = vld [vmem:[#allocation5 + $0x280] sm:$0xff]  }
 0x3c8   : > { %7373 = vmatpush3.bf16.msra.mxu1 %v7636_v54  ;;  %6925 = vmatpush3.bf16.msra.mxu0 %v7640_v9  ;;  %v7642_v54 = vld [vmem:[#allocation5 + $0x2a8] sm:$0xff]  }
 0x3c9   : > { %6926 = vmatprep.subr.bf16.mxu0 %v7641_v1  ;;  %6986 = vmatprep.subr.bf16.mxu1 %v7647_v60 }
 0x3ca   : > { %2784 = vmatmul.mubr.bf16.gmra.mxu1 %v2453_v36  ;;  %2881 = vmatmul.mubr.bf16.gmra.mxu0 %v2455_v39  ;;  %v7646_v36 = vld [vmem:[#allocation5 + $0x298] sm:$0xff]   ;;  %v7649_v39 = vld [vmem:[#allocation5 + $0x370] sm:$0xff]  }
 0x3cb   : > { %2791 = vmatprep.mubr.bf16.mxu1 %v2459_v20  ;;  %2888 = vmatprep.mubr.bf16.mxu0 %v2461_v61  ;;  %v7651_v20 = vld [vmem:[#allocation5 + $0x2d0] sm:$0xff]   ;;  %v7653_v61 = vld [vmem:[#allocation5 + $0x368] sm:$0xff]  }
 0x3cc   : > { %6927 = vmatpush3.bf16.msra.mxu0 %v7642_v54 }
 0x3cd   : > { %6928 = vmatprep.subr.bf16.mxu0 %v7643_v17 }
 0x3d0   : > { %6929 = vmatpush3.bf16.msra.mxu0 %v7644_v26 }
 0x3d1   : > { %6930 = vmatprep.subr.bf16.mxu0 %v7645_v14 }
 0x3d2   : > { %2792 = vmatmul.mubr.bf16.gmra.mxu1 %v2458_v48  ;;  %2889 = vmatmul.mubr.bf16.gmra.mxu0 %v2460_v31  ;;  %v7660_v48 = vld [vmem:[#allocation5 + $0x318] sm:$0xff]   ;;  %v7657_v31 = vld [vmem:[#allocation5 + $0x2c8] sm:$0xff]  }
 0x3d3   : > { %2799 = vmatprep.mubr.bf16.mxu1 %v2464_v28  ;;  %2896 = vmatprep.mubr.bf16.mxu0 %v2466_v50  ;;  %v7658_v28 = vld [vmem:[#allocation5 + $0x288] sm:$0xff]   ;;  %v7662_v50 = vld [vmem:[#allocation5 + $0x310] sm:$0xff]  }
 0x3d4   : > { %6931 = vmatpush3.bf16.msra.mxu0 %v7646_v36 }
 0x3d5   : > { %6932 = vmatprep.subr.bf16.mxu0 %v7651_v20 }
 0x3d8   : > { %6933 = vmatpush3.bf16.msra.mxu0 %v7652_v5 }
 0x3d9   : > { %6934 = vmatprep.subr.bf16.mxu0 %v7657_v31 }
 0x3da   : > { %2800 = vmatmul.mubr.bf16.gmra.mxu1 %v2463_v13  ;;  %2897 = vmatmul.mubr.bf16.gmra.mxu0 %v2465_v33  ;;  %v7668_v13 = vld [vmem:[#allocation5 + $0x300] sm:$0xff]   ;;  %v8734_v33 = vld [vmem:[#allocation5 + $0x3b8] sm:$0xff]  }
 0x3db   : > { %2807 = vmatprep.mubr.bf16.mxu1 %v2469_v24  ;;  %2904 = vmatprep.mubr.bf16.mxu0 %v2471_v27  ;;  %9984 = vst [vmem:[#allocation15_spill] sm:$0xff] %v8734_v33 }
 0x3dc   : > { %6935 = vmatpush3.bf16.msra.mxu0 %v7658_v28  ;;  %v8802_v28 = vld [vmem:[%s9958_s5 + $0x1] ss:$0 sm:$0xff] }
 0x3dd   : > { %6936 = vmatprep.subr.bf16.mxu0 %v7663_v51 }
 0x3e0   : > { %6937 = vmatpush3.bf16.msra.mxu0 %v7664_v52 }
 0x3e1   : > { %7390 = vmatprep.subr.bf16.mxu0 %v8734_v33 }
 0x3e2   : > { %2808 = vmatmul.mubr.bf16.gmra.mxu1 %v2468_v23  ;;  %2905 = vmatmul.mubr.bf16.gmra.mxu0 %v2470_v30 }
 0x3e3   : > { %7374 = vmatprep.mubr.bf16.mxu1 %v2437_v16 }
 0x3ea   : > { %7375 = vmatmul.mubr.bf16.vlgmr.msra.gmra.mxu1 %v2442_v53 }
 0x3eb   : > { %7378 = vmatprep.mubr.bf16.mxu1 %v2447_v63  ;;  %6987 = vmatpush3.bf16.msra.mxu1 %v7648_v6 }
 0x3ec   : > { %6988 = vmatprep.subr.bf16.mxu1 %v7649_v39 }
 0x3ef   : > { %6989 = vmatpush3.bf16.msra.mxu1 %v7650_v15 }
 0x3f0   : > { %6990 = vmatprep.subr.bf16.mxu1 %v7653_v61 }
 0x3f2   : > { %7379 = vmatmul.mubr.bf16.gmra.mxu1 %v2452_v4 }
 0x3f3   : > { %7382 = vmatprep.mubr.bf16.mxu1 %v2457_v37  ;;  %6991 = vmatpush3.bf16.msra.mxu1 %v7654_v44 }
 0x3f4   : > { %6992 = vmatprep.subr.bf16.mxu1 %v7655_v58 }
 0x3f7   : > { %6993 = vmatpush3.bf16.msra.mxu1 %v7656_v57 }
 0x3f8   : > { %6994 = vmatprep.subr.bf16.mxu1 %v7659_v29 }
 0x3fa   : > { %7383 = vmatmul.mubr.bf16.gmra.mxu1 %v2462_v35 }
 0x3fb   : > { %7386 = vmatprep.mubr.bf16.mxu1 %v2467_v22  ;;  %6995 = vmatpush3.bf16.msra.mxu1 %v7660_v48 }
 0x3fc   : > { %6996 = vmatprep.subr.bf16.mxu1 %v7661_v25 }
 0x3ff   : > { %6997 = vmatpush3.bf16.msra.mxu1 %v7662_v50 }
 0x400   : > { %6998 = vmatprep.subr.bf16.mxu1 %v7665_v49 }
 0x402   : > { %7387 = vmatmul.mubr.bf16.gmra.mxu1 %v2472_v42 }
 0x403   : > { %6999 = vmatpush3.bf16.msra.mxu1 %v7666_v19 }
 0x404   : > { %7000 = vmatprep.subr.bf16.mxu1 %v7667_v18 }
 0x407   : > { %7001 = vmatpush3.bf16.msra.mxu1 %v7668_v13 }
 0x46a   : > { %v6794_v8 = vpop.f32.mrf.mxu1  ;;  %v8737_v24 = vpop.f32.mrf.mxu0 }
 0x46c   : > { %v6795_v27 = vpop.f32.mrf.mxu1  ;;  %v8739_v46 = vpop.f32.mrf.mxu0 }
 0x46d   : > { %v6796_v25 = vadd.f32 %v6795_v27, %v6794_v8  ;;  %v6860_v33 = vadd.f32 %v8739_v46, %v8737_v24 }
 0x46e   : > { %v6797_v41 = vpop.f32.mrf.mxu1  ;;  %v8741_v47 = vpop.f32.mrf.mxu0 }
 0x46f   : > { %v2754_v52 = vadd.f32 %v6796_v25, %v8802_v28 }
 0x470   : > { %v6798_v10 = vpop.f32.mrf.mxu1  ;;  %v8743_v23 = vpop.f32.mrf.mxu0 }
 0x471   : > { %v6799_v13 = vadd.f32 %v6798_v10, %v6797_v41  ;;  %v2851_v41 = vadd.f32 %v6860_v33, %v2754_v52  ;;  %v6863_v10 = vadd.f32 %v8743_v23, %v8741_v47 }
 0x472   : > { %v6800_v30 = vpop.f32.mrf.mxu1  ;;  %v6864_v16 = vpop.f32.mrf.mxu0 }
 0x474   : > { %v6801_v38 = vpop.f32.mrf.mxu1  ;;  %v6865_v43 = vpop.f32.mrf.mxu0 }
 0x475   : > { %v6802_v48 = vadd.f32 %v6801_v38, %v6800_v30  ;;  %v6866_v30 = vadd.f32 %v6865_v43, %v6864_v16 }
 0x476   : > { %v6803_v56 = vpop.f32.mrf.mxu1  ;;  %v6867_v21 = vpop.f32.mrf.mxu0 }
 0x477   : > { %v2762_v19 = vadd.f32 %v6802_v48, %v8802_v28 }
 0x478   : > { %v6804_v53 = vpop.f32.mrf.mxu1  ;;  %v6868_v63 = vpop.f32.mrf.mxu0 }
 0x479   : > { %v6805_v51 = vadd.f32 %v6804_v53, %v6803_v56  ;;  %v2757_v56 = vadd.f32 %v6799_v13, %v8802_v28  ;;  %v6869_v53 = vadd.f32 %v6868_v63, %v6867_v21 }
 0x47a   : > { %v6806_v32 = vpop.f32.mrf.mxu1  ;;  %v8745_v55 = vpop.f32.mrf.mxu0 }
 0x47c   : > { %v6807_v45 = vpop.f32.mrf.mxu1  ;;  %v8747_v11 = vpop.f32.mrf.mxu0 }
 0x47e   : > { %v8749_v4 = vpop.f32.mrf.mxu1  ;;  %v8751_v37 = vpop.f32.mrf.mxu0 }
 0x480   : > { %v8753_v40 = vpop.f32.mrf.mxu1  ;;  %v8755_v7 = vpop.f32.mrf.mxu0 }
 0x481   : > { %v6811_v21 = vadd.f32 %v8753_v40, %v8749_v4  ;;  %v6875_v52 = vadd.f32 %v8755_v7, %v8751_v37 }
 0x482   : > { %v6812_v3 = vpop.f32.mrf.mxu1  ;;  %v6876_v59 = vpop.f32.mrf.mxu0 }
 0x484   : > { %v6813_v35 = vpop.f32.mrf.mxu1  ;;  %v6877_v22 = vpop.f32.mrf.mxu0 }
 0x485   : > { %v6814_v38 = vadd.f32 %v6813_v35, %v6812_v3  ;;  %v6878_v33 = vadd.f32 %v6877_v22, %v6876_v59  ;;  %v2773_v22 = vadd.f32 %v6811_v21, %v8802_v28 }
 0x486   : > { %v6815_v2 = vpop.f32.mrf.mxu1  ;;  %v8757_v62 = vpop.f32.mrf.mxu0 }
 0x487   : > { %v2778_v16 = vadd.f32 %v6814_v38, %v8802_v28 }
 0x488   : > { %v6816_v12 = vpop.f32.mrf.mxu1  ;;  %v8759_v42 = vpop.f32.mrf.mxu0 }
 0x489   : > { %v6817_v24 = vadd.f32 %v6816_v12, %v6815_v2  ;;  %v2854_v2 = vadd.f32 %v6863_v10, %v2757_v56  ;;  %v6872_v12 = vadd.f32 %v8747_v11, %v8745_v55  ;;  %v6881_v55 = vadd.f32 %v8759_v42, %v8757_v62 }
 0x48a   : > { %v8761_v0 = vpop.f32.mrf.mxu1  ;;  %v8763_v34 = vpop.f32.mrf.mxu0 }
 0x48c   : > { %v8765_v9 = vpop.f32.mrf.mxu1  ;;  %v8767_v1 = vpop.f32.mrf.mxu0 }
 0x48d   : > { %v6820_v11 = vadd.f32 %v8765_v9, %v8761_v0 }
 0x48e   : > { %v8769_v54 = vpop.f32.mrf.mxu1  ;;  %v8771_v17 = vpop.f32.mrf.mxu0 }
 0x48f   : > { %v2786_v37 = vadd.f32 %v6820_v11, %v8802_v28 }
 0x490   : > { %v8773_v26 = vpop.f32.mrf.mxu1  ;;  %v8775_v14 = vpop.f32.mrf.mxu0 }
 0x491   : > { %v6823_v13 = vadd.f32 %v8773_v26, %v8769_v54 }
 0x492   : > { %v6824_v60 = vpop.f32.mrf.mxu1  ;;  %v8777_v6 = vpop.f32.mrf.mxu0 }
 0x494   : > { %v6825_v36 = vpop.f32.mrf.mxu1  ;;  %v8781_v15 = vpop.f32.mrf.mxu0 }
 0x495   : > { %v6826_v4 = vadd.f32 %v6825_v36, %v6824_v60  ;;  %v6890_v7 = vadd.f32 %v8781_v15, %v8777_v6 }
 0x496   : > { %v8779_v39 = vpop.f32.mrf.mxu1  ;;  %v8787_v44 = vpop.f32.mrf.mxu0 }
 0x497   : > { %v2794_v0 = vadd.f32 %v6826_v4, %v8802_v28 }
 0x498   : > { %v8783_v20 = vpop.f32.mrf.mxu1  ;;  %v8793_v57 = vpop.f32.mrf.mxu0 }
 0x49a   : > { %v8785_v61 = vpop.f32.mrf.mxu1  ;;  %v8804_v50 = vpop.f32.mrf.mxu0 }
 0x49b   : > { %9987 = vst [vmem:[#allocation14_spill] sm:$0xff] %v8804_v50  ;;  %v2765_v50 = vadd.f32 %v6805_v51, %v8802_v28 }
 0x49c   : > { %v8789_v5 = vpop.f32.mrf.mxu1  ;;  %v8812_v8 = vpop.f32.mrf.mxu0 }
 0x49e   : > { %v8791_v58 = vpop.f32.mrf.mxu1  ;;  %v8825_v43 = vpop.f32.mrf.mxu0 }
 0x49f   : > { %9985 = vst [vmem:[#allocation12_spill] sm:$0xff] %v8791_v58  ;;  %v6808_v58 = vadd.f32 %v6807_v45, %v6806_v32  ;;  %v2862_v32 = vadd.f32 %v6869_v53, %v2765_v50  ;;  %v2781_v50 = vadd.f32 %v6817_v24, %v8802_v28  ;;  %v2870_v53 = vadd.f32 %v6875_v52, %v2773_v22 }
 0x4a0   : > { %v8795_v29 = vpop.f32.mrf.mxu1  ;;  %v2891_v24 = vadd.f32 %v6890_v7, %v2794_v0 }
 0x4a1   : > { %9986 = vst [vmem:[#allocation13_spill] sm:$0xff] %v8795_v29  ;;  %v2859_v29 = vadd.f32 %v6866_v30, %v2762_v19  ;;  %v2770_v45 = vadd.f32 %v6808_v58, %v8802_v28  ;;  %v2875_v58 = vadd.f32 %v6878_v33, %v2778_v16  ;;  %v6829_v30 = vadd.f32 %v8783_v20, %v8779_v39 }
 0x4a2   : > { %v8797_v31 = vpop.f32.mrf.mxu1  ;;  %v2789_v39 = vadd.f32 %v6823_v13, %v8802_v28 }
 0x4a3   : > { %v2867_v51 = vadd.f32 %v6872_v12, %v2770_v45  ;;  %v2797_v20 = vadd.f32 %v6829_v30, %v8802_v28  ;;  %v6893_v45 = vadd.f32 %v8793_v57, %v8787_v44 }
 0x4a4   : > { %v8806_v49 = vpop.f32.mrf.mxu1 }
 0x4a6   : > { %v8809_v18 = vpop.f32.mrf.mxu1  ;;  %v9990_v52 = vld [vmem:[#allocation12_spill] sm:$0xff] }
 0x4a7   : > { %9988 = vst [vmem:[#allocation11_spill] sm:$0xff] %v8809_v18 }
 0x4a8   : > { %v8814_v27 = vpop.f32.mrf.mxu1  ;;  %v9991_v13 = vld [vmem:[#allocation13_spill] sm:$0xff] }
 0x4a9   : > { %v6835_v30 = vadd.f32 %v9991_v13, %v9990_v52  ;;  %v7673_v13 = vld [vmem:[#allocation5 + $0x398] sm:$0xff]  }
 0x4aa   : > { %v7376_v48 = vpop.f32.mrf.mxu1 }
 0x4ab   : > { %v8820_v18 = vadd.f32 %v7376_v48, %v2859_v29  ;;  %v8840_v29 = vpop.f32.mrf.mxu0  ;;  %v2878_v48 = vadd.f32 %v6881_v55, %v2781_v50 }
 0x4ac   : > { %v2947_v3 = vpop.f32.mrf.mxu1 }
 0x4ad   : > { %v3012_v46 = vmax.f32 %v8820_v18, 0.0  ;;  %v8828_v35 = vadd.f32 %v2947_v3, %v2851_v41  ;;  %v6900_v62 = vpop.f32.mrf.mxu0  ;;  %v6838_v41 = vadd.f32 %v8806_v49, %v8797_v31  ;;  %v6884_v3 = vadd.f32 %v8767_v1, %v8763_v34 }
 0x4ae   : > { %v7377_v63 = vpop.f32.mrf.mxu1  ;;  %v6832_v31 = vadd.f32 %v8789_v5, %v8785_v61  ;;  %v9989_v12 = vld [vmem:[#allocation11_spill] sm:$0xff]  ;;  %v2894_v61 = vadd.f32 %v6893_v45, %v2797_v20 }
 0x4af   : > { %3028 = vst [vmem:[#allocation2 + $0x1a] sm:$0xff] %v3012_v46  ;;  %v3010_v47 = vmax.f32 %v8828_v35, 0.0  ;;  %v8836_v23 = vadd.f32 %v7377_v63, %v2862_v32  ;;  %v6901_v10 = vpop.f32.mrf.mxu0  ;;  %v6887_v32 = vadd.f32 %v8775_v14, %v8771_v17  ;;  %v2883_v21 = vadd.f32 %v6884_v3, %v2786_v37 }
 0x4b0   : > { %v2950_v25 = vpop.f32.mrf.mxu1  ;;  %v2810_v17 = vadd.f32 %v6838_v41, %v8802_v28  ;;  %v6841_v44 = vadd.f32 %v8814_v27, %v9989_v12  ;;  %v2802_v27 = vadd.f32 %v6832_v31, %v8802_v28  ;;  %v6902_v37 = vadd.f32 %v6901_v10, %v6900_v62  ;;  %v9992_v41 = vld [vmem:[#allocation14_spill] sm:$0xff]  ;;  %v9993_v10 = vld [vmem:[#allocation15_spill] sm:$0xff] }
 0x4b1   : > { %3026 = vst [vmem:[#allocation2 + $0x2] sm:$0xff] %v3010_v47  ;;  %v3013_v40 = vmax.f32 %v8836_v23, 0.0  ;;  %v8846_v59 = vadd.f32 %v2950_v25, %v2854_v2  ;;  %v6903_v14 = vpop.f32.mrf.mxu0  ;;  %v2886_v50 = vadd.f32 %v6887_v32, %v2789_v39  ;;  %v7671_v31 = vld [vmem:[#allocation5 + $0x3a8] sm:$0xff]   ;;  %v6899_v12 = vadd.f32 %v8840_v29, %v8825_v43 }
 0x4b2   : > { %v7380_v19 = vpop.f32.mrf.mxu1  ;;  %v2907_v32 = vadd.f32 %v6902_v37, %v2810_v17 }
 0x4b3   : > { %3029 = vst [vmem:[#allocation2 + $0x22] sm:$0xff] %v3013_v40  ;;  %v3011_v60 = vmax.f32 %v8846_v59, 0.0  ;;  %v8856_v36 = vadd.f32 %v7380_v19, %v2875_v58  ;;  %v6904_v3 = vpop.f32.mrf.mxu0  ;;  %v3212_v43 = vpack.c.bf16 %v3013_v40, %v3012_v46 }
 0x4b4   : > { %v2963_v42 = vpop.f32.mrf.mxu1 }
 0x4b5   : > { %3027 = vst [vmem:[#allocation2 + $0xa] sm:$0xff] %v3011_v60  ;;  %v3016_v9 = vmax.f32 %v8856_v36, 0.0  ;;  %v8866_v38 = vadd.f32 %v2963_v42, %v2867_v51 }
 0x4b6   : > { %v7381_v56 = vpop.f32.mrf.mxu1 }
 0x4b7   : > { %3032 = vst [vmem:[#allocation2 + $0x4a] sm:$0xff] %v3016_v9  ;;  %v3014_v54 = vmax.f32 %v8866_v38, 0.0  ;;  %v8874_v26 = vadd.f32 %v7381_v56, %v2878_v48  ;;  %v3207_v48 = vpack.c.bf16 %v3011_v60, %v3010_v47  ;;  %v3143_v56 = vld [vmem:[#allocation2 + $0x19] sm:$0xff]  ;;  %v2813_v47 = vadd.f32 %v6841_v44, %v8802_v28 }
 0x4b8   : > { %v2966_v16 = vpop.f32.mrf.mxu1  ;;  %v3141_v33 = vld [vmem:[#allocation2 + $0x1] sm:$0xff] }
 0x4b9   : > { %3030 = vst [vmem:[#allocation2 + $0x32] sm:$0xff] %v3014_v54  ;;  %v3017_v6 = vmax.f32 %v8874_v26, 0.0  ;;  %v8885_v15 = vadd.f32 %v2966_v16, %v2870_v53  ;;  %v3125_v63 = vld [vmem:[#allocation2] sm:$0xff]  ;;  %v7670_v53 = vld [vmem:[#allocation5 + $0x3b0] sm:$0xff]   ;;  %v6896_v16 = vadd.f32 %v8812_v8, %v9992_v41  ;;  %v2805_v8 = vadd.f32 %v6835_v30, %v8802_v28 }
 0x4ba   : > { %v7384_v49 = vpop.f32.mrf.mxu1  ;;  %v3144_v2 = vld [vmem:[#allocation2 + $0x21] sm:$0xff] }
 0x4bb   : > { %3033 = vst [vmem:[#allocation2 + $0x52] sm:$0xff] %v3017_v6  ;;  %v3015_v34 = vmax.f32 %v8885_v15, 0.0  ;;  %v8896_v1 = vadd.f32 %v7384_v49, %v2891_v24  ;;  %v3175_v55 = vld [vmem:[#allocation2 + $0x1b] sm:$0xff]  ;;  %v3176_v11 = vld [vmem:[#allocation2 + $0x23] sm:$0xff]  ;;  %v3211_v20 = vpack.c.bf16 %v3144_v2, %v3143_v56  ;;  %v6905_v49 = vadd.f32 %v6904_v3, %v6903_v14 }
 0x4bc   : > { %v2979_v57 = vpop.f32.mrf.mxu1  ;;  %v3142_v5 = vld [vmem:[#allocation2 + $0x9] sm:$0xff]  ;;  %v3213_v35 = vpack.c.bf16 %v3176_v11, %v3175_v55  ;;  %v3128_v2 = vld [vmem:[#allocation2 + $0x20] sm:$0xff] }
 0x4bd   : > { %v3173_v25 = vld [vmem:[#allocation2 + $0x3] sm:$0xff]  ;;  %v3174_v58 = vld [vmem:[#allocation2 + $0xb] sm:$0xff]  ;;  %3031 = vst [vmem:[#allocation2 + $0x3a] sm:$0xff] %v3015_v34  ;;  %v3020_v4 = vmax.f32 %v8896_v1, 0.0  ;;  %v8904_v59 = vadd.f32 %v2979_v57, %v2883_v21  ;;  %v3206_v22 = vpack.c.bf16 %v3142_v5, %v3141_v33  ;;  %v2910_v5 = vadd.f32 %v6905_v49, %v2813_v47 }
 0x4be   : > { %v3208_v19 = vpack.c.bf16 %v3174_v58, %v3173_v25  ;;  %v3126_v51 = vld [vmem:[#allocation2 + $0x8] sm:$0xff]  ;;  %v7385_v42 = vpop.f32.mrf.mxu1  ;;  %v3127_v25 = vld [vmem:[#allocation2 + $0x18] sm:$0xff] }
 0x4bf   : > { %v3205_v0 = vpack.c.bf16 %v3126_v51, %v3125_v63  ;;  %3036 = vst [vmem:[#allocation2 + $0x7a] sm:$0xff] %v3020_v4  ;;  %v3018_v7 = vmax.f32 %v8904_v59, 0.0  ;;  %v8914_v39 = vadd.f32 %v7385_v42, %v2894_v61  ;;  %3523 = vmatprep.mubr.bf16.mxu0 %v3206_v22  ;;  %v2899_v63 = vadd.f32 %v6896_v16, %v2802_v27  ;;  %v7672_v27 = vld [vmem:[#allocation5 + $0x3a0] sm:$0xff]   ;;  %v3147_v37 = vld [vmem:[#allocation2 + $0x49] sm:$0xff] }
 0x4c0   : > { %3620 = vmatprep.mubr.bf16.mxu1 %v3208_v19  ;;  %v2982_v24 = vpop.f32.mrf.mxu1  ;;  %v3210_v22 = vpack.c.bf16 %v3128_v2, %v3127_v25  ;;  %v3145_v29 = vld [vmem:[#allocation2 + $0x31] sm:$0xff] }
 0x4c1   : > { %3524 = vmatmul.mubr.bf16.vlgmr.msra.gmra.mxu0 %v3205_v0  ;;  %3621 = vmatmul.mubr.bf16.vlgmr.msra.gmra.mxu1 %v3207_v48  ;;  %3034 = vst [vmem:[#allocation2 + $0x62] sm:$0xff] %v3018_v7  ;;  %v3021_v60 = vmax.f32 %v8914_v39, 0.0  ;;  %v8922_v62 = vadd.f32 %v2982_v24, %v2886_v50  ;;  %v2902_v50 = vadd.f32 %v6899_v12, %v2805_v8  ;;  %v3129_v48 = vld [vmem:[#allocation2 + $0x30] sm:$0xff]  ;;  %v7675_v24 = vld [vmem:[#allocation5 + $0x388] sm:$0xff]  }
 0x4c2   : > { %7391 = vmatpush3.bf16.msra.mxu0 %v9993_v10  ;;  %3531 = vmatprep.mubr.bf16.mxu0 %v3211_v20  ;;  %v7388_v45 = vpop.f32.mrf.mxu1  ;;  %v3148_v30 = vld [vmem:[#allocation2 + $0x51] sm:$0xff]  ;;  %v3131_v10 = vld [vmem:[#allocation2 + $0x48] sm:$0xff] }
 0x4c3   : > { %3628 = vmatprep.mubr.bf16.mxu1 %v3213_v35  ;;  %7392 = vmatprep.subr.bf16.mxu0 %v7670_v53  ;;  %3037 = vst [vmem:[#allocation2 + $0x82] sm:$0xff] %v3021_v60  ;;  %v3019_v21 = vmax.f32 %v8922_v62, 0.0  ;;  %v8929_v33 = vadd.f32 %v7388_v45, %v2907_v32  ;;  %v3179_v42 = vld [vmem:[#allocation2 + $0x4b] sm:$0xff]  ;;  %v3180_v0 = vld [vmem:[#allocation2 + $0x53] sm:$0xff]  ;;  %v3221_v20 = vpack.c.bf16 %v3148_v30, %v3147_v37  ;;  %v7676_v45 = vld [vmem:[#allocation5 + $0x380] sm:$0xff]  }
 0x4c4   : > { %v2995_v17 = vpop.f32.mrf.mxu1  ;;  %v3146_v44 = vld [vmem:[#allocation2 + $0x39] sm:$0xff]  ;;  %v3223_v41 = vpack.c.bf16 %v3180_v0, %v3179_v42  ;;  %v7674_v16 = vld [vmem:[#allocation5 + $0x390] sm:$0xff]   ;;  %v3232_v59 = vpack.c.bf16 %v3021_v60, %v3020_v4 }
 0x4c5   : > { %v3177_v28 = vld [vmem:[#allocation2 + $0x33] sm:$0xff]  ;;  %v3178_v57 = vld [vmem:[#allocation2 + $0x3b] sm:$0xff]  ;;  %3035 = vst [vmem:[#allocation2 + $0x6a] sm:$0xff] %v3019_v21  ;;  %v3024_v14 = vmax.f32 %v8929_v33, 0.0  ;;  %v8936_v61 = vadd.f32 %v2995_v17, %v2899_v63  ;;  %v3216_v55 = vpack.c.bf16 %v3146_v44, %v3145_v29 }
 0x4c6   : > { %7393 = vmatpush3.bf16.msra.mxu0 %v7670_v53  ;;  %v7389_v58 = vpop.f32.mrf.mxu1  ;;  %v3218_v11 = vpack.c.bf16 %v3178_v57, %v3177_v28  ;;  %v3130_v40 = vld [vmem:[#allocation2 + $0x38] sm:$0xff]  ;;  %v3217_v53 = vpack.c.bf16 %v3015_v34, %v3014_v54  ;;  %v3132_v3 = vld [vmem:[#allocation2 + $0x50] sm:$0xff]  ;;  %v3222_v54 = vpack.c.bf16 %v3017_v6, %v3016_v9  ;;  %v3227_v9 = vpack.c.bf16 %v3019_v21, %v3018_v7 }
 0x4c7   : > { %7394 = vmatprep.subr.bf16.mxu0 %v7671_v31  ;;  %3040 = vst [vmem:[#allocation2 + $0xaa] sm:$0xff] %v3024_v14  ;;  %v3022_v19 = vmax.f32 %v8936_v61, 0.0  ;;  %v8945_v51 = vadd.f32 %v7389_v58, %v2910_v5  ;;  %v3215_v56 = vpack.c.bf16 %v3130_v40, %v3129_v48  ;;  %v3220_v15 = vpack.c.bf16 %v3132_v3, %v3131_v10  ;;  %v3151_v26 = vld [vmem:[#allocation2 + $0x79] sm:$0xff]  ;;  %v3190_v40 = vld [vmem:[#allocation2 + $0xc] sm:$0xff] }
 0x4c8   : > { %v2998_v52 = vpop.f32.mrf.mxu1  ;;  %v3149_v34 = vld [vmem:[#allocation2 + $0x61] sm:$0xff]  ;;  %v3135_v25 = vld [vmem:[#allocation2 + $0x78] sm:$0xff] }
 0x4c9   : > { %3532 = vmatmul.mubr.bf16.gmra.mxu0 %v3210_v22  ;;  %3629 = vmatmul.mubr.bf16.gmra.mxu1 %v3212_v43  ;;  %3038 = vst [vmem:[#allocation2 + $0x92] sm:$0xff] %v3022_v19  ;;  %v3025_v18 = vmax.f32 %v8945_v51, 0.0  ;;  %v8950_v46 = vadd.f32 %v2998_v52, %v2902_v50  ;;  %v3133_v36 = vld [vmem:[#allocation2 + $0x60] sm:$0xff]  ;;  %v3196_v37 = vld [vmem:[#allocation2 + $0x54] sm:$0xff] }
 0x4ca   : > { %3539 = vmatprep.mubr.bf16.mxu0 %v3216_v55  ;;  %3636 = vmatprep.mubr.bf16.mxu1 %v3218_v11  ;;  %v3152_v49 = vld [vmem:[#allocation2 + $0x81] sm:$0xff]  ;;  %v7677_v10 = vld [vmem:[#allocation5 + $0x438] sm:$0xff]  }
 0x4cb   : > { %7395 = vmatpush3.bf16.msra.mxu0 %v7671_v31  ;;  %3041 = vst [vmem:[#allocation2 + $0xb2] sm:$0xff] %v3025_v18  ;;  %v3023_v23 = vmax.f32 %v8950_v46, 0.0  ;;  %v3183_v63 = vld [vmem:[#allocation2 + $0x7b] sm:$0xff]  ;;  %v3184_v2 = vld [vmem:[#allocation2 + $0x83] sm:$0xff]  ;;  %v3231_v6 = vpack.c.bf16 %v3152_v49, %v3151_v26  ;;  %v3242_v61 = vpack.c.bf16 %v3025_v18, %v3024_v14  ;;  %7066 = vmatprep.subr.bf16.mxu1 %v7677_v10  ;;  %v7690_v26 = vld [vmem:[#allocation5 + $0x470] sm:$0xff]  }
 0x4cc   : > { %7396 = vmatprep.subr.bf16.mxu0 %v7672_v27  ;;  %v3150_v35 = vld [vmem:[#allocation2 + $0x69] sm:$0xff]  ;;  %v3233_v17 = vpack.c.bf16 %v3184_v2, %v3183_v63  ;;  %v3136_v44 = vld [vmem:[#allocation2 + $0x80] sm:$0xff]  ;;  %v7685_v63 = vld [vmem:[#allocation5 + $0x418] sm:$0xff]  }
 0x4cd   : > { %3039 = vst [vmem:[#allocation2 + $0x9a] sm:$0xff] %v3023_v23  ;;  %v3181_v47 = vld [vmem:[#allocation2 + $0x63] sm:$0xff]  ;;  %v3182_v38 = vld [vmem:[#allocation2 + $0x6b] sm:$0xff]  ;;  %v3226_v32 = vpack.c.bf16 %v3150_v35, %v3149_v34  ;;  %v3230_v58 = vpack.c.bf16 %v3136_v44, %v3135_v25  ;;  %v3237_v1 = vpack.c.bf16 %v3023_v23, %v3022_v19  ;;  %v3193_v23 = vld [vmem:[#allocation2 + $0x34] sm:$0xff] }
 0x4ce   : > { %v3228_v8 = vpack.c.bf16 %v3182_v38, %v3181_v47  ;;  %v3134_v31 = vld [vmem:[#allocation2 + $0x68] sm:$0xff]  ;;  %v3191_v19 = vld [vmem:[#allocation2 + $0x1c] sm:$0xff]  ;;  %v7679_v34 = vld [vmem:[#allocation5 + $0x430] sm:$0xff]  }
 0x4cf   : > { %7397 = vmatpush3.bf16.msra.mxu0 %v7672_v27  ;;  %v3225_v12 = vpack.c.bf16 %v3134_v31, %v3133_v36  ;;  %v3155_v39 = vld [vmem:[#allocation2 + $0xa9] sm:$0xff]  ;;  %v3194_v0 = vld [vmem:[#allocation2 + $0x3c] sm:$0xff] }
 0x4d0   : > { %7398 = vmatprep.subr.bf16.mxu0 %v7673_v13  ;;  %v3153_v7 = vld [vmem:[#allocation2 + $0x91] sm:$0xff]  ;;  %v3189_v52 = vld [vmem:[#allocation2 + $0x4] sm:$0xff]  ;;  %v3199_v14 = vld [vmem:[#allocation2 + $0x7c] sm:$0xff] }
 0x4d1   : > { %3540 = vmatmul.mubr.bf16.gmra.mxu0 %v3215_v56  ;;  %3637 = vmatmul.mubr.bf16.gmra.mxu1 %v3217_v53  ;;  %v3137_v55 = vld [vmem:[#allocation2 + $0x90] sm:$0xff]  ;;  %v3209_v42 = vpack.c.bf16 %v3190_v40, %v3189_v52  ;;  %v3192_v46 = vld [vmem:[#allocation2 + $0x24] sm:$0xff]  ;;  %v3219_v56 = vpack.c.bf16 %v3194_v0, %v3193_v23  ;;  %v7687_v2 = vld [vmem:[#allocation5 + $0x4b8] sm:$0xff]  }
 0x4d2   : > { %3547 = vmatprep.mubr.bf16.mxu0 %v3221_v20  ;;  %3644 = vmatprep.mubr.bf16.mxu1 %v3223_v41  ;;  %v3156_v22 = vld [vmem:[#allocation2 + $0xb1] sm:$0xff]  ;;  %v3214_v48 = vpack.c.bf16 %v3192_v46, %v3191_v19  ;;  %v3197_v20 = vld [vmem:[#allocation2 + $0x64] sm:$0xff] }
 0x4d3   : > { %7399 = vmatpush3.bf16.msra.mxu0 %v7673_v13  ;;  %v3187_v43 = vld [vmem:[#allocation2 + $0xab] sm:$0xff]  ;;  %v3188_v29 = vld [vmem:[#allocation2 + $0xb3] sm:$0xff]  ;;  %v3241_v4 = vpack.c.bf16 %v3156_v22, %v3155_v39  ;;  %v7683_v31 = vld [vmem:[#allocation5 + $0x420] sm:$0xff]  }
 0x4d4   : > { %7400 = vmatprep.subr.bf16.mxu0 %v7674_v16  ;;  %v3154_v28 = vld [vmem:[#allocation2 + $0x99] sm:$0xff]  ;;  %v3243_v60 = vpack.c.bf16 %v3188_v29, %v3187_v43  ;;  %v3140_v27 = vld [vmem:[#allocation2 + $0xb0] sm:$0xff]  ;;  %v3139_v13 = vld [vmem:[#allocation2 + $0xa8] sm:$0xff] }
 0x4d5   : > { %v3185_v57 = vld [vmem:[#allocation2 + $0x93] sm:$0xff]  ;;  %v3186_v5 = vld [vmem:[#allocation2 + $0x9b] sm:$0xff]  ;;  %v3236_v62 = vpack.c.bf16 %v3154_v28, %v3153_v7  ;;  %v3240_v30 = vpack.c.bf16 %v3140_v27, %v3139_v13  ;;  %v3200_v51 = vld [vmem:[#allocation2 + $0x84] sm:$0xff] }
 0x4d6   : > { %v3238_v21 = vpack.c.bf16 %v3186_v5, %v3185_v57  ;;  %v3138_v50 = vld [vmem:[#allocation2 + $0x98] sm:$0xff]  ;;  %v3195_v53 = vld [vmem:[#allocation2 + $0x4c] sm:$0xff]  ;;  %v7684_v49 = vld [vmem:[#allocation5 + $0x3e0] sm:$0xff]  }
 0x4d7   : > { %7401 = vmatpush3.bf16.msra.mxu0 %v7674_v16  ;;  %v3235_v11 = vpack.c.bf16 %v3138_v50, %v3137_v55  ;;  %v3198_v41 = vld [vmem:[#allocation2 + $0x6c] sm:$0xff]  ;;  %v3224_v33 = vpack.c.bf16 %v3196_v37, %v3195_v53  ;;  %v3201_v18 = vld [vmem:[#allocation2 + $0x94] sm:$0xff]  ;;  %v3202_v3 = vld [vmem:[#allocation2 + $0x9c] sm:$0xff] }
 0x4d8   : > { %7402 = vmatprep.subr.bf16.mxu0 %v7675_v24  ;;  %v3229_v16 = vpack.c.bf16 %v3198_v41, %v3197_v20  ;;  %v3239_v35 = vpack.c.bf16 %v3202_v3, %v3201_v18  ;;  %v3203_v47 = vld [vmem:[#allocation2 + $0xac] sm:$0xff]  ;;  %v3204_v38 = vld [vmem:[#allocation2 + $0xb4] sm:$0xff]  ;;  %v7695_v57 = vld [vmem:[#allocation5 + $0x4a0] sm:$0xff]  }
 0x4d9   : > { %3548 = vmatmul.mubr.bf16.gmra.mxu0 %v3220_v15  ;;  %3645 = vmatmul.mubr.bf16.gmra.mxu1 %v3222_v54  ;;  %v3244_v15 = vpack.c.bf16 %v3204_v38, %v3203_v47  ;;  %v7678_v54 = vld [vmem:[#allocation5 + $0x3f8] sm:$0xff]   ;;  %v7694_v44 = vld [vmem:[#allocation5 + $0x468] sm:$0xff]   ;;  %v7692_v28 = vld [vmem:[#allocation5 + $0x3d0] sm:$0xff]  }
 0x4da   : > { %3555 = vmatprep.mubr.bf16.mxu0 %v3226_v32  ;;  %3652 = vmatprep.mubr.bf16.mxu1 %v3228_v8  ;;  %v7680_v32 = vld [vmem:[#allocation5 + $0x3f0] sm:$0xff]   ;;  %v7681_v8 = vld [vmem:[#allocation5 + $0x428] sm:$0xff]   ;;  %v7688_v36 = vld [vmem:[#allocation5 + $0x478] sm:$0xff]  }
 0x4db   : > { %7403 = vmatpush3.bf16.msra.mxu0 %v7675_v24  ;;  %v3234_v24 = vpack.c.bf16 %v3200_v51, %v3199_v14  ;;  %7067 = vmatpush3.bf16.msra.mxu1 %v7678_v54  ;;  %v7696_v5 = vld [vmem:[#allocation5 + $0x460] sm:$0xff]   ;;  %v7699_v25 = vld [vmem:[#allocation5 + $0x498] sm:$0xff]   ;;  %v7701_v7 = vld [vmem:[#allocation5 + $0x490] sm:$0xff]  }
 0x4dc   : > { %7404 = vmatprep.subr.bf16.mxu0 %v7676_v45  ;;  %7068 = vmatprep.subr.bf16.mxu1 %v7679_v34  ;;  %v7705_v50 = vld [vmem:[#allocation5 + $0x488] sm:$0xff]   ;;  %v7703_v43 = vld [vmem:[#allocation5 + $0x400] sm:$0xff]  }
 0x4dd   : > { %v7706_v22 = vld [vmem:[#allocation5 + $0x448] sm:$0xff]   ;;  %v7707_v29 = vld [vmem:[#allocation5 + $0x480] sm:$0xff]  }
 0x4de   : > { %v7704_v55 = vld [vmem:[#allocation5 + $0x3c0] sm:$0xff]  }
 0x4df   : > { %7405 = vmatpush3.bf16.msra.mxu0 %v7676_v45  ;;  %7069 = vmatpush3.bf16.msra.mxu1 %v7680_v32  ;;  %v7682_v45 = vld [vmem:[#allocation5 + $0x3e8] sm:$0xff]  }
 0x4e0   : > { %7070 = vmatprep.subr.bf16.mxu1 %v7681_v8  ;;  %7130 = vmatprep.subr.bf16.mxu0 %v7687_v2 }
 0x4e1   : > { %3556 = vmatmul.mubr.bf16.gmra.mxu0 %v3225_v12  ;;  %3653 = vmatmul.mubr.bf16.gmra.mxu1 %v3227_v9  ;;  %v7686_v12 = vld [vmem:[#allocation5 + $0x3d8] sm:$0xff]   ;;  %v7689_v9 = vld [vmem:[#allocation5 + $0x4b0] sm:$0xff]  }
 0x4e2   : > { %3563 = vmatprep.mubr.bf16.mxu0 %v3231_v6  ;;  %3660 = vmatprep.mubr.bf16.mxu1 %v3233_v17  ;;  %v7691_v6 = vld [vmem:[#allocation5 + $0x410] sm:$0xff]   ;;  %v7693_v17 = vld [vmem:[#allocation5 + $0x4a8] sm:$0xff]  }
 0x4e3   : > { %7071 = vmatpush3.bf16.msra.mxu1 %v7682_v45 }
 0x4e4   : > { %7072 = vmatprep.subr.bf16.mxu1 %v7683_v31 }
 0x4e7   : > { %7073 = vmatpush3.bf16.msra.mxu1 %v7684_v49 }
 0x4e8   : > { %7074 = vmatprep.subr.bf16.mxu1 %v7685_v63 }
 0x4e9   : > { %3564 = vmatmul.mubr.bf16.gmra.mxu0 %v3230_v58  ;;  %3661 = vmatmul.mubr.bf16.gmra.mxu1 %v3232_v59  ;;  %v7700_v58 = vld [vmem:[#allocation5 + $0x458] sm:$0xff]   ;;  %v7697_v59 = vld [vmem:[#allocation5 + $0x408] sm:$0xff]  }
 0x4ea   : > { %3571 = vmatprep.mubr.bf16.mxu0 %v3236_v62  ;;  %3668 = vmatprep.mubr.bf16.mxu1 %v3238_v21  ;;  %v7698_v62 = vld [vmem:[#allocation5 + $0x3c8] sm:$0xff]   ;;  %v7702_v21 = vld [vmem:[#allocation5 + $0x450] sm:$0xff]  }
 0x4eb   : > { %7075 = vmatpush3.bf16.msra.mxu1 %v7686_v12 }
 0x4ec   : > { %7076 = vmatprep.subr.bf16.mxu1 %v7691_v6 }
 0x4ef   : > { %7077 = vmatpush3.bf16.msra.mxu1 %v7692_v28 }
 0x4f0   : > { %7078 = vmatprep.subr.bf16.mxu1 %v7697_v59 }
 0x4f1   : > { %3572 = vmatmul.mubr.bf16.gmra.mxu0 %v3235_v11  ;;  %3669 = vmatmul.mubr.bf16.gmra.mxu1 %v3237_v1  ;;  %v7708_v11 = vld [vmem:[#allocation5 + $0x440] sm:$0xff]   ;;  %v8981_v1 = vld [vmem:[#allocation5 + $0x4f8] sm:$0xff]  }
 0x4f2   : > { %3579 = vmatprep.mubr.bf16.mxu0 %v3241_v4  ;;  %3676 = vmatprep.mubr.bf16.mxu1 %v3243_v60  ;;  %9994 = vst [vmem:[#allocation11_spill] sm:$0xff] %v8981_v1 }
 0x4f3   : > { %7079 = vmatpush3.bf16.msra.mxu1 %v7698_v62  ;;  %v9049_v62 = vld [vmem:[%s9958_s5 + $0x2] ss:$0 sm:$0xff] }
 0x4f4   : > { %7080 = vmatprep.subr.bf16.mxu1 %v7703_v43 }
 0x4f7   : > { %7081 = vmatpush3.bf16.msra.mxu1 %v7704_v55 }
 0x4f8   : > { %7422 = vmatprep.subr.bf16.mxu1 %v8981_v1 }
 0x4f9   : > { %3580 = vmatmul.mubr.bf16.gmra.mxu0 %v3240_v30  ;;  %3677 = vmatmul.mubr.bf16.gmra.mxu1 %v3242_v61 }
 0x4fa   : > { %7406 = vmatprep.mubr.bf16.mxu0 %v3209_v42 }
 0x501   : > { %7407 = vmatmul.mubr.bf16.vlgmr.msra.gmra.mxu0 %v3214_v48 }
 0x502   : > { %7410 = vmatprep.mubr.bf16.mxu0 %v3219_v56  ;;  %7131 = vmatpush3.bf16.msra.mxu0 %v7688_v36 }
 0x503   : > { %7132 = vmatprep.subr.bf16.mxu0 %v7689_v9 }
 0x506   : > { %7133 = vmatpush3.bf16.msra.mxu0 %v7690_v26 }
 0x507   : > { %7134 = vmatprep.subr.bf16.mxu0 %v7693_v17 }
 0x509   : > { %7411 = vmatmul.mubr.bf16.gmra.mxu0 %v3224_v33 }
 0x50a   : > { %7414 = vmatprep.mubr.bf16.mxu0 %v3229_v16  ;;  %7135 = vmatpush3.bf16.msra.mxu0 %v7694_v44 }
 0x50b   : > { %7136 = vmatprep.subr.bf16.mxu0 %v7695_v57 }
 0x50e   : > { %7137 = vmatpush3.bf16.msra.mxu0 %v7696_v5 }
 0x50f   : > { %7138 = vmatprep.subr.bf16.mxu0 %v7699_v25 }
 0x511   : > { %7415 = vmatmul.mubr.bf16.gmra.mxu0 %v3234_v24 }
 0x512   : > { %7418 = vmatprep.mubr.bf16.mxu0 %v3239_v35  ;;  %7139 = vmatpush3.bf16.msra.mxu0 %v7700_v58 }
 0x513   : > { %7140 = vmatprep.subr.bf16.mxu0 %v7701_v7 }
 0x516   : > { %7141 = vmatpush3.bf16.msra.mxu0 %v7702_v21 }
 0x517   : > { %7142 = vmatprep.subr.bf16.mxu0 %v7705_v50 }
 0x519   : > { %7419 = vmatmul.mubr.bf16.gmra.mxu0 %v3244_v15 }
 0x51a   : > { %7143 = vmatpush3.bf16.msra.mxu0 %v7706_v22 }
 0x51b   : > { %7144 = vmatprep.subr.bf16.mxu0 %v7707_v29 }
 0x51e   : > { %7145 = vmatpush3.bf16.msra.mxu0 %v7708_v11 }
 0x581   : > { %v6938_v39 = vpop.f32.mrf.mxu0  ;;  %v8984_v4 = vpop.f32.mrf.mxu1 }
 0x583   : > { %v6939_v60 = vpop.f32.mrf.mxu0  ;;  %v8986_v27 = vpop.f32.mrf.mxu1 }
 0x584   : > { %v6940_v7 = vadd.f32 %v6939_v60, %v6938_v39  ;;  %v7004_v1 = vadd.f32 %v8986_v27, %v8984_v4 }
 0x585   : > { %v6941_v52 = vpop.f32.mrf.mxu0  ;;  %v8988_v40 = vpop.f32.mrf.mxu1 }
 0x586   : > { %v3526_v55 = vadd.f32 %v6940_v7, %v9049_v62 }
 0x587   : > { %v6942_v13 = vpop.f32.mrf.mxu0  ;;  %v8990_v30 = vpop.f32.mrf.mxu1 }
 0x588   : > { %v6943_v11 = vadd.f32 %v6942_v13, %v6941_v52  ;;  %v3623_v52 = vadd.f32 %v7004_v1, %v3526_v55  ;;  %v7007_v13 = vadd.f32 %v8990_v30, %v8988_v40 }
 0x589   : > { %v6944_v61 = vpop.f32.mrf.mxu0  ;;  %v7008_v42 = vpop.f32.mrf.mxu1 }
 0x58b   : > { %v6945_v19 = vpop.f32.mrf.mxu0  ;;  %v7009_v46 = vpop.f32.mrf.mxu1 }
 0x58c   : > { %v6946_v58 = vadd.f32 %v6945_v19, %v6944_v61  ;;  %v7010_v61 = vadd.f32 %v7009_v46, %v7008_v42 }
 0x58d   : > { %v6947_v23 = vpop.f32.mrf.mxu0  ;;  %v7011_v0 = vpop.f32.mrf.mxu1 }
 0x58e   : > { %v3534_v22 = vadd.f32 %v6946_v58, %v9049_v62 }
 0x58f   : > { %v6948_v48 = vpop.f32.mrf.mxu0  ;;  %v7012_v56 = vpop.f32.mrf.mxu1 }
 0x590   : > { %v6949_v43 = vadd.f32 %v6948_v48, %v6947_v23  ;;  %v3529_v23 = vadd.f32 %v6943_v11, %v9049_v62  ;;  %v7013_v48 = vadd.f32 %v7012_v56, %v7011_v0 }
 0x591   : > { %v6950_v53 = vpop.f32.mrf.mxu0  ;;  %v8992_v37 = vpop.f32.mrf.mxu1 }
 0x593   : > { %v6951_v20 = vpop.f32.mrf.mxu0  ;;  %v8994_v41 = vpop.f32.mrf.mxu1 }
 0x595   : > { %v8996_v33 = vpop.f32.mrf.mxu0  ;;  %v8998_v16 = vpop.f32.mrf.mxu1 }
 0x597   : > { %v9000_v14 = vpop.f32.mrf.mxu0  ;;  %v9002_v51 = vpop.f32.mrf.mxu1 }
 0x598   : > { %v6955_v0 = vadd.f32 %v9000_v14, %v8996_v33  ;;  %v7019_v55 = vadd.f32 %v9002_v51, %v8998_v16 }
 0x599   : > { %v6956_v18 = vpop.f32.mrf.mxu0  ;;  %v7020_v3 = vpop.f32.mrf.mxu1 }
 0x59b   : > { %v6957_v24 = vpop.f32.mrf.mxu0  ;;  %v7021_v35 = vpop.f32.mrf.mxu1 }
 0x59c   : > { %v6958_v19 = vadd.f32 %v6957_v24, %v6956_v18  ;;  %v7022_v1 = vadd.f32 %v7021_v35, %v7020_v3  ;;  %v3545_v35 = vadd.f32 %v6955_v0, %v9049_v62 }
 0x59d   : > { %v6959_v47 = vpop.f32.mrf.mxu0  ;;  %v9004_v38 = vpop.f32.mrf.mxu1 }
 0x59e   : > { %v3550_v42 = vadd.f32 %v6958_v19, %v9049_v62 }
 0x59f   : > { %v6960_v10 = vpop.f32.mrf.mxu0  ;;  %v9006_v15 = vpop.f32.mrf.mxu1 }
 0x5a0   : > { %v6961_v4 = vadd.f32 %v6960_v10, %v6959_v47  ;;  %v3626_v47 = vadd.f32 %v7007_v13, %v3529_v23  ;;  %v7016_v10 = vadd.f32 %v8994_v41, %v8992_v37  ;;  %v7025_v37 = vadd.f32 %v9006_v15, %v9004_v38 }
 0x5a1   : > { %v9008_v54 = vpop.f32.mrf.mxu0  ;;  %v9010_v34 = vpop.f32.mrf.mxu1 }
 0x5a3   : > { %v9012_v32 = vpop.f32.mrf.mxu0  ;;  %v9014_v8 = vpop.f32.mrf.mxu1 }
 0x5a4   : > { %v6964_v41 = vadd.f32 %v9012_v32, %v9008_v54 }
 0x5a5   : > { %v9016_v45 = vpop.f32.mrf.mxu0  ;;  %v9018_v31 = vpop.f32.mrf.mxu1 }
 0x5a6   : > { %v3558_v16 = vadd.f32 %v6964_v41, %v9049_v62 }
 0x5a7   : > { %v9020_v49 = vpop.f32.mrf.mxu0  ;;  %v9022_v63 = vpop.f32.mrf.mxu1 }
 0x5a8   : > { %v6967_v11 = vadd.f32 %v9020_v49, %v9016_v45 }
 0x5a9   : > { %v6968_v2 = vpop.f32.mrf.mxu0  ;;  %v9024_v36 = vpop.f32.mrf.mxu1 }
 0x5ab   : > { %v6969_v12 = vpop.f32.mrf.mxu0  ;;  %v9028_v26 = vpop.f32.mrf.mxu1 }
 0x5ac   : > { %v6970_v33 = vadd.f32 %v6969_v12, %v6968_v2  ;;  %v7034_v51 = vadd.f32 %v9028_v26, %v9024_v36 }
 0x5ad   : > { %v9026_v9 = vpop.f32.mrf.mxu0  ;;  %v9034_v44 = vpop.f32.mrf.mxu1 }
 0x5ae   : > { %v3566_v54 = vadd.f32 %v6970_v33, %v9049_v62 }
 0x5af   : > { %v9030_v6 = vpop.f32.mrf.mxu0  ;;  %v9040_v5 = vpop.f32.mrf.mxu1 }
 0x5b1   : > { %v9032_v17 = vpop.f32.mrf.mxu0  ;;  %v9051_v21 = vpop.f32.mrf.mxu1 }
 0x5b2   : > { %9997 = vst [vmem:[#allocation14_spill] sm:$0xff] %v9051_v21  ;;  %v3537_v21 = vadd.f32 %v6949_v43, %v9049_v62 }
 0x5b3   : > { %v9036_v28 = vpop.f32.mrf.mxu0  ;;  %v9059_v39 = vpop.f32.mrf.mxu1 }
 0x5b5   : > { %v9038_v57 = vpop.f32.mrf.mxu0  ;;  %v9072_v46 = vpop.f32.mrf.mxu1 }
 0x5b6   : > { %9995 = vst [vmem:[#allocation12_spill] sm:$0xff] %v9038_v57  ;;  %v6952_v57 = vadd.f32 %v6951_v20, %v6950_v53  ;;  %v3634_v53 = vadd.f32 %v7013_v48, %v3537_v21  ;;  %v3553_v21 = vadd.f32 %v6961_v4, %v9049_v62  ;;  %v3642_v48 = vadd.f32 %v7019_v55, %v3545_v35 }
 0x5b7   : > { %v9042_v25 = vpop.f32.mrf.mxu0  ;;  %v3663_v4 = vadd.f32 %v7034_v51, %v3566_v54 }
 0x5b8   : > { %9996 = vst [vmem:[#allocation13_spill] sm:$0xff] %v9042_v25  ;;  %v3631_v25 = vadd.f32 %v7010_v61, %v3534_v22  ;;  %v3542_v20 = vadd.f32 %v6952_v57, %v9049_v62  ;;  %v3647_v57 = vadd.f32 %v7022_v1, %v3550_v42  ;;  %v6973_v61 = vadd.f32 %v9030_v6, %v9026_v9 }
 0x5b9   : > { %v9044_v59 = vpop.f32.mrf.mxu0  ;;  %v3561_v9 = vadd.f32 %v6967_v11, %v9049_v62 }
 0x5ba   : > { %v3639_v43 = vadd.f32 %v7016_v10, %v3542_v20  ;;  %v3569_v6 = vadd.f32 %v6973_v61, %v9049_v62  ;;  %v7037_v20 = vadd.f32 %v9040_v5, %v9034_v44 }
 0x5bb   : > { %v9053_v50 = vpop.f32.mrf.mxu0 }
 0x5bd   : > { %v9056_v29 = vpop.f32.mrf.mxu0  ;;  %v10000_v55 = vld [vmem:[#allocation12_spill] sm:$0xff] }
 0x5be   : > { %9998 = vst [vmem:[#allocation15_spill] sm:$0xff] %v9056_v29 }
 0x5bf   : > { %v9061_v60 = vpop.f32.mrf.mxu0  ;;  %v10001_v11 = vld [vmem:[#allocation13_spill] sm:$0xff] }
 0x5c0   : > { %v6979_v61 = vadd.f32 %v10001_v11, %v10000_v55  ;;  %v7713_v11 = vld [vmem:[#allocation5 + $0x4d8] sm:$0xff]  }
 0x5c1   : > { %v7408_v58 = vpop.f32.mrf.mxu0 }
 0x5c2   : > { %v9067_v29 = vadd.f32 %v7408_v58, %v3631_v25  ;;  %v9087_v25 = vpop.f32.mrf.mxu1  ;;  %v3650_v58 = vadd.f32 %v7025_v37, %v3553_v21 }
 0x5c3   : > { %v3719_v18 = vpop.f32.mrf.mxu0 }
 0x5c4   : > { %v3784_v27 = vmax.f32 %v9067_v29, 0.0  ;;  %v9075_v24 = vadd.f32 %v3719_v18, %v3623_v52  ;;  %v7044_v38 = vpop.f32.mrf.mxu1  ;;  %v6982_v52 = vadd.f32 %v9053_v50, %v9044_v59  ;;  %v7028_v18 = vadd.f32 %v9014_v8, %v9010_v34 }
 0x5c5   : > { %v7409_v56 = vpop.f32.mrf.mxu0  ;;  %v6976_v59 = vadd.f32 %v9036_v28, %v9032_v17  ;;  %v9999_v10 = vld [vmem:[#allocation15_spill] sm:$0xff]  ;;  %v3666_v17 = vadd.f32 %v7037_v20, %v3569_v6 }
 0x5c6   : > { %3800 = vst [vmem:[#allocation2 + $0x1a] sm:$0xff] %v3784_v27  ;;  %v3782_v40 = vmax.f32 %v9075_v24, 0.0  ;;  %v9083_v30 = vadd.f32 %v7409_v56, %v3634_v53  ;;  %v7045_v13 = vpop.f32.mrf.mxu1  ;;  %v7031_v53 = vadd.f32 %v9022_v63, %v9018_v31  ;;  %v3655_v0 = vadd.f32 %v7028_v18, %v3558_v16 }
 0x5c7   : > { %v3722_v7 = vpop.f32.mrf.mxu0  ;;  %v3582_v31 = vadd.f32 %v6982_v52, %v9049_v62  ;;  %v6985_v44 = vadd.f32 %v9061_v60, %v9999_v10  ;;  %v3574_v60 = vadd.f32 %v6976_v59, %v9049_v62  ;;  %v7046_v16 = vadd.f32 %v7045_v13, %v7044_v38  ;;  %v10002_v52 = vld [vmem:[#allocation14_spill] sm:$0xff]  ;;  %v10003_v13 = vld [vmem:[#allocation11_spill] sm:$0xff] }
 0x5c8   : > { %3798 = vst [vmem:[#allocation2 + $0x2] sm:$0xff] %v3782_v40  ;;  %v3785_v14 = vmax.f32 %v9083_v30, 0.0  ;;  %v9093_v3 = vadd.f32 %v3722_v7, %v3626_v47  ;;  %v7047_v63 = vpop.f32.mrf.mxu1  ;;  %v3658_v21 = vadd.f32 %v7031_v53, %v3561_v9  ;;  %v7711_v59 = vld [vmem:[#allocation5 + $0x4e8] sm:$0xff]   ;;  %v7043_v10 = vadd.f32 %v9087_v25, %v9072_v46 }
 0x5c9   : > { %v7412_v22 = vpop.f32.mrf.mxu0  ;;  %v3679_v53 = vadd.f32 %v7046_v16, %v3582_v31 }
 0x5ca   : > { %3801 = vst [vmem:[#allocation2 + $0x22] sm:$0xff] %v3785_v14  ;;  %v3783_v2 = vmax.f32 %v9093_v3, 0.0  ;;  %v9103_v12 = vadd.f32 %v7412_v22, %v3647_v57  ;;  %v7048_v18 = vpop.f32.mrf.mxu1  ;;  %v3984_v46 = vpack.c.bf16 %v3785_v14, %v3784_v27 }
 0x5cb   : > { %v3735_v15 = vpop.f32.mrf.mxu0 }
 0x5cc   : > { %3799 = vst [vmem:[#allocation2 + $0xa] sm:$0xff] %v3783_v2  ;;  %v3788_v32 = vmax.f32 %v9103_v12, 0.0  ;;  %v9113_v19 = vadd.f32 %v3735_v15, %v3639_v43 }
 0x5cd   : > { %v7413_v23 = vpop.f32.mrf.mxu0 }
 0x5ce   : > { %3804 = vst [vmem:[#allocation2 + $0x4a] sm:$0xff] %v3788_v32  ;;  %v3786_v45 = vmax.f32 %v9113_v19, 0.0  ;;  %v9121_v49 = vadd.f32 %v7413_v23, %v3650_v58  ;;  %v3979_v58 = vpack.c.bf16 %v3783_v2, %v3782_v40  ;;  %v3915_v23 = vld [vmem:[#allocation2 + $0x19] sm:$0xff]  ;;  %v3585_v40 = vadd.f32 %v6985_v44, %v9049_v62 }
 0x5cf   : > { %v3738_v42 = vpop.f32.mrf.mxu0  ;;  %v3913_v1 = vld [vmem:[#allocation2 + $0x1] sm:$0xff] }
 0x5d0   : > { %3802 = vst [vmem:[#allocation2 + $0x32] sm:$0xff] %v3786_v45  ;;  %v3789_v36 = vmax.f32 %v9121_v49, 0.0  ;;  %v9132_v26 = vadd.f32 %v3738_v42, %v3642_v48  ;;  %v3897_v56 = vld [vmem:[#allocation2] sm:$0xff]  ;;  %v7710_v48 = vld [vmem:[#allocation5 + $0x4f0] sm:$0xff]   ;;  %v7040_v42 = vadd.f32 %v9059_v39, %v10002_v52  ;;  %v3577_v39 = vadd.f32 %v6979_v61, %v9049_v62 }
 0x5d1   : > { %v7416_v50 = vpop.f32.mrf.mxu0  ;;  %v3916_v47 = vld [vmem:[#allocation2 + $0x21] sm:$0xff] }
 0x5d2   : > { %3805 = vst [vmem:[#allocation2 + $0x52] sm:$0xff] %v3789_v36  ;;  %v3787_v34 = vmax.f32 %v9132_v26, 0.0  ;;  %v9143_v8 = vadd.f32 %v7416_v50, %v3663_v4  ;;  %v3947_v37 = vld [vmem:[#allocation2 + $0x1b] sm:$0xff]  ;;  %v3948_v41 = vld [vmem:[#allocation2 + $0x23] sm:$0xff]  ;;  %v3983_v6 = vpack.c.bf16 %v3916_v47, %v3915_v23  ;;  %v7049_v50 = vadd.f32 %v7048_v18, %v7047_v63 }
 0x5d3   : > { %v3751_v5 = vpop.f32.mrf.mxu0  ;;  %v3914_v28 = vld [vmem:[#allocation2 + $0x9] sm:$0xff]  ;;  %v3985_v24 = vpack.c.bf16 %v3948_v41, %v3947_v37  ;;  %v3900_v47 = vld [vmem:[#allocation2 + $0x20] sm:$0xff] }
 0x5d4   : > { %v3945_v7 = vld [vmem:[#allocation2 + $0x3] sm:$0xff]  ;;  %v3946_v57 = vld [vmem:[#allocation2 + $0xb] sm:$0xff]  ;;  %3803 = vst [vmem:[#allocation2 + $0x3a] sm:$0xff] %v3787_v34  ;;  %v3792_v33 = vmax.f32 %v9143_v8, 0.0  ;;  %v9151_v3 = vadd.f32 %v3751_v5, %v3655_v0  ;;  %v3978_v35 = vpack.c.bf16 %v3914_v28, %v3913_v1  ;;  %v3682_v28 = vadd.f32 %v7049_v50, %v3585_v40 }
 0x5d5   : > { %v3980_v22 = vpack.c.bf16 %v3946_v57, %v3945_v7  ;;  %v3898_v43 = vld [vmem:[#allocation2 + $0x8] sm:$0xff]  ;;  %v7417_v15 = vpop.f32.mrf.mxu0  ;;  %v3899_v7 = vld [vmem:[#allocation2 + $0x18] sm:$0xff] }
 0x5d6   : > { %v3977_v54 = vpack.c.bf16 %v3898_v43, %v3897_v56  ;;  %3808 = vst [vmem:[#allocation2 + $0x7a] sm:$0xff] %v3792_v33  ;;  %v3790_v51 = vmax.f32 %v9151_v3, 0.0  ;;  %v9161_v9 = vadd.f32 %v7417_v15, %v3666_v17  ;;  %4295 = vmatprep.mubr.bf16.mxu1 %v3978_v35  ;;  %v3671_v56 = vadd.f32 %v7040_v42, %v3574_v60  ;;  %v7712_v60 = vld [vmem:[#allocation5 + $0x4e0] sm:$0xff]   ;;  %v3919_v16 = vld [vmem:[#allocation2 + $0x49] sm:$0xff] }
 0x5d7   : > { %4392 = vmatprep.mubr.bf16.mxu0 %v3980_v22  ;;  %v3754_v4 = vpop.f32.mrf.mxu0  ;;  %v3982_v35 = vpack.c.bf16 %v3900_v47, %v3899_v7  ;;  %v3917_v25 = vld [vmem:[#allocation2 + $0x31] sm:$0xff] }
 0x5d8   : > { %4296 = vmatmul.mubr.bf16.vlgmr.msra.gmra.mxu1 %v3977_v54  ;;  %4393 = vmatmul.mubr.bf16.vlgmr.msra.gmra.mxu0 %v3979_v58  ;;  %3806 = vst [vmem:[#allocation2 + $0x62] sm:$0xff] %v3790_v51  ;;  %v3793_v2 = vmax.f32 %v9161_v9, 0.0  ;;  %v9169_v38 = vadd.f32 %v3754_v4, %v3658_v21  ;;  %v3674_v21 = vadd.f32 %v7043_v10, %v3577_v39  ;;  %v3901_v58 = vld [vmem:[#allocation2 + $0x30] sm:$0xff]  ;;  %v7715_v4 = vld [vmem:[#allocation5 + $0x4c8] sm:$0xff]  }
 0x5d9   : > { %7423 = vmatpush3.bf16.msra.mxu1 %v10003_v13  ;;  %4303 = vmatprep.mubr.bf16.mxu1 %v3983_v6  ;;  %v7420_v20 = vpop.f32.mrf.mxu0  ;;  %v3920_v61 = vld [vmem:[#allocation2 + $0x51] sm:$0xff]  ;;  %v3903_v13 = vld [vmem:[#allocation2 + $0x48] sm:$0xff] }
 0x5da   : > { %4400 = vmatprep.mubr.bf16.mxu0 %v3985_v24  ;;  %7424 = vmatprep.subr.bf16.mxu1 %v7710_v48  ;;  %3809 = vst [vmem:[#allocation2 + $0x82] sm:$0xff] %v3793_v2  ;;  %v3791_v0 = vmax.f32 %v9169_v38, 0.0  ;;  %v9176_v1 = vadd.f32 %v7420_v20, %v3679_v53  ;;  %v3951_v15 = vld [vmem:[#allocation2 + $0x4b] sm:$0xff]  ;;  %v3952_v54 = vld [vmem:[#allocation2 + $0x53] sm:$0xff]  ;;  %v3993_v6 = vpack.c.bf16 %v3920_v61, %v3919_v16  ;;  %v7716_v20 = vld [vmem:[#allocation5 + $0x4c0] sm:$0xff]  }
 0x5db   : > { %v3767_v31 = vpop.f32.mrf.mxu0  ;;  %v3918_v44 = vld [vmem:[#allocation2 + $0x39] sm:$0xff]  ;;  %v3995_v52 = vpack.c.bf16 %v3952_v54, %v3951_v15  ;;  %v7714_v42 = vld [vmem:[#allocation5 + $0x4d0] sm:$0xff]   ;;  %v4004_v3 = vpack.c.bf16 %v3793_v2, %v3792_v33 }
 0x5dc   : > { %v3949_v62 = vld [vmem:[#allocation2 + $0x33] sm:$0xff]  ;;  %v3950_v5 = vld [vmem:[#allocation2 + $0x3b] sm:$0xff]  ;;  %3807 = vst [vmem:[#allocation2 + $0x6a] sm:$0xff] %v3791_v0  ;;  %v3796_v63 = vmax.f32 %v9176_v1, 0.0  ;;  %v9183_v17 = vadd.f32 %v3767_v31, %v3671_v56  ;;  %v3988_v37 = vpack.c.bf16 %v3918_v44, %v3917_v25 }
 0x5dd   : > { %7425 = vmatpush3.bf16.msra.mxu1 %v7710_v48  ;;  %v7421_v57 = vpop.f32.mrf.mxu0  ;;  %v3990_v41 = vpack.c.bf16 %v3950_v5, %v3949_v62  ;;  %v3902_v14 = vld [vmem:[#allocation2 + $0x38] sm:$0xff]  ;;  %v3989_v48 = vpack.c.bf16 %v3787_v34, %v3786_v45  ;;  %v3904_v18 = vld [vmem:[#allocation2 + $0x50] sm:$0xff]  ;;  %v3994_v45 = vpack.c.bf16 %v3789_v36, %v3788_v32  ;;  %v3999_v32 = vpack.c.bf16 %v3791_v0, %v3790_v51 }
 0x5de   : > { %7426 = vmatprep.subr.bf16.mxu1 %v7711_v59  ;;  %3812 = vst [vmem:[#allocation2 + $0xaa] sm:$0xff] %v3796_v63  ;;  %v3794_v22 = vmax.f32 %v9183_v17, 0.0  ;;  %v9192_v43 = vadd.f32 %v7421_v57, %v3682_v28  ;;  %v3987_v23 = vpack.c.bf16 %v3902_v14, %v3901_v58  ;;  %v3992_v26 = vpack.c.bf16 %v3904_v18, %v3903_v13  ;;  %v3923_v49 = vld [vmem:[#allocation2 + $0x79] sm:$0xff]  ;;  %v3962_v14 = vld [vmem:[#allocation2 + $0xc] sm:$0xff] }
 0x5df   : > { %v3770_v55 = vpop.f32.mrf.mxu0  ;;  %v3921_v34 = vld [vmem:[#allocation2 + $0x61] sm:$0xff]  ;;  %v3907_v7 = vld [vmem:[#allocation2 + $0x78] sm:$0xff] }
 0x5e0   : > { %4304 = vmatmul.mubr.bf16.gmra.mxu1 %v3982_v35  ;;  %4401 = vmatmul.mubr.bf16.gmra.mxu0 %v3984_v46  ;;  %3810 = vst [vmem:[#allocation2 + $0x92] sm:$0xff] %v3794_v22  ;;  %v3797_v29 = vmax.f32 %v9192_v43, 0.0  ;;  %v9197_v27 = vadd.f32 %v3770_v55, %v3674_v21  ;;  %v3905_v12 = vld [vmem:[#allocation2 + $0x60] sm:$0xff]  ;;  %v3968_v16 = vld [vmem:[#allocation2 + $0x54] sm:$0xff] }
 0x5e1   : > { %4311 = vmatprep.mubr.bf16.mxu1 %v3988_v37  ;;  %4408 = vmatprep.mubr.bf16.mxu0 %v3990_v41  ;;  %v3924_v50 = vld [vmem:[#allocation2 + $0x81] sm:$0xff]  ;;  %v7717_v13 = vld [vmem:[#allocation7 + $0x70] ss:$8 sps:$4 sm:$0xff]  }
 0x5e2   : > { %7427 = vmatpush3.bf16.msra.mxu1 %v7711_v59  ;;  %3813 = vst [vmem:[#allocation2 + $0xb2] sm:$0xff] %v3797_v29  ;;  %v3795_v30 = vmax.f32 %v9197_v27, 0.0  ;;  %v3955_v56 = vld [vmem:[#allocation2 + $0x7b] sm:$0xff]  ;;  %v3956_v47 = vld [vmem:[#allocation2 + $0x83] sm:$0xff]  ;;  %v4003_v36 = vpack.c.bf16 %v3924_v50, %v3923_v49  ;;  %v4014_v17 = vpack.c.bf16 %v3797_v29, %v3796_v63 }
 0x5e3   : > { %7428 = vmatprep.subr.bf16.mxu1 %v7712_v60  ;;  %v3922_v24 = vld [vmem:[#allocation2 + $0x69] sm:$0xff]  ;;  %v4005_v31 = vpack.c.bf16 %v3956_v47, %v3955_v56  ;;  %v3908_v44 = vld [vmem:[#allocation2 + $0x80] sm:$0xff]  ;;  %v7731_v47 = vld [vmem:[#allocation7 + $0x54] ss:$8 sps:$4 sm:$0xff]  }
 0x5e4   : > { %3811 = vst [vmem:[#allocation2 + $0x9a] sm:$0xff] %v3795_v30  ;;  %v3953_v40 = vld [vmem:[#allocation2 + $0x63] sm:$0xff]  ;;  %v3954_v19 = vld [vmem:[#allocation2 + $0x6b] sm:$0xff]  ;;  %v3998_v53 = vpack.c.bf16 %v3922_v24, %v3921_v34  ;;  %v4002_v57 = vpack.c.bf16 %v3908_v44, %v3907_v7  ;;  %v4009_v8 = vpack.c.bf16 %v3795_v30, %v3794_v22  ;;  %v3965_v30 = vld [vmem:[#allocation2 + $0x34] sm:$0xff] }
 0x5e5   : > { %v4000_v39 = vpack.c.bf16 %v3954_v19, %v3953_v40  ;;  %v3906_v59 = vld [vmem:[#allocation2 + $0x68] sm:$0xff]  ;;  %v3963_v22 = vld [vmem:[#allocation2 + $0x1c] sm:$0xff]  ;;  %v7729_v56 = vld [vmem:[#allocation7 + $0x50] ss:$8 sps:$4 sm:$0xff]  }
 0x5e6   : > { %7429 = vmatpush3.bf16.msra.mxu1 %v7712_v60  ;;  %v3997_v10 = vpack.c.bf16 %v3906_v59, %v3905_v12  ;;  %v3927_v9 = vld [vmem:[#allocation2 + $0xa9] sm:$0xff]  ;;  %v3966_v54 = vld [vmem:[#allocation2 + $0x3c] sm:$0xff] }
 0x5e7   : > { %7430 = vmatprep.subr.bf16.mxu1 %v7713_v11  ;;  %v3925_v51 = vld [vmem:[#allocation2 + $0x91] sm:$0xff]  ;;  %v3961_v55 = vld [vmem:[#allocation2 + $0x4] sm:$0xff]  ;;  %v3971_v63 = vld [vmem:[#allocation2 + $0x7c] sm:$0xff] }
 0x5e8   : > { %4312 = vmatmul.mubr.bf16.gmra.mxu1 %v3987_v23  ;;  %4409 = vmatmul.mubr.bf16.gmra.mxu0 %v3989_v48  ;;  %v3909_v37 = vld [vmem:[#allocation2 + $0x90] sm:$0xff]  ;;  %v3981_v15 = vpack.c.bf16 %v3962_v14, %v3961_v55  ;;  %v3964_v27 = vld [vmem:[#allocation2 + $0x24] sm:$0xff]  ;;  %v3991_v23 = vpack.c.bf16 %v3966_v54, %v3965_v30 }
 0x5e9   : > { %4319 = vmatprep.mubr.bf16.mxu1 %v3993_v6  ;;  %4416 = vmatprep.mubr.bf16.mxu0 %v3995_v52  ;;  %v3928_v35 = vld [vmem:[#allocation2 + $0xb1] sm:$0xff]  ;;  %v3986_v58 = vpack.c.bf16 %v3964_v27, %v3963_v22  ;;  %v3969_v6 = vld [vmem:[#allocation2 + $0x64] sm:$0xff] }
 0x5ea   : > { %7431 = vmatpush3.bf16.msra.mxu1 %v7713_v11  ;;  %v3959_v46 = vld [vmem:[#allocation2 + $0xab] sm:$0xff]  ;;  %v3960_v25 = vld [vmem:[#allocation2 + $0xb3] sm:$0xff]  ;;  %v4013_v33 = vpack.c.bf16 %v3928_v35, %v3927_v9 }
 0x5eb   : > { %7432 = vmatprep.subr.bf16.mxu1 %v7714_v42  ;;  %v3926_v62 = vld [vmem:[#allocation2 + $0x99] sm:$0xff]  ;;  %v4015_v2 = vpack.c.bf16 %v3960_v25, %v3959_v46  ;;  %v3912_v60 = vld [vmem:[#allocation2 + $0xb0] sm:$0xff]  ;;  %v3911_v11 = vld [vmem:[#allocation2 + $0xa8] sm:$0xff] }
 0x5ec   : > { %v3957_v5 = vld [vmem:[#allocation2 + $0x93] sm:$0xff]  ;;  %v3958_v28 = vld [vmem:[#allocation2 + $0x9b] sm:$0xff]  ;;  %v4008_v38 = vpack.c.bf16 %v3926_v62, %v3925_v51  ;;  %v4012_v61 = vpack.c.bf16 %v3912_v60, %v3911_v11  ;;  %v3972_v43 = vld [vmem:[#allocation2 + $0x84] sm:$0xff] }
 0x5ed   : > { %v4010_v0 = vpack.c.bf16 %v3958_v28, %v3957_v5  ;;  %v3910_v21 = vld [vmem:[#allocation2 + $0x98] sm:$0xff]  ;;  %v3967_v48 = vld [vmem:[#allocation2 + $0x4c] sm:$0xff]  ;;  %v7726_v50 = vld [vmem:[#allocation7 + $0x160] ss:$8 sps:$4 sm:$0xff]  }
 0x5ee   : > { %7433 = vmatpush3.bf16.msra.mxu1 %v7714_v42  ;;  %v4007_v41 = vpack.c.bf16 %v3910_v21, %v3909_v37  ;;  %v3970_v52 = vld [vmem:[#allocation2 + $0x6c] sm:$0xff]  ;;  %v3996_v1 = vpack.c.bf16 %v3968_v16, %v3967_v48  ;;  %v3973_v29 = vld [vmem:[#allocation2 + $0x94] sm:$0xff]  ;;  %v3974_v18 = vld [vmem:[#allocation2 + $0x9c] sm:$0xff] }
 0x5ef   : > { %7434 = vmatprep.subr.bf16.mxu1 %v7715_v4  ;;  %v4001_v42 = vpack.c.bf16 %v3970_v52, %v3969_v6  ;;  %v4011_v24 = vpack.c.bf16 %v3974_v18, %v3973_v29  ;;  %v3975_v40 = vld [vmem:[#allocation2 + $0xac] sm:$0xff]  ;;  %v3976_v19 = vld [vmem:[#allocation2 + $0xb4] sm:$0xff]  ;;  %v7747_v7 = vld [vmem:[#allocation7 + $0x20] ss:$8 sps:$4 sm:$0xff]  }
 0x5f0   : > { %4320 = vmatmul.mubr.bf16.gmra.mxu1 %v3992_v26  ;;  %4417 = vmatmul.mubr.bf16.gmra.mxu0 %v3994_v45  ;;  %v7719_v26 = vld [vmem:[#allocation7 + $0x74] ss:$8 sps:$4 sm:$0xff]   ;;  %v4016_v45 = vpack.c.bf16 %v3976_v19, %v3975_v40  ;;  %v7728_v59 = vld [vmem:[#allocation7 + $0x164] ss:$8 sps:$4 sm:$0xff]   ;;  %v7741_v44 = vld [vmem:[#allocation7 + $0x30] ss:$8 sps:$4 sm:$0xff]  }
 0x5f1   : > { %4327 = vmatprep.mubr.bf16.mxu1 %v3998_v53  ;;  %4424 = vmatprep.mubr.bf16.mxu0 %v4000_v39  ;;  %v7722_v34 = vld [vmem:[#allocation7 + $0x174] ss:$8 sps:$4 sm:$0xff]   ;;  %v7720_v53 = vld [vmem:[#allocation7 + $0x170] ss:$8 sps:$4 sm:$0xff]   ;;  %v7723_v39 = vld [vmem:[#allocation7 + $0x60] ss:$8 sps:$4 sm:$0xff]  }
 0x5f2   : > { %7435 = vmatpush3.bf16.msra.mxu1 %v7715_v4  ;;  %v4006_v4 = vpack.c.bf16 %v3972_v43, %v3971_v63  ;;  %5198 = vmatprep.subr.bf16.mxu0 %v7719_v26  ;;  %v7734_v12 = vld [vmem:[#allocation7 + $0x154] ss:$8 sps:$4 sm:$0xff]   ;;  %v7737_v49 = vld [vmem:[#allocation7 + $0x44] ss:$8 sps:$4 sm:$0xff]   ;;  %v7744_v28 = vld [vmem:[#allocation7 + $0x130] ss:$8 sps:$4 sm:$0xff]  }
 0x5f3   : > { %7436 = vmatprep.subr.bf16.mxu1 %v7716_v20  ;;  %5199 = vmatpush1.bf16.msra.mxu0 %v7717_v13  ;;  %v7743_v62 = vld [vmem:[#allocation7 + $0x34] ss:$8 sps:$4 sm:$0xff]   ;;  %v7750_v51 = vld [vmem:[#allocation7 + $0x120] ss:$8 sps:$4 sm:$0xff]   ;;  %v7756_v35 = vld [vmem:[#allocation7 + $0x110] ss:$8 sps:$4 sm:$0xff]  }
 0x5f4   : > { %v7746_v5 = vld [vmem:[#allocation7 + $0x134] ss:$8 sps:$4 sm:$0xff]   ;;  %v7759_v46 = vld [vmem:[#allocation7] ss:$8 sps:$4 sm:$0xff]   ;;  %v7761_v25 = vld [vmem:[#allocation7 + $0x4] ss:$8 sps:$4 sm:$0xff]  }
 0x5f5   : > { %v7758_v21 = vld [vmem:[#allocation7 + $0x114] ss:$8 sps:$4 sm:$0xff]   ;;  %v7764_v37 = vld [vmem:[#allocation7 + $0x104] ss:$8 sps:$4 sm:$0xff]   ;;  %v7771_v60 = vld [vmem:[#allocation7 + $0xe0] ss:$8 sps:$4 sm:$0xff]  }
 0x5f6   : > { %7437 = vmatpush3.bf16.msra.mxu1 %v7716_v20  ;;  %v7725_v20 = vld [vmem:[#allocation7 + $0x64] ss:$8 sps:$4 sm:$0xff]   ;;  %v7767_v9 = vld [vmem:[#allocation7 + $0xf4] ss:$8 sps:$4 sm:$0xff]   ;;  %v7774_v11 = vld [vmem:[#allocation7 + $0x1e0] ss:$8 sps:$4 sm:$0xff]  }
 0x5f7   : > { %5311 = vmatprep.subr.bf16.mxu1 %v7722_v34  ;;  %5200 = vmatprep.subr.bf16.mxu0 %v7725_v20  ;;  %v7773_v55 = vld [vmem:[#allocation7 + $0xe4] ss:$8 sps:$4 sm:$0xff]   ;;  %v7780_v22 = vld [vmem:[#allocation7 + $0x1d0] ss:$8 sps:$4 sm:$0xff]   ;;  %v7783_v54 = vld [vmem:[#allocation7 + $0xc0] ss:$8 sps:$4 sm:$0xff]  }
 0x5f8   : > { %4328 = vmatmul.mubr.bf16.gmra.mxu1 %v3997_v10  ;;  %4425 = vmatmul.mubr.bf16.gmra.mxu0 %v3999_v32  ;;  %v7732_v10 = vld [vmem:[#allocation7 + $0x150] ss:$8 sps:$4 sm:$0xff]   ;;  %v7735_v32 = vld [vmem:[#allocation7 + $0x40] ss:$8 sps:$4 sm:$0xff]   ;;  %v7776_v14 = vld [vmem:[#allocation7 + $0x1e4] ss:$8 sps:$4 sm:$0xff]  }
 0x5f9   : > { %4335 = vmatprep.mubr.bf16.mxu1 %v4003_v36  ;;  %4432 = vmatprep.mubr.bf16.mxu0 %v4005_v31  ;;  %v7740_v36 = vld [vmem:[#allocation7 + $0x144] ss:$8 sps:$4 sm:$0xff]   ;;  %v7738_v31 = vld [vmem:[#allocation7 + $0x140] ss:$8 sps:$4 sm:$0xff]   ;;  %v7794_v48 = vld [vmem:[#allocation7 + $0x1b4] ss:$8 sps:$4 sm:$0xff]  }
 0x5fa   : > { %5201 = vmatpush1.bf16.msra.mxu0 %v7723_v39  ;;  %v7785_v27 = vld [vmem:[#allocation7 + $0xc4] ss:$8 sps:$4 sm:$0xff]   ;;  %v7789_v16 = vld [vmem:[#allocation7 + $0xb0] ss:$8 sps:$4 sm:$0xff]   ;;  %v7798_v63 = vld [vmem:[#allocation7 + $0x1a0] ss:$8 sps:$4 sm:$0xff]  }
 0x5fb   : > { %5202 = vmatprep.subr.bf16.mxu0 %v7731_v47  ;;  %v7788_v30 = vld [vmem:[#allocation7 + $0x1c4] ss:$8 sps:$4 sm:$0xff]   ;;  %v7792_v6 = vld [vmem:[#allocation7 + $0x1b0] ss:$8 sps:$4 sm:$0xff]   ;;  %v7803_v43 = vld [vmem:[#allocation7 + $0x94] ss:$8 sps:$4 sm:$0xff]  }
 0x5fc   : > { %v7797_v52 = vld [vmem:[#allocation7 + $0xa4] ss:$8 sps:$4 sm:$0xff]   ;;  %v7806_v29 = vld [vmem:[#allocation7 + $0x194] ss:$8 sps:$4 sm:$0xff]   ;;  %v7801_v18 = vld [vmem:[#allocation7 + $0x90] ss:$8 sps:$4 sm:$0xff]  }
 0x5fd   : > { %v7812_v40 = vld [vmem:[#allocation7 + $0x184] ss:$8 sps:$4 sm:$0xff]   ;;  %v7807_v19 = vld [vmem:[#allocation7 + $0x80] ss:$8 sps:$4 sm:$0xff]   ;;  %v7815_v26 = vld [vmem:[#allocation7 + $0x274] ss:$8 sps:$4 sm:$0xff]  }
 0x5fe   : > { %5203 = vmatpush1.bf16.msra.mxu0 %v7729_v56  ;;  %v7810_v13 = vld [vmem:[#allocation7 + $0x180] ss:$8 sps:$4 sm:$0xff]  }
 0x5ff   : > { %5204 = vmatprep.subr.bf16.mxu0 %v7737_v49 }
 0x600   : > { %4336 = vmatmul.mubr.bf16.gmra.mxu1 %v4002_v57  ;;  %4433 = vmatmul.mubr.bf16.gmra.mxu0 %v4004_v3  ;;  %v7749_v57 = vld [vmem:[#allocation7 + $0x24] ss:$8 sps:$4 sm:$0xff]  }
 0x601   : > { %4343 = vmatprep.mubr.bf16.mxu1 %v4008_v38  ;;  %4440 = vmatprep.mubr.bf16.mxu0 %v4010_v0  ;;  %v7752_v3 = vld [vmem:[#allocation7 + $0x124] ss:$8 sps:$4 sm:$0xff]   ;;  %v7753_v38 = vld [vmem:[#allocation7 + $0x10] ss:$8 sps:$4 sm:$0xff]   ;;  %v7755_v0 = vld [vmem:[#allocation7 + $0x14] ss:$8 sps:$4 sm:$0xff]  }
 0x602   : > { %5205 = vmatpush1.bf16.msra.mxu0 %v7735_v32 }
 0x603   : > { %5206 = vmatprep.subr.bf16.mxu0 %v7743_v62 }
 0x606   : > { %5207 = vmatpush1.bf16.msra.mxu0 %v7741_v44 }
 0x607   : > { %5208 = vmatprep.subr.bf16.mxu0 %v7749_v57 }
 0x608   : > { %4344 = vmatmul.mubr.bf16.gmra.mxu1 %v4007_v41  ;;  %4441 = vmatmul.mubr.bf16.gmra.mxu0 %v4009_v8  ;;  %v7762_v41 = vld [vmem:[#allocation7 + $0x100] ss:$8 sps:$4 sm:$0xff]   ;;  %v7765_v8 = vld [vmem:[#allocation7 + $0xf0] ss:$8 sps:$4 sm:$0xff]  }
 0x609   : > { %4351 = vmatprep.mubr.bf16.mxu1 %v4013_v33  ;;  %4448 = vmatprep.mubr.bf16.mxu0 %v4015_v2  ;;  %v7770_v33 = vld [vmem:[#allocation7 + $0x1f4] ss:$8 sps:$4 sm:$0xff]   ;;  %v7768_v2 = vld [vmem:[#allocation7 + $0x1f0] ss:$8 sps:$4 sm:$0xff]  }
 0x60a   : > { %5209 = vmatpush1.bf16.msra.mxu0 %v7747_v7 }
 0x60b   : > { %5210 = vmatprep.subr.bf16.mxu0 %v7755_v0 }
 0x60e   : > { %5211 = vmatpush1.bf16.msra.mxu0 %v7753_v38 }
 0x60f   : > { %5212 = vmatprep.subr.bf16.mxu0 %v7761_v25 }
 0x610   : > { %4352 = vmatmul.mubr.bf16.gmra.mxu1 %v4012_v61  ;;  %4449 = vmatmul.mubr.bf16.gmra.mxu0 %v4014_v17  ;;  %v7777_v61 = vld [vmem:[#allocation7 + $0xd0] ss:$8 sps:$4 sm:$0xff]   ;;  %v7779_v17 = vld [vmem:[#allocation7 + $0xd4] ss:$8 sps:$4 sm:$0xff]  }
 0x611   : > { %7438 = vmatprep.mubr.bf16.mxu1 %v3981_v15  ;;  %v7782_v15 = vld [vmem:[#allocation7 + $0x1d4] ss:$8 sps:$4 sm:$0xff]  }
 0x612   : > { %5213 = vmatpush1.bf16.msra.mxu0 %v7759_v46 }
 0x613   : > { %5214 = vmatprep.subr.bf16.mxu0 %v7767_v9 }
 0x616   : > { %5215 = vmatpush2.bf16.msra.mxu0 %v7765_v8 }
 0x617   : > { %5216 = vmatprep.subr.bf16.mxu0 %v7773_v55 }
 0x618   : > { %7439 = vmatmul.mubr.bf16.vlgmr.msra.gmra.mxu1 %v3986_v58  ;;  %v7786_v58 = vld [vmem:[#allocation7 + $0x1c0] ss:$8 sps:$4 sm:$0xff]  }
 0x619   : > { %7442 = vmatprep.mubr.bf16.mxu1 %v3991_v23  ;;  %5312 = vmatpush1.bf16.msra.mxu1 %v7720_v53  ;;  %v7791_v23 = vld [vmem:[#allocation7 + $0xb4] ss:$8 sps:$4 sm:$0xff]  }
 0x61a   : > { %5313 = vmatprep.subr.bf16.mxu1 %v7728_v59  ;;  %5217 = vmatpush2.bf16.msra.mxu0 %v7771_v60 }
 0x61b   : > { %5218 = vmatprep.subr.bf16.mxu0 %v7779_v17 }
 0x61d   : > { %5314 = vmatpush1.bf16.msra.mxu1 %v7726_v50 }
 0x61e   : > { %5315 = vmatprep.subr.bf16.mxu1 %v7734_v12  ;;  %5219 = vmatpush2.bf16.msra.mxu0 %v7777_v61 }
 0x61f   : > { %5220 = vmatprep.subr.bf16.mxu0 %v7785_v27 }
 0x620   : > { %7443 = vmatmul.mubr.bf16.gmra.mxu1 %v3996_v1  ;;  %v7800_v1 = vld [vmem:[#allocation7 + $0x1a4] ss:$8 sps:$4 sm:$0xff]  }
 0x621   : > { %7446 = vmatprep.mubr.bf16.mxu1 %v4001_v42  ;;  %5316 = vmatpush1.bf16.msra.mxu1 %v7732_v10  ;;  %v7795_v42 = vld [vmem:[#allocation7 + $0xa0] ss:$8 sps:$4 sm:$0xff]  }
 0x622   : > { %5317 = vmatprep.subr.bf16.mxu1 %v7740_v36  ;;  %5221 = vmatpush2.bf16.msra.mxu0 %v7783_v54 }
 0x623   : > { %5222 = vmatprep.subr.bf16.mxu0 %v7791_v23 }
 0x625   : > { %5318 = vmatpush1.bf16.msra.mxu1 %v7738_v31 }
 0x626   : > { %5319 = vmatprep.subr.bf16.mxu1 %v7746_v5  ;;  %5223 = vmatpush2.bf16.msra.mxu0 %v7789_v16 }
 0x627   : > { %5224 = vmatprep.subr.bf16.mxu0 %v7797_v52 }
 0x628   : > { %7447 = vmatmul.mubr.bf16.gmra.mxu1 %v4006_v4  ;;  %v7804_v4 = vld [vmem:[#allocation7 + $0x190] ss:$8 sps:$4 sm:$0xff]  }
 0x629   : > { %7450 = vmatprep.mubr.bf16.mxu1 %v4011_v24  ;;  %5320 = vmatpush1.bf16.msra.mxu1 %v7744_v28  ;;  %v7809_v24 = vld [vmem:[#allocation7 + $0x84] ss:$8 sps:$4 sm:$0xff]  }
 0x62a   : > { %5321 = vmatprep.subr.bf16.mxu1 %v7752_v3  ;;  %5225 = vmatpush2.bf16.msra.mxu0 %v7795_v42 }
 0x62b   : > { %5226 = vmatprep.subr.bf16.mxu0 %v7803_v43  ;;  %v9293_v43 = vld [vmem:[%s9958_s5 + $0x3] ss:$0 sm:$0xff] }
 0x62d   : > { %5322 = vmatpush1.bf16.msra.mxu1 %v7750_v51 }
 0x62e   : > { %5323 = vmatprep.subr.bf16.mxu1 %v7758_v21  ;;  %5227 = vmatpush2.bf16.msra.mxu0 %v7801_v18 }
 0x62f   : > { %5228 = vmatprep.subr.bf16.mxu0 %v7809_v24 }
 0x630   : > { %7451 = vmatmul.mubr.bf16.gmra.mxu1 %v4016_v45 }
 0x631   : > { %5324 = vmatpush1.bf16.msra.mxu1 %v7756_v35 }
 0x632   : > { %5325 = vmatprep.subr.bf16.mxu1 %v7764_v37  ;;  %5229 = vmatpush2.bf16.msra.mxu0 %v7807_v19 }
 0x633   : > { %5424 = vmatprep.subr.bf16.mxu0 %v7815_v26 }
 0x635   : > { %5326 = vmatpush1.bf16.msra.mxu1 %v7762_v41 }
 0x636   : > { %5327 = vmatprep.subr.bf16.mxu1 %v7770_v33 }
 0x639   : > { %5328 = vmatpush2.bf16.msra.mxu1 %v7768_v2 }
 0x63a   : > { %5329 = vmatprep.subr.bf16.mxu1 %v7776_v14 }
 0x63d   : > { %5330 = vmatpush2.bf16.msra.mxu1 %v7774_v11 }
 0x63e   : > { %5331 = vmatprep.subr.bf16.mxu1 %v7782_v15 }
 0x641   : > { %5332 = vmatpush2.bf16.msra.mxu1 %v7780_v22 }
 0x642   : > { %5333 = vmatprep.subr.bf16.mxu1 %v7788_v30 }
 0x645   : > { %5334 = vmatpush2.bf16.msra.mxu1 %v7786_v58 }
 0x646   : > { %5335 = vmatprep.subr.bf16.mxu1 %v7794_v48 }
 0x649   : > { %5336 = vmatpush2.bf16.msra.mxu1 %v7792_v6 }
 0x64a   : > { %5337 = vmatprep.subr.bf16.mxu1 %v7800_v1 }
 0x64d   : > { %5338 = vmatpush2.bf16.msra.mxu1 %v7798_v63 }
 0x64e   : > { %5339 = vmatprep.subr.bf16.mxu1 %v7806_v29 }
 0x651   : > { %5340 = vmatpush2.bf16.msra.mxu1 %v7804_v4 }
 0x652   : > { %5341 = vmatprep.subr.bf16.mxu1 %v7812_v40 }
 0x655   : > { %5342 = vmatpush2.bf16.msra.mxu1 %v7810_v13 }
 0x698   : > { %v7082_v45 = vpop.f32.mrf.mxu1  ;;  %v9228_v34 = vpop.f32.mrf.mxu0 }
 0x69a   : > { %v7083_v53 = vpop.f32.mrf.mxu1  ;;  %v9230_v39 = vpop.f32.mrf.mxu0 }
 0x69b   : > { %v7084_v63 = vadd.f32 %v7083_v53, %v7082_v45 }
 0x69c   : > { %v7085_v20 = vpop.f32.mrf.mxu1  ;;  %v9232_v59 = vpop.f32.mrf.mxu0 }
 0x69d   : > { %v4298_v19 = vadd.f32 %v7084_v63, %v9293_v43 }
 0x69e   : > { %v7086_v50 = vpop.f32.mrf.mxu1  ;;  %v9234_v56 = vpop.f32.mrf.mxu0 }
 0x69f   : > { %v7087_v13 = vadd.f32 %v7086_v50, %v7085_v20  ;;  %v7151_v50 = vadd.f32 %v9234_v56, %v9232_v59 }
 0x6a0   : > { %v7088_v47 = vpop.f32.mrf.mxu1  ;;  %v7152_v12 = vpop.f32.mrf.mxu0 }
 0x6a2   : > { %v7089_v10 = vpop.f32.mrf.mxu1  ;;  %v7153_v32 = vpop.f32.mrf.mxu0 }
 0x6a3   : > { %v7090_v1 = vadd.f32 %v7089_v10, %v7088_v47  ;;  %v7154_v26 = vadd.f32 %v7153_v32, %v7152_v12  ;;  %v7148_v10 = vadd.f32 %v9230_v39, %v9228_v34 }
 0x6a4   : > { %v7091_v49 = vpop.f32.mrf.mxu1  ;;  %v7155_v36 = vpop.f32.mrf.mxu0 }
 0x6a5   : > { %v4306_v4 = vadd.f32 %v7090_v1, %v9293_v43  ;;  %v4395_v20 = vadd.f32 %v7148_v10, %v4298_v19 }
 0x6a6   : > { %v7092_v31 = vpop.f32.mrf.mxu1  ;;  %v7156_v44 = vpop.f32.mrf.mxu0 }
 0x6a7   : > { %v7093_v24 = vadd.f32 %v7092_v31, %v7091_v49  ;;  %v4301_v49 = vadd.f32 %v7087_v13, %v9293_v43  ;;  %v7157_v31 = vadd.f32 %v7156_v44, %v7155_v36 }
 0x6a8   : > { %v7094_v62 = vpop.f32.mrf.mxu1  ;;  %v9236_v5 = vpop.f32.mrf.mxu0 }
 0x6aa   : > { %v7095_v28 = vpop.f32.mrf.mxu1  ;;  %v9238_v7 = vpop.f32.mrf.mxu0 }
 0x6ac   : > { %v9240_v57 = vpop.f32.mrf.mxu1  ;;  %v9242_v3 = vpop.f32.mrf.mxu0 }
 0x6ae   : > { %v9244_v51 = vpop.f32.mrf.mxu1  ;;  %v9246_v38 = vpop.f32.mrf.mxu0 }
 0x6af   : > { %v7099_v36 = vadd.f32 %v9244_v51, %v9240_v57  ;;  %v7163_v13 = vadd.f32 %v9246_v38, %v9242_v3 }
 0x6b0   : > { %v7100_v0 = vpop.f32.mrf.mxu1  ;;  %v7164_v21 = vpop.f32.mrf.mxu0 }
 0x6b2   : > { %v7101_v35 = vpop.f32.mrf.mxu1  ;;  %v7165_v46 = vpop.f32.mrf.mxu0 }
 0x6b3   : > { %v7102_v47 = vadd.f32 %v7101_v35, %v7100_v0  ;;  %v7166_v44 = vadd.f32 %v7165_v46, %v7164_v21  ;;  %v4317_v46 = vadd.f32 %v7099_v36, %v9293_v43 }
 0x6b4   : > { %v7103_v25 = vpop.f32.mrf.mxu1  ;;  %v9248_v37 = vpop.f32.mrf.mxu0 }
 0x6b5   : > { %v4322_v12 = vadd.f32 %v7102_v47, %v9293_v43 }
 0x6b6   : > { %v7104_v41 = vpop.f32.mrf.mxu1  ;;  %v9250_v8 = vpop.f32.mrf.mxu0 }
 0x6b7   : > { %v7105_v34 = vadd.f32 %v7104_v41, %v7103_v25  ;;  %v4398_v25 = vadd.f32 %v7151_v50, %v4301_v49  ;;  %v7160_v41 = vadd.f32 %v9238_v7, %v9236_v5  ;;  %v7169_v5 = vadd.f32 %v9250_v8, %v9248_v37 }
 0x6b8   : > { %v9252_v9 = vpop.f32.mrf.mxu1  ;;  %v9254_v33 = vpop.f32.mrf.mxu0 }
 0x6ba   : > { %v9256_v2 = vpop.f32.mrf.mxu1  ;;  %v9258_v60 = vpop.f32.mrf.mxu0 }
 0x6bb   : > { %v7108_v7 = vadd.f32 %v9256_v2, %v9252_v9 }
 0x6bc   : > { %v9260_v55 = vpop.f32.mrf.mxu1  ;;  %v9262_v14 = vpop.f32.mrf.mxu0 }
 0x6bd   : > { %v4330_v3 = vadd.f32 %v7108_v7, %v9293_v43 }
 0x6be   : > { %v9264_v11 = vpop.f32.mrf.mxu1  ;;  %v9266_v61 = vpop.f32.mrf.mxu0 }
 0x6c0   : > { %v7112_v17 = vpop.f32.mrf.mxu1  ;;  %v9268_v15 = vpop.f32.mrf.mxu0 }
 0x6c2   : > { %v7113_v22 = vpop.f32.mrf.mxu1  ;;  %v9272_v30 = vpop.f32.mrf.mxu0 }
 0x6c3   : > { %v7114_v57 = vadd.f32 %v7113_v22, %v7112_v17  ;;  %v7178_v38 = vadd.f32 %v9272_v30, %v9268_v15 }
 0x6c4   : > { %v9270_v27 = vpop.f32.mrf.mxu1  ;;  %v9278_v23 = vpop.f32.mrf.mxu0 }
 0x6c5   : > { %v4338_v9 = vadd.f32 %v7114_v57, %v9293_v43 }
 0x6c6   : > { %v9274_v54 = vpop.f32.mrf.mxu1  ;;  %v9284_v6 = vpop.f32.mrf.mxu0 }
 0x6c7   : > { %v7117_v47 = vadd.f32 %v9274_v54, %v9270_v27 }
 0x6c8   : > { %v9276_v58 = vpop.f32.mrf.mxu1  ;;  %v9295_v29 = vpop.f32.mrf.mxu0 }
 0x6c9   : > { %10006 = vst [vmem:[#allocation13_spill] sm:$0xff] %v9295_v29  ;;  %v4309_v29 = vadd.f32 %v7093_v24, %v9293_v43  ;;  %v4341_v54 = vadd.f32 %v7117_v47, %v9293_v43 }
 0x6ca   : > { %v9280_v48 = vpop.f32.mrf.mxu1  ;;  %v9303_v45 = vpop.f32.mrf.mxu0 }
 0x6cc   : > { %v9282_v16 = vpop.f32.mrf.mxu1  ;;  %v9316_v32 = vpop.f32.mrf.mxu0 }
 0x6cd   : > { %10004 = vst [vmem:[#allocation15_spill] sm:$0xff] %v9282_v16  ;;  %v7096_v16 = vadd.f32 %v7095_v28, %v7094_v62  ;;  %v4406_v62 = vadd.f32 %v7157_v31, %v4309_v29  ;;  %v4414_v31 = vadd.f32 %v7163_v13, %v4317_v46 }
 0x6ce   : > { %v9286_v52 = vpop.f32.mrf.mxu1  ;;  %v9331_v63 = vpop.f32.mrf.mxu0 }
 0x6cf   : > { %10005 = vst [vmem:[#allocation12_spill] sm:$0xff] %v9286_v52  ;;  %v4403_v52 = vadd.f32 %v7154_v26, %v4306_v4  ;;  %v4314_v28 = vadd.f32 %v7096_v16, %v9293_v43  ;;  %v4419_v16 = vadd.f32 %v7166_v44, %v4322_v12  ;;  %v4325_v4 = vadd.f32 %v7105_v34, %v9293_v43 }
 0x6d0   : > { %v9288_v42 = vpop.f32.mrf.mxu1  ;;  %v7111_v26 = vadd.f32 %v9264_v11, %v9260_v55  ;;  %v7188_v37 = vpop.f32.mrf.mxu0  ;;  %v4435_v34 = vadd.f32 %v7178_v38, %v4338_v9 }
 0x6d1   : > { %v4411_v19 = vadd.f32 %v7160_v41, %v4314_v28  ;;  %v7181_v28 = vadd.f32 %v9284_v6, %v9278_v23 }
 0x6d2   : > { %v9297_v18 = vpop.f32.mrf.mxu1  ;;  %v4333_v27 = vadd.f32 %v7111_v26, %v9293_v43  ;;  %v7189_v50 = vpop.f32.mrf.mxu0 }
 0x6d3   : > { %v7190_v38 = vadd.f32 %v7189_v50, %v7188_v37 }
 0x6d4   : > { %v9300_v40 = vpop.f32.mrf.mxu1  ;;  %v10009_v26 = vld [vmem:[#allocation15_spill] sm:$0xff] }
 0x6d5   : > { %10007 = vst [vmem:[#allocation14_spill] sm:$0xff] %v9300_v40 }
 0x6d6   : > { %v9305_v53 = vpop.f32.mrf.mxu1  ;;  %v10010_v47 = vld [vmem:[#allocation12_spill] sm:$0xff] }
 0x6d8   : > { %v7440_v1 = vpop.f32.mrf.mxu1 }
 0x6d9   : > { %v9311_v40 = vadd.f32 %v7440_v1, %v4403_v52  ;;  %v4422_v1 = vadd.f32 %v7169_v5, %v4325_v4 }
 0x6da   : > { %v4491_v0 = vpop.f32.mrf.mxu1 }
 0x6db   : > { %v4556_v39 = vmax.f32 %v9311_v40, 0.0  ;;  %v9319_v35 = vadd.f32 %v4491_v0, %v4395_v20  ;;  %v7126_v20 = vadd.f32 %v9297_v18, %v9288_v42  ;;  %v7172_v0 = vadd.f32 %v9258_v60, %v9254_v33 }
 0x6dc   : > { %v7441_v52 = vpop.f32.mrf.mxu1  ;;  %v7120_v42 = vadd.f32 %v9280_v48, %v9276_v58  ;;  %v10008_v23 = vld [vmem:[#allocation14_spill] sm:$0xff]  ;;  %v4438_v48 = vadd.f32 %v7181_v28, %v4341_v54 }
 0x6dd   : > { %4572 = vst [vmem:[#allocation2 + $0x1a] sm:$0xff] %v4556_v39  ;;  %v4554_v59 = vmax.f32 %v9319_v35, 0.0  ;;  %v9327_v56 = vadd.f32 %v7441_v52, %v4406_v62  ;;  %v7175_v62 = vadd.f32 %v9266_v61, %v9262_v14  ;;  %v4427_v36 = vadd.f32 %v7172_v0, %v4330_v3  ;;  %v7813_v52 = vld [vmem:[#allocation7 + $0x270] ss:$8 sps:$4 sm:$0xff]   ;;  %v7191_v61 = vpop.f32.mrf.mxu0  ;;  %v7818_v3 = vld [vmem:[#allocation7 + $0x264] ss:$8 sps:$4 sm:$0xff]  }
 0x6de   : > { %v4494_v29 = vpop.f32.mrf.mxu1  ;;  %v4354_v14 = vadd.f32 %v7126_v20, %v9293_v43  ;;  %v7129_v6 = vadd.f32 %v9305_v53, %v10008_v23  ;;  %v4346_v53 = vadd.f32 %v7120_v42, %v9293_v43  ;;  %v7816_v28 = vld [vmem:[#allocation7 + $0x260] ss:$8 sps:$4 sm:$0xff]  }
 0x6df   : > { %4570 = vst [vmem:[#allocation2 + $0x2] sm:$0xff] %v4554_v59  ;;  %v4557_v51 = vmax.f32 %v9327_v56, 0.0  ;;  %v9337_v21 = vadd.f32 %v4494_v29, %v4398_v25  ;;  %v4430_v57 = vadd.f32 %v7175_v62, %v4333_v27  ;;  %v7822_v56 = vld [vmem:[#allocation7 + $0x240] ss:$8 sps:$4 sm:$0xff]  }
 0x6e0   : > { %v7444_v24 = vpop.f32.mrf.mxu1  ;;  %v4451_v50 = vadd.f32 %v7190_v38, %v4354_v14 }
 0x6e1   : > { %4573 = vst [vmem:[#allocation2 + $0x22] sm:$0xff] %v4557_v51  ;;  %v4555_v17 = vmax.f32 %v9337_v21, 0.0  ;;  %v9347_v22 = vadd.f32 %v7444_v24, %v4419_v16 }
 0x6e2   : > { %v4507_v8 = vpop.f32.mrf.mxu1 }
 0x6e3   : > { %4571 = vst [vmem:[#allocation2 + $0xa] sm:$0xff] %v4555_v17  ;;  %v4560_v2 = vmax.f32 %v9347_v22, 0.0  ;;  %v9357_v10 = vadd.f32 %v4507_v8, %v4411_v19  ;;  %v7123_v8 = vadd.f32 %v10010_v47, %v10009_v26  ;;  %v7824_v26 = vld [vmem:[#allocation7 + $0x244] ss:$8 sps:$4 sm:$0xff]  }
 0x6e4   : > { %v7445_v49 = vpop.f32.mrf.mxu1 }
 0x6e5   : > { %4576 = vst [vmem:[#allocation2 + $0x4a] sm:$0xff] %v4560_v2  ;;  %v4558_v55 = vmax.f32 %v9357_v10, 0.0  ;;  %v9365_v11 = vadd.f32 %v7445_v49, %v4422_v1  ;;  %v4749_v49 = vpack.c.bf16 %v4555_v17, %v4554_v59  ;;  %v4357_v59 = vadd.f32 %v7129_v6, %v9293_v43 }
 0x6e6   : > { %v4510_v12 = vpop.f32.mrf.mxu1  ;;  %v4683_v44 = vld [vmem:[#allocation2 + $0x1] sm:$0xff] }
 0x6e7   : > { %4574 = vst [vmem:[#allocation2 + $0x32] sm:$0xff] %v4558_v55  ;;  %v4561_v15 = vmax.f32 %v9365_v11, 0.0  ;;  %v9376_v30 = vadd.f32 %v4510_v12, %v4414_v31  ;;  %v4667_v25 = vld [vmem:[#allocation2] sm:$0xff]  ;;  %v10011_v12 = vld [vmem:[#allocation13_spill] sm:$0xff] }
 0x6e8   : > { %v7448_v18 = vpop.f32.mrf.mxu1  ;;  %v4686_v41 = vld [vmem:[#allocation2 + $0x21] sm:$0xff]  ;;  %v4685_v31 = vld [vmem:[#allocation2 + $0x19] sm:$0xff]  ;;  %v7184_v0 = vadd.f32 %v9303_v45, %v10011_v12  ;;  %v4349_v45 = vadd.f32 %v7123_v8, %v9293_v43 }
 0x6e9   : > { %4577 = vst [vmem:[#allocation2 + $0x52] sm:$0xff] %v4561_v15  ;;  %v4559_v33 = vmax.f32 %v9376_v30, 0.0  ;;  %v9387_v60 = vadd.f32 %v7448_v18, %v4435_v34  ;;  %v4717_v7 = vld [vmem:[#allocation2 + $0x1b] sm:$0xff]  ;;  %v4718_v13 = vld [vmem:[#allocation2 + $0x23] sm:$0xff]  ;;  %v4753_v20 = vpack.c.bf16 %v4686_v41, %v4685_v31  ;;  %v7192_v34 = vpop.f32.mrf.mxu0 }
 0x6ea   : > { %v4523_v58 = vpop.f32.mrf.mxu1  ;;  %v4684_v29 = vld [vmem:[#allocation2 + $0x9] sm:$0xff]  ;;  %v4755_v35 = vpack.c.bf16 %v4718_v13, %v4717_v7  ;;  %v7821_v18 = vld [vmem:[#allocation7 + $0x254] ss:$8 sps:$4 sm:$0xff]   ;;  %v4443_v41 = vadd.f32 %v7184_v0, %v4346_v53  ;;  %v4670_v23 = vld [vmem:[#allocation2 + $0x20] sm:$0xff] }
 0x6eb   : > { %v4715_v16 = vld [vmem:[#allocation2 + $0x3] sm:$0xff]  ;;  %v4716_v4 = vld [vmem:[#allocation2 + $0xb] sm:$0xff]  ;;  %4575 = vst [vmem:[#allocation2 + $0x3a] sm:$0xff] %v4559_v33  ;;  %v4564_v21 = vmax.f32 %v9387_v60, 0.0  ;;  %v9395_v46 = vadd.f32 %v4523_v58, %v4427_v36  ;;  %v4748_v24 = vpack.c.bf16 %v4684_v29, %v4683_v44  ;;  %v7193_v36 = vadd.f32 %v7192_v34, %v7191_v61 }
 0x6ec   : > { %v4750_v19 = vpack.c.bf16 %v4716_v4, %v4715_v16  ;;  %v4668_v5 = vld [vmem:[#allocation2 + $0x8] sm:$0xff]  ;;  %v7449_v9 = vpop.f32.mrf.mxu1  ;;  %v4669_v16 = vld [vmem:[#allocation2 + $0x18] sm:$0xff] }
 0x6ed   : > { %v4747_v1 = vpack.c.bf16 %v4668_v5, %v4667_v25  ;;  %4580 = vst [vmem:[#allocation2 + $0x7a] sm:$0xff] %v4564_v21  ;;  %v4562_v27 = vmax.f32 %v9395_v46, 0.0  ;;  %v9405_v54 = vadd.f32 %v7449_v9, %v4438_v48  ;;  %5230 = vmatprep.mubr.bf16.mxu0 %v4748_v24  ;;  %v4454_v29 = vadd.f32 %v7193_v36, %v4357_v59  ;;  %v7827_v9 = vld [vmem:[#allocation7 + $0x234] ss:$8 sps:$4 sm:$0xff]   ;;  %v4689_v12 = vld [vmem:[#allocation2 + $0x49] sm:$0xff] }
 0x6ee   : > { %5343 = vmatprep.mubr.bf16.mxu1 %v4750_v19  ;;  %v4526_v62 = vpop.f32.mrf.mxu1  ;;  %v4752_v24 = vpack.c.bf16 %v4670_v23, %v4669_v16  ;;  %v7819_v19 = vld [vmem:[#allocation7 + $0x250] ss:$8 sps:$4 sm:$0xff]   ;;  %v7828_v59 = vld [vmem:[#allocation7 + $0x220] ss:$8 sps:$4 sm:$0xff]  }
 0x6ef   : > { %5231 = vmatmul.mubr.bf16.vlgmr.msra.gmra.mxu0 %v4747_v1  ;;  %5344 = vmatmul.mubr.bf16.vlgmr.msra.gmra.mxu1 %v4749_v49  ;;  %4578 = vst [vmem:[#allocation2 + $0x62] sm:$0xff] %v4562_v27  ;;  %v4565_v17 = vmax.f32 %v9405_v54, 0.0  ;;  %v9413_v37 = vadd.f32 %v4526_v62, %v4430_v57  ;;  %v7825_v0 = vld [vmem:[#allocation7 + $0x230] ss:$8 sps:$4 sm:$0xff]  }
 0x6f0   : > { %5425 = vmatpush1.bf16.msra.mxu0 %v7813_v52  ;;  %5240 = vmatprep.mubr.bf16.mxu0 %v4753_v20  ;;  %v7452_v42 = vpop.f32.mrf.mxu1  ;;  %v7187_v52 = vadd.f32 %v9331_v63, %v9316_v32  ;;  %v4754_v32 = vpack.c.bf16 %v4557_v51, %v4556_v39  ;;  %v4687_v63 = vld [vmem:[#allocation2 + $0x31] sm:$0xff]  ;;  %v4759_v20 = vpack.c.bf16 %v4559_v33, %v4558_v55  ;;  %v4673_v55 = vld [vmem:[#allocation2 + $0x48] sm:$0xff] }
 0x6f1   : > { %5353 = vmatprep.mubr.bf16.mxu1 %v4755_v35  ;;  %5426 = vmatprep.subr.bf16.mxu0 %v7818_v3  ;;  %4581 = vst [vmem:[#allocation2 + $0x82] sm:$0xff] %v4565_v17  ;;  %v4563_v44 = vmax.f32 %v9413_v37, 0.0  ;;  %v9419_v25 = vadd.f32 %v7452_v42, %v4451_v50  ;;  %v4690_v1 = vld [vmem:[#allocation2 + $0x51] sm:$0xff]  ;;  %v7830_v35 = vld [vmem:[#allocation7 + $0x224] ss:$8 sps:$4 sm:$0xff]   ;;  %v4764_v42 = vpack.c.bf16 %v4561_v15, %v4560_v2 }
 0x6f2   : > { %v4539_v14 = vpop.f32.mrf.mxu1  ;;  %v4688_v6 = vld [vmem:[#allocation2 + $0x39] sm:$0xff]  ;;  %v4446_v57 = vadd.f32 %v7187_v52, %v4349_v45  ;;  %v4721_v49 = vld [vmem:[#allocation2 + $0x4b] sm:$0xff]  ;;  %v4763_v34 = vpack.c.bf16 %v4690_v1, %v4689_v12  ;;  %v4774_v46 = vpack.c.bf16 %v4565_v17, %v4564_v21 }
 0x6f3   : > { %v4719_v43 = vld [vmem:[#allocation2 + $0x33] sm:$0xff]  ;;  %v4720_v58 = vld [vmem:[#allocation2 + $0x3b] sm:$0xff]  ;;  %4579 = vst [vmem:[#allocation2 + $0x6a] sm:$0xff] %v4563_v44  ;;  %v4568_v61 = vmax.f32 %v9419_v25, 0.0  ;;  %v9426_v48 = vadd.f32 %v4539_v14, %v4443_v41  ;;  %v4758_v13 = vpack.c.bf16 %v4688_v6, %v4687_v63  ;;  %v7836_v52 = vld [vmem:[#allocation7 + $0x204] ss:$8 sps:$4 sm:$0xff]   ;;  %v4769_v15 = vpack.c.bf16 %v4563_v44, %v4562_v27 }
 0x6f4   : > { %5427 = vmatpush1.bf16.msra.mxu0 %v7816_v28  ;;  %v7453_v4 = vpop.f32.mrf.mxu1  ;;  %v4760_v53 = vpack.c.bf16 %v4720_v58, %v4719_v43  ;;  %v4672_v8 = vld [vmem:[#allocation2 + $0x38] sm:$0xff]  ;;  %v4671_v3 = vld [vmem:[#allocation2 + $0x30] sm:$0xff]  ;;  %v7834_v14 = vld [vmem:[#allocation7 + $0x200] ss:$8 sps:$4 sm:$0xff]  }
 0x6f5   : > { %5428 = vmatprep.subr.bf16.mxu0 %v7821_v18  ;;  %4584 = vst [vmem:[#allocation2 + $0xaa] sm:$0xff] %v4568_v61  ;;  %v4566_v5 = vmax.f32 %v9426_v48, 0.0  ;;  %v9435_v7 = vadd.f32 %v7453_v4, %v4454_v29  ;;  %v4722_v31 = vld [vmem:[#allocation2 + $0x53] sm:$0xff]  ;;  %v4757_v38 = vpack.c.bf16 %v4672_v8, %v4671_v3  ;;  %v8020_v48 = vmov 0  }
 0x6f6   : > { %v4542_v47 = vpop.f32.mrf.mxu1  ;;  %v4765_v62 = vpack.c.bf16 %v4722_v31, %v4721_v49  ;;  %v4674_v50 = vld [vmem:[#allocation2 + $0x50] sm:$0xff]  ;;  %v4691_v18 = vld [vmem:[#allocation2 + $0x61] sm:$0xff]  ;;  %v4693_v29 = vld [vmem:[#allocation2 + $0x79] sm:$0xff] }
 0x6f7   : > { %5241 = vmatmul.mubr.bf16.gmra.mxu0 %v4752_v24  ;;  %5354 = vmatmul.mubr.bf16.gmra.mxu1 %v4754_v32  ;;  %4582 = vst [vmem:[#allocation2 + $0x92] sm:$0xff] %v4566_v5  ;;  %v4569_v40 = vmax.f32 %v9435_v7, 0.0  ;;  %v9440_v39 = vadd.f32 %v4542_v47, %v4446_v57  ;;  %v7833_v28 = vld [vmem:[#allocation7 + $0x214] ss:$8 sps:$4 sm:$0xff]   ;;  %v4762_v33 = vpack.c.bf16 %v4674_v50, %v4673_v55  ;;  %v7831_v36 = vld [vmem:[#allocation7 + $0x210] ss:$8 sps:$4 sm:$0xff]  }
 0x6f8   : > { %5250 = vmatprep.mubr.bf16.mxu0 %v4758_v13  ;;  %5363 = vmatprep.mubr.bf16.mxu1 %v4760_v53  ;;  %v4694_v43 = vld [vmem:[#allocation2 + $0x81] sm:$0xff]  ;;  %v7838_v7 = vld [vmem:[%s9961_s8 + $0x38] sm:$0xff]   ;;  %v7840_v50 = vld [vmem:[%s9961_s8 + $0x30] sm:$0xff]  }
 0x6f9   : > { %5429 = vmatpush1.bf16.msra.mxu0 %v7819_v19  ;;  %4585 = vst [vmem:[#allocation2 + $0xb2] sm:$0xff] %v4569_v40  ;;  %v4567_v51 = vmax.f32 %v9440_v39, 0.0  ;;  %v4725_v22 = vld [vmem:[#allocation2 + $0x7b] sm:$0xff]  ;;  %v4726_v58 = vld [vmem:[#allocation2 + $0x83] sm:$0xff]  ;;  %v4773_v16 = vpack.c.bf16 %v4694_v43, %v4693_v29  ;;  %v4784_v3 = vpack.c.bf16 %v4569_v40, %v4568_v61  ;;  %v4732_v39 = vld [vmem:[#allocation2 + $0xc] sm:$0xff] }
 0x6fa   : > { %5430 = vmatprep.subr.bf16.mxu0 %v7824_v26  ;;  %v4692_v10 = vld [vmem:[#allocation2 + $0x69] sm:$0xff]  ;;  %v4675_v11 = vld [vmem:[#allocation2 + $0x60] sm:$0xff]  ;;  %v4775_v4 = vpack.c.bf16 %v4726_v58, %v4725_v22  ;;  %v4677_v19 = vld [vmem:[#allocation2 + $0x78] sm:$0xff] }
 0x6fb   : > { %4583 = vst [vmem:[#allocation2 + $0x9a] sm:$0xff] %v4567_v51  ;;  %v4723_v45 = vld [vmem:[#allocation2 + $0x63] sm:$0xff]  ;;  %v4724_v30 = vld [vmem:[#allocation2 + $0x6b] sm:$0xff]  ;;  %v4768_v41 = vpack.c.bf16 %v4692_v10, %v4691_v18  ;;  %v4779_v60 = vpack.c.bf16 %v4567_v51, %v4566_v5  ;;  %v7837_v61 = vld [vmem:[%s9961_s8 + $0x78] sm:$0xff]  }
 0x6fc   : > { %v4770_v23 = vpack.c.bf16 %v4724_v30, %v4723_v45  ;;  %v4676_v6 = vld [vmem:[#allocation2 + $0x68] sm:$0xff]  ;;  %v4678_v57 = vld [vmem:[#allocation2 + $0x80] sm:$0xff]  ;;  %7210 = vmatprep.subr.bf16.mxu1 %v7837_v61  ;;  %v7846_v43 = vld [vmem:[%s9961_s8 + $0x18] sm:$0xff]  }
 0x6fd   : > { %5431 = vmatpush1.bf16.msra.mxu0 %v7822_v56  ;;  %v4767_v2 = vpack.c.bf16 %v4676_v6, %v4675_v11  ;;  %v4772_v13 = vpack.c.bf16 %v4678_v57, %v4677_v19  ;;  %v4697_v54 = vld [vmem:[#allocation2 + $0xa9] sm:$0xff]  ;;  %7211 = vmatpush3.bf16.msra.mxu1 %v7838_v7  ;;  %v7845_v6 = vld [vmem:[%s9961_s8 + $0x58] sm:$0xff]   ;;  %v7852_v57 = vld [vmem:[%s9961_s8] sm:$0xff]  }
 0x6fe   : > { %5432 = vmatprep.subr.bf16.mxu0 %v7827_v9  ;;  %v4695_v27 = vld [vmem:[#allocation2 + $0x91] sm:$0xff]  ;;  %v4681_v49 = vld [vmem:[#allocation2 + $0xa8] sm:$0xff] }
 0x6ff   : > { %5251 = vmatmul.mubr.bf16.gmra.mxu0 %v4757_v38  ;;  %5364 = vmatmul.mubr.bf16.gmra.mxu1 %v4759_v20  ;;  %v4679_v8 = vld [vmem:[#allocation2 + $0x90] sm:$0xff]  ;;  %v4731_v5 = vld [vmem:[#allocation2 + $0x4] sm:$0xff]  ;;  %v4733_v38 = vld [vmem:[#allocation2 + $0x1c] sm:$0xff] }
 0x700   : > { %5260 = vmatprep.mubr.bf16.mxu0 %v4763_v34  ;;  %5373 = vmatprep.mubr.bf16.mxu1 %v4765_v62  ;;  %v4698_v26 = vld [vmem:[#allocation2 + $0xb1] sm:$0xff]  ;;  %v4751_v51 = vpack.c.bf16 %v4732_v39, %v4731_v5  ;;  %v4734_v20 = vld [vmem:[#allocation2 + $0x24] sm:$0xff]  ;;  %v4736_v34 = vld [vmem:[#allocation2 + $0x3c] sm:$0xff] }
 0x701   : > { %5433 = vmatpush1.bf16.msra.mxu0 %v7825_v0  ;;  %v4729_v47 = vld [vmem:[#allocation2 + $0xab] sm:$0xff]  ;;  %v4730_v56 = vld [vmem:[#allocation2 + $0xb3] sm:$0xff]  ;;  %v4783_v21 = vpack.c.bf16 %v4698_v26, %v4697_v54  ;;  %v4756_v12 = vpack.c.bf16 %v4734_v20, %v4733_v38 }
 0x702   : > { %5434 = vmatprep.subr.bf16.mxu0 %v7830_v35  ;;  %v4696_v24 = vld [vmem:[#allocation2 + $0x99] sm:$0xff]  ;;  %v4785_v17 = vpack.c.bf16 %v4730_v56, %v4729_v47  ;;  %v4682_v1 = vld [vmem:[#allocation2 + $0xb0] sm:$0xff]  ;;  %v7841_v30 = vld [vmem:[%s9961_s8 + $0x68] sm:$0xff]  }
 0x703   : > { %v4727_v32 = vld [vmem:[#allocation2 + $0x93] sm:$0xff]  ;;  %v4728_v63 = vld [vmem:[#allocation2 + $0x9b] sm:$0xff]  ;;  %v4778_v37 = vpack.c.bf16 %v4696_v24, %v4695_v27  ;;  %v4782_v31 = vpack.c.bf16 %v4682_v1, %v4681_v49  ;;  %v7842_v55 = vld [vmem:[%s9961_s8 + $0x28] sm:$0xff]  }
 0x704   : > { %v4780_v44 = vpack.c.bf16 %v4728_v63, %v4727_v32  ;;  %v4680_v53 = vld [vmem:[#allocation2 + $0x98] sm:$0xff]  ;;  %v4737_v40 = vld [vmem:[#allocation2 + $0x4c] sm:$0xff]  ;;  %v4666_v24 = vld [vmem:[%s9960_s7] sm:$0x3] }
 0x705   : > { %5435 = vmatpush1.bf16.msra.mxu0 %v7828_v59  ;;  %v4777_v9 = vpack.c.bf16 %v4680_v53, %v4679_v8  ;;  %v4735_v0 = vld [vmem:[#allocation2 + $0x34] sm:$0xff]  ;;  %v4740_v10 = vld [vmem:[#allocation2 + $0x6c] sm:$0xff]  ;;  %v10012_v32 = vld [vmem:[#allocation10_spill] sm:$0xff] }
 0x706   : > { %5436 = vmatprep.subr.bf16.mxu0 %v7833_v28  ;;  %v4761_v25 = vpack.c.bf16 %v4736_v34, %v4735_v0  ;;  %v4738_v62 = vld [vmem:[#allocation2 + $0x54] sm:$0xff]  ;;  %v4739_v28 = vld [vmem:[#allocation2 + $0x64] sm:$0xff]  ;;  %v4745_v22 = vld [vmem:[#allocation2 + $0xac] sm:$0xff]  ;;  %v10013_v63 = vsub.s32 0, %v10012_v32 }
 0x707   : > { %5261 = vmatmul.mubr.bf16.gmra.mxu0 %v4762_v33  ;;  %5374 = vmatmul.mubr.bf16.gmra.mxu1 %v4764_v42  ;;  %v4766_v35 = vpack.c.bf16 %v4738_v62, %v4737_v40  ;;  %v7839_v59 = vld [vmem:[%s9961_s8 + $0x70] sm:$0xff]   ;;  %v4771_v45 = vpack.c.bf16 %v4740_v10, %v4739_v28  ;;  %v4741_v33 = vld [vmem:[#allocation2 + $0x7c] sm:$0xff]  ;;  %v4742_v42 = vld [vmem:[#allocation2 + $0x84] sm:$0xff] }
 0x708   : > { %5270 = vmatprep.mubr.bf16.mxu0 %v4768_v41  ;;  %5383 = vmatprep.mubr.bf16.mxu1 %v4770_v23  ;;  %v4776_v18 = vpack.c.bf16 %v4742_v42, %v4741_v33  ;;  %v7844_v41 = vld [vmem:[%s9961_s8 + $0x20] sm:$0xff]   ;;  %v4743_v23 = vld [vmem:[#allocation2 + $0x94] sm:$0xff]  ;;  %v7849_v29 = vld [vmem:[%s9961_s8 + $0x48] sm:$0xff]   ;;  %v9524_v19 = vrot.slane %v4666_v24, %v10013_v63 }
 0x709   : > { %5437 = vmatpush1.bf16.msra.mxu0 %v7831_v36  ;;  %7212 = vmatprep.subr.bf16.mxu1 %v7839_v59  ;;  %v7843_v36 = vld [vmem:[%s9961_s8 + $0x60] sm:$0xff]   ;;  %v4746_v58 = vld [vmem:[#allocation2 + $0xb4] sm:$0xff] }
 0x70a   : > { %5438 = vmatprep.subr.bf16.mxu0 %v7836_v52  ;;  %7213 = vmatpush3.bf16.msra.mxu1 %v7840_v50  ;;  %v4744_v52 = vld [vmem:[#allocation2 + $0x9c] sm:$0xff]  ;;  %v4786_v11 = vpack.c.bf16 %v4746_v58, %v4745_v22 }
 0x70b   : > { %7214 = vmatprep.subr.bf16.mxu1 %v7841_v30 }
 0x70d   : > { %5439 = vmatpush1.bf16.msra.mxu0 %v7834_v14  ;;  %v4781_v14 = vpack.c.bf16 %v4744_v52, %v4743_v23 }
 0x70e   : > { %7215 = vmatpush3.bf16.msra.mxu1 %v7842_v55 }
 0x70f   : > { %5271 = vmatmul.mubr.bf16.gmra.mxu0 %v4767_v2  ;;  %5384 = vmatmul.mubr.bf16.gmra.mxu1 %v4769_v15  ;;  %v7847_v2 = vld [vmem:[%s9961_s8 + $0x50] sm:$0xff]  }
 0x710   : > { %5280 = vmatprep.mubr.bf16.mxu0 %v4773_v16  ;;  %5393 = vmatprep.mubr.bf16.mxu1 %v4775_v4  ;;  %v7848_v15 = vld [vmem:[%s9961_s8 + $0x10] sm:$0xff]   ;;  %v7850_v16 = vld [vmem:[%s9961_s8 + $0x8] sm:$0xff]   ;;  %v7851_v4 = vld [vmem:[%s9961_s8 + $0x40] sm:$0xff]  }
 0x711   : > { %7216 = vmatprep.subr.bf16.mxu1 %v7843_v36 }
 0x712   : > { %7217 = vmatpush3.bf16.msra.mxu1 %v7844_v41 }
 0x713   : > { %7218 = vmatprep.subr.bf16.mxu1 %v7845_v6 }
 0x716   : > { %7219 = vmatpush3.bf16.msra.mxu1 %v7846_v43 }
 0x717   : > { %5281 = vmatmul.mubr.bf16.gmra.mxu0 %v4772_v13  ;;  %5394 = vmatmul.mubr.bf16.gmra.mxu1 %v4774_v46  ;;  %v10014_v13 = vsub.s32 1, %v10012_v32 }
 0x718   : > { %5290 = vmatprep.mubr.bf16.mxu0 %v4778_v37  ;;  %5403 = vmatprep.mubr.bf16.mxu1 %v4780_v44 }
 0x719   : > { %7220 = vmatprep.subr.bf16.mxu1 %v7847_v2  ;;  %v9528_v46 = vrot.slane %v4666_v24, %v10014_v13 }
 0x71a   : > { %7221 = vmatpush3.bf16.msra.mxu1 %v7848_v15 }
 0x71b   : > { %7222 = vmatprep.subr.bf16.mxu1 %v7849_v29 }
 0x71e   : > { %7223 = vmatpush3.bf16.msra.mxu1 %v7850_v16 }
 0x71f   : > { %5291 = vmatmul.mubr.bf16.gmra.mxu0 %v4777_v9  ;;  %5404 = vmatmul.mubr.bf16.gmra.mxu1 %v4779_v60 }
 0x720   : > { %5300 = vmatprep.mubr.bf16.mxu0 %v4783_v21  ;;  %5413 = vmatprep.mubr.bf16.mxu1 %v4785_v17 }
 0x721   : > { %7224 = vmatprep.subr.bf16.mxu1 %v7851_v4 }
 0x722   : > { %7225 = vmatpush3.bf16.msra.mxu1 %v7852_v57 }
 0x727   : > { %5301 = vmatmul.mubr.bf16.gmra.mxu0 %v4782_v31  ;;  %5414 = vmatmul.mubr.bf16.gmra.mxu1 %v4784_v3 }
 0x728   : > { %5456 = vmatprep.mubr.bf16.mxu0 %v8020_v48 }
 0x72f   : > { %5457 = vmatmul.mubr.bf16.vlgmr.msra.gmra.mxu0 %v4751_v51 }
 0x730   : > { %5466 = vmatprep.mubr.bf16.mxu0 %v8020_v48 }
 0x737   : > { %5467 = vmatmul.mubr.bf16.gmra.mxu0 %v4756_v12 }
 0x738   : > { %5476 = vmatprep.mubr.bf16.mxu0 %v8020_v48 }
 0x73f   : > { %5477 = vmatmul.mubr.bf16.gmra.mxu0 %v4761_v25 }
 0x740   : > { %5486 = vmatprep.mubr.bf16.mxu0 %v8020_v48 }
 0x747   : > { %5487 = vmatmul.mubr.bf16.gmra.mxu0 %v4766_v35 }
 0x748   : > { %5496 = vmatprep.mubr.bf16.mxu0 %v8020_v48 }
 0x74f   : > { %5497 = vmatmul.mubr.bf16.gmra.mxu0 %v4771_v45 }
 0x750   : > { %5506 = vmatprep.mubr.bf16.mxu0 %v8020_v48 }
 0x757   : > { %5507 = vmatmul.mubr.bf16.gmra.mxu0 %v4776_v18 }
 0x758   : > { %5516 = vmatprep.mubr.bf16.mxu0 %v8020_v48 }
 0x75f   : > { %5517 = vmatmul.mubr.bf16.gmra.mxu0 %v4781_v14 }
 0x760   : > { %5526 = vmatprep.mubr.bf16.mxu0 %v8020_v48 }
 0x767   : > { %5527 = vmatmul.mubr.bf16.gmra.mxu0 %v4786_v11 }
 0x7af   : > { %v5232_v27 = vpop.f32.mrf.mxu0  ;;  %v9530_v37 = vpop.f32.mrf.mxu1 }
 0x7b0   : > { %v9533_v44 = vadd.f32 %v5232_v27, %v9524_v19 }
 0x7b1   : > { %v5234_v53 = vpop.f32.mrf.mxu0  ;;  %v9538_v47 = vpop.f32.mrf.mxu1 }
 0x7b2   : > { %v9536_v26 = vadd.f32 %v5234_v53, %v9528_v46 }
 0x7b3   : > { %v5236_v56 = vpop.f32.mrf.mxu0  ;;  %v9540_v9 = vpop.f32.mrf.mxu1 }
 0x7b5   : > { %v5238_v8 = vpop.f32.mrf.mxu0  ;;  %v5351_v1 = vpop.f32.mrf.mxu1 }
 0x7b7   : > { %v5242_v60 = vpop.f32.mrf.mxu0  ;;  %v9552_v3 = vpop.f32.mrf.mxu1 }
 0x7b8   : > { %v9543_v54 = vadd.f32 %v5242_v60, %v9524_v19  ;;  %v5237_v60 = vadd.f32 %v5236_v56, %v9524_v19 }
 0x7b9   : > { %v5244_v21 = vpop.f32.mrf.mxu0  ;;  %v9560_v38 = vpop.f32.mrf.mxu1 }
 0x7ba   : > { %v9546_v17 = vadd.f32 %v5244_v21, %v9528_v46 }
 0x7bb   : > { %v9548_v49 = vpop.f32.mrf.mxu0  ;;  %v9566_v0 = vpop.f32.mrf.mxu1 }
 0x7bd   : > { %v9550_v31 = vpop.f32.mrf.mxu0  ;;  %v9574_v40 = vpop.f32.mrf.mxu1 }
 0x7bf   : > { %v5252_v48 = vpop.f32.mrf.mxu0  ;;  %v9580_v59 = vpop.f32.mrf.mxu1 }
 0x7c0   : > { %v9555_v5 = vadd.f32 %v5252_v48, %v9524_v19 }
 0x7c1   : > { %v5254_v39 = vpop.f32.mrf.mxu0  ;;  %v9588_v30 = vpop.f32.mrf.mxu1 }
 0x7c2   : > { %v9558_v51 = vadd.f32 %v5254_v39, %v9528_v46  ;;  %v5346_v39 = vadd.f32 %v9530_v37, %v9533_v44 }
 0x7c3   : > { %v9562_v20 = vpop.f32.mrf.mxu0  ;;  %v9594_v42 = vpop.f32.mrf.mxu1 }
 0x7c5   : > { %v9564_v12 = vpop.f32.mrf.mxu0  ;;  %v9602_v52 = vpop.f32.mrf.mxu1 }
 0x7c7   : > { %v5262_v34 = vpop.f32.mrf.mxu0  ;;  %v9608_v43 = vpop.f32.mrf.mxu1 }
 0x7c8   : > { %v9569_v25 = vadd.f32 %v5262_v34, %v9524_v19  ;;  %v5239_v34 = vadd.f32 %v5238_v8, %v9528_v46 }
 0x7c9   : > { %v5264_v61 = vpop.f32.mrf.mxu0  ;;  %v9616_v15 = vpop.f32.mrf.mxu1 }
 0x7ca   : > { %v9572_v7 = vadd.f32 %v5264_v61, %v9528_v46 }
 0x7cb   : > { %v9576_v62 = vpop.f32.mrf.mxu0  ;;  %v9622_v4 = vpop.f32.mrf.mxu1 }
 0x7cd   : > { %v9578_v35 = vpop.f32.mrf.mxu0  ;;  %v9630_v13 = vpop.f32.mrf.mxu1 }
 0x7cf   : > { %v5272_v50 = vpop.f32.mrf.mxu0  ;;  %v9637_v21 = vpop.f32.mrf.mxu1 }
 0x7d0   : > { %v9583_v28 = vadd.f32 %v5272_v50, %v9524_v19  ;;  %v5348_v50 = vadd.f32 %v9538_v47, %v9536_v26 }
 0x7d1   : > { %v5274_v10 = vpop.f32.mrf.mxu0 }
 0x7d2   : > { %v9586_v45 = vadd.f32 %v5274_v10, %v9528_v46  ;;  %v5350_v10 = vadd.f32 %v9540_v9, %v5237_v60  ;;  %v5249_v9 = vadd.f32 %v9550_v31, %v9528_v46 }
 0x7d3   : > { %v9590_v55 = vpop.f32.mrf.mxu0 }
 0x7d5   : > { %v9592_v33 = vpop.f32.mrf.mxu0 }
 0x7d7   : > { %v5282_v18 = vpop.f32.mrf.mxu0 }
 0x7d8   : > { %v9597_v36 = vadd.f32 %v5282_v18, %v9524_v19 }
 0x7d9   : > { %v5284_v41 = vpop.f32.mrf.mxu0 }
 0x7da   : > { %v9600_v23 = vadd.f32 %v5284_v41, %v9528_v46  ;;  %v9645_v41 = vpop.f32.mrf.mxu1 }
 0x7db   : > { %v9604_v14 = vpop.f32.mrf.mxu0 }
 0x7dc   : > { %v9651_v26 = vpop.f32.mrf.mxu1 }
 0x7dd   : > { %v9606_v6 = vpop.f32.mrf.mxu0 }
 0x7df   : > { %v5292_v22 = vpop.f32.mrf.mxu0 }
 0x7e0   : > { %v9611_v58 = vadd.f32 %v5292_v22, %v9524_v19 }
 0x7e1   : > { %v5294_v11 = vpop.f32.mrf.mxu0 }
 0x7e2   : > { %v9614_v2 = vadd.f32 %v5294_v11, %v9528_v46  ;;  %v5352_v11 = vadd.f32 %v5351_v1, %v5239_v34  ;;  %v5358_v34 = vadd.f32 %v9560_v38, %v9546_v17  ;;  %v5366_v38 = vadd.f32 %v9580_v59, %v9555_v5 }
 0x7e3   : > { %v9618_v29 = vpop.f32.mrf.mxu0 }
 0x7e5   : > { %v9620_v16 = vpop.f32.mrf.mxu0 }
 0x7e7   : > { %v5302_v57 = vpop.f32.mrf.mxu0 }
 0x7e8   : > { %v9625_v24 = vadd.f32 %v5302_v57, %v9524_v19 }
 0x7e9   : > { %v5304_v32 = vpop.f32.mrf.mxu0 }
 0x7ea   : > { %v9628_v63 = vadd.f32 %v5304_v32, %v9528_v46 }
 0x7eb   : > { %v9632_v27 = vpop.f32.mrf.mxu0 }
 0x7ec   : > { %10015 = vst [vmem:[#allocation11_spill] sm:$0xff] %v9628_v63  ;;  %v5247_v63 = vadd.f32 %v9548_v49, %v9524_v19 }
 0x7ed   : > { %v9634_v53 = vpop.f32.mrf.mxu0 }
 0x7ee   : > { %10016 = vst [vmem:[#allocation14_spill] sm:$0xff] %v9634_v53  ;;  %v5356_v53 = vadd.f32 %v9552_v3, %v9543_v54  ;;  %v5360_v49 = vadd.f32 %v9566_v0, %v5247_v63  ;;  %v5362_v3 = vadd.f32 %v9574_v40, %v5249_v9  ;;  %v5259_v40 = vadd.f32 %v9564_v12, %v9528_v46 }
 0x7ef   : > { %v5458_v48 = vpop.f32.mrf.mxu0 }
 0x7f0   : > { %v5459_v18 = vadd.f32 %v5458_v48, %v5346_v39  ;;  %v5372_v59 = vadd.f32 %v9602_v52, %v5259_v40 }
 0x7f1   : > { %v5460_v61 = vpop.f32.mrf.mxu0 }
 0x7f2   : > { %v5461_v56 = vadd.f32 %v5460_v61, %v5348_v50  ;;  %v5537_v37 = vmax.f32 %v5459_v18, 0.0 }
 0x7f3   : > { %v5462_v22 = vpop.f32.mrf.mxu0 }
 0x7f4   : > { %v5463_v57 = vadd.f32 %v5462_v22, %v5350_v10  ;;  %v5538_v60 = vmax.f32 %v5461_v56, 0.0  ;;  %v9658_v10 = vpop.f32.mrf.mxu1 }
 0x7f5   : > { %v5464_v32 = vpop.f32.mrf.mxu0 }
 0x7f6   : > { %v5539_v44 = vmax.f32 %v5463_v57, 0.0  ;;  %v5465_v8 = vadd.f32 %v5464_v32, %v5352_v11  ;;  %v5257_v11 = vadd.f32 %v9562_v20, %v9524_v19  ;;  %v9665_v0 = vpop.f32.mrf.mxu1 }
 0x7f7   : > { %v5468_v47 = vpop.f32.mrf.mxu0 }
 0x7f8   : > { %v5569_v1 = vpack.c.bf16 %v5539_v44, %v5537_v37  ;;  %v5540_v48 = vmax.f32 %v5465_v8, 0.0  ;;  %v5469_v50 = vadd.f32 %v5468_v47, %v5356_v53  ;;  %v5368_v8 = vadd.f32 %v9588_v30, %v9558_v51 }
 0x7f9   : > { %v5470_v39 = vpop.f32.mrf.mxu0  ;;  %v5370_v20 = vadd.f32 %v9594_v42, %v5257_v11  ;;  %v5376_v30 = vadd.f32 %v9608_v43, %v9569_v25 }
 0x7fa   : > { %v5570_v61 = vpack.c.bf16 %v5540_v48, %v5538_v60  ;;  %v5471_v18 = vadd.f32 %v5470_v39, %v5358_v34  ;;  %v5541_v56 = vmax.f32 %v5469_v50, 0.0  ;;  %v9672_v60 = vpop.f32.mrf.mxu1  ;;  %v5267_v39 = vadd.f32 %v9576_v62, %v9524_v19 }
 0x7fb   : > { %v5472_v54 = vpop.f32.mrf.mxu0  ;;  %v5269_v50 = vadd.f32 %v9578_v35, %v9528_v46  ;;  %v5277_v35 = vadd.f32 %v9590_v55, %v9524_v19 }
 0x7fc   : > { %v5473_v22 = vadd.f32 %v5472_v54, %v5360_v49  ;;  %5752 = vmatprep.mubr.bf16.mxu1 %v5570_v61  ;;  %v5542_v53 = vmax.f32 %v5471_v18, 0.0  ;;  %v5399_v42 = vpop.f32.mrf.mxu1  ;;  %v5380_v62 = vadd.f32 %v9622_v4, %v5267_v39 }
 0x7fd   : > { %v5474_v31 = vpop.f32.mrf.mxu0  ;;  %5753 = vmatmul.mubr.bf16.vlgmr.msra.gmra.mxu1 %v5569_v1  ;;  %v5382_v25 = vadd.f32 %v9630_v13, %v5269_v50  ;;  %v5390_v55 = vadd.f32 %v9651_v26, %v5277_v35  ;;  %v5398_v50 = vadd.f32 %v9672_v60, %v9600_v23 }
 0x7fe   : > { %v5543_v57 = vmax.f32 %v5473_v22, 0.0  ;;  %v5475_v17 = vadd.f32 %v5474_v31, %v5362_v3  ;;  %v5378_v22 = vadd.f32 %v9616_v15, %v9572_v7  ;;  %v5386_v7 = vadd.f32 %v9637_v21, %v9583_v28 }
 0x7ff   : > { %v5478_v63 = vpop.f32.mrf.mxu0 }
 0x800   : > { %v5571_v32 = vpack.c.bf16 %v5543_v57, %v5541_v56  ;;  %v5544_v37 = vmax.f32 %v5475_v17, 0.0  ;;  %v5479_v9 = vadd.f32 %v5478_v63, %v5366_v38  ;;  %v5401_v56 = vpop.f32.mrf.mxu1 }
 0x801   : > { %v5480_v44 = vpop.f32.mrf.mxu0 }
 0x802   : > { %v5572_v47 = vpack.c.bf16 %v5544_v37, %v5542_v53  ;;  %v5481_v1 = vadd.f32 %v5480_v44, %v5368_v8  ;;  %v5545_v34 = vmax.f32 %v5479_v9, 0.0  ;;  %v5405_v15 = vpop.f32.mrf.mxu1 }
 0x803   : > { %v5482_v5 = vpop.f32.mrf.mxu0 }
 0x804   : > { %v5483_v48 = vadd.f32 %v5482_v5, %v5370_v20  ;;  %5760 = vmatprep.mubr.bf16.mxu1 %v5572_v47  ;;  %v5546_v52 = vmax.f32 %v5481_v1, 0.0  ;;  %v5388_v20 = vadd.f32 %v9645_v41, %v9586_v45  ;;  %v5407_v5 = vpop.f32.mrf.mxu1  ;;  %v5396_v45 = vadd.f32 %v9665_v0, %v9597_v36 }
 0x805   : > { %v5484_v12 = vpop.f32.mrf.mxu0  ;;  %5761 = vmatmul.mubr.bf16.gmra.mxu1 %v5571_v32  ;;  %v5279_v32 = vadd.f32 %v9592_v33, %v9528_v46  ;;  %v5287_v33 = vadd.f32 %v9604_v14, %v9524_v19  ;;  %v5408_v35 = vadd.f32 %v5407_v5, %v9614_v2 }
 0x806   : > { %v5547_v49 = vmax.f32 %v5483_v48, 0.0  ;;  %v5485_v51 = vadd.f32 %v5484_v12, %v5372_v59  ;;  %v5409_v41 = vpop.f32.mrf.mxu1 }
 0x807   : > { %v5488_v61 = vpop.f32.mrf.mxu0  ;;  %v5392_v28 = vadd.f32 %v9658_v10, %v5279_v32 }
 0x808   : > { %v5573_v54 = vpack.c.bf16 %v5547_v49, %v5545_v34  ;;  %v5548_v3 = vmax.f32 %v5485_v51, 0.0  ;;  %v5489_v11 = vadd.f32 %v5488_v61, %v5376_v30  ;;  %v5289_v49 = vadd.f32 %v9606_v6, %v9528_v46 }
 0x809   : > { %v5490_v18 = vpop.f32.mrf.mxu0  ;;  %v5297_v6 = vadd.f32 %v9618_v29, %v9524_v19 }
 0x80a   : > { %v5574_v31 = vpack.c.bf16 %v5548_v3, %v5546_v52  ;;  %v5491_v43 = vadd.f32 %v5490_v18, %v5378_v22  ;;  %v5549_v63 = vmax.f32 %v5489_v11, 0.0  ;;  %v5400_v52 = vadd.f32 %v5399_v42, %v5287_v33  ;;  %v5411_v3 = vpop.f32.mrf.mxu1 }
 0x80b   : > { %v5492_v57 = vpop.f32.mrf.mxu0  ;;  %v5402_v22 = vadd.f32 %v5401_v56, %v5289_v49  ;;  %v5299_v42 = vadd.f32 %v9620_v16, %v9528_v46  ;;  %v5307_v16 = vadd.f32 %v9632_v27, %v9524_v19 }
 0x80c   : > { %v5493_v17 = vadd.f32 %v5492_v57, %v5380_v62  ;;  %5768 = vmatprep.mubr.bf16.mxu1 %v5574_v31  ;;  %v5550_v13 = vmax.f32 %v5491_v43, 0.0  ;;  %v5415_v23 = vpop.f32.mrf.mxu1 }
 0x80d   : > { %v5494_v38 = vpop.f32.mrf.mxu0  ;;  %5769 = vmatmul.mubr.bf16.gmra.mxu1 %v5573_v54 }
 0x80e   : > { %v5551_v40 = vmax.f32 %v5493_v17, 0.0  ;;  %v5495_v53 = vadd.f32 %v5494_v38, %v5382_v25  ;;  %v5406_v25 = vadd.f32 %v5405_v15, %v9611_v58  ;;  %v5417_v29 = vpop.f32.mrf.mxu1 }
 0x80f   : > { %v5498_v4 = vpop.f32.mrf.mxu0 }
 0x810   : > { %v5575_v37 = vpack.c.bf16 %v5551_v40, %v5549_v63  ;;  %v5552_v44 = vmax.f32 %v5495_v53, 0.0  ;;  %v5499_v9 = vadd.f32 %v5498_v4, %v5386_v7  ;;  %v5410_v63 = vadd.f32 %v5409_v41, %v5297_v6  ;;  %v5419_v2 = vpop.f32.mrf.mxu1 }
 0x811   : > { %v5500_v8 = vpop.f32.mrf.mxu0  ;;  %v5412_v4 = vadd.f32 %v5411_v3, %v5299_v42 }
 0x812   : > { %v5576_v47 = vpack.c.bf16 %v5552_v44, %v5550_v13  ;;  %v5501_v21 = vadd.f32 %v5500_v8, %v5388_v20  ;;  %v5553_v12 = vmax.f32 %v5499_v9, 0.0  ;;  %v5416_v8 = vadd.f32 %v5415_v23, %v9625_v24  ;;  %v5421_v19 = vpop.f32.mrf.mxu1 }
 0x813   : > { %v5502_v59 = vpop.f32.mrf.mxu0 }
 0x814   : > { %v5503_v1 = vadd.f32 %v5502_v59, %v5390_v55  ;;  %5776 = vmatprep.mubr.bf16.mxu1 %v5576_v47  ;;  %v5554_v10 = vmax.f32 %v5501_v21, 0.0  ;;  %v10017_v55 = vld [vmem:[#allocation14_spill] sm:$0xff]  ;;  %v10018_v21 = vld [vmem:[#allocation11_spill] sm:$0xff] }
 0x815   : > { %v5504_v48 = vpop.f32.mrf.mxu0  ;;  %5777 = vmatmul.mubr.bf16.gmra.mxu1 %v5575_v37  ;;  %v5309_v47 = vadd.f32 %v10017_v55, %v9528_v46 }
 0x816   : > { %v5555_v39 = vmax.f32 %v5503_v1, 0.0  ;;  %v5505_v34 = vadd.f32 %v5504_v48, %v5392_v28  ;;  %v5418_v1 = vadd.f32 %v5417_v29, %v10018_v21  ;;  %v5420_v48 = vadd.f32 %v5419_v2, %v5307_v16 }
 0x817   : > { %v5508_v26 = vpop.f32.mrf.mxu0 }
 0x818   : > { %v5577_v51 = vpack.c.bf16 %v5555_v39, %v5553_v12  ;;  %v5556_v30 = vmax.f32 %v5505_v34, 0.0  ;;  %v5509_v54 = vadd.f32 %v5508_v26, %v5396_v45  ;;  %v5422_v39 = vadd.f32 %v5421_v19, %v5309_v47 }
 0x819   : > { %v5510_v61 = vpop.f32.mrf.mxu0 }
 0x81a   : > { %v5578_v14 = vpack.c.bf16 %v5556_v30, %v5554_v10  ;;  %v5511_v62 = vadd.f32 %v5510_v61, %v5398_v50  ;;  %v5557_v31 = vmax.f32 %v5509_v54, 0.0  ;;  %v9718_v50 = vld [vmem:[%s9962_s9] ss:$0 sm:$0xff] }
 0x81b   : > { %v5512_v18 = vpop.f32.mrf.mxu0 }
 0x81c   : > { %v5513_v36 = vadd.f32 %v5512_v18, %v5400_v52  ;;  %5784 = vmatprep.mubr.bf16.mxu1 %v5578_v14  ;;  %v5558_v43 = vmax.f32 %v5511_v62, 0.0 }
 0x81d   : > { %v5514_v0 = vpop.f32.mrf.mxu0  ;;  %5785 = vmatmul.mubr.bf16.gmra.mxu1 %v5577_v51 }
 0x81e   : > { %v5559_v11 = vmax.f32 %v5513_v36, 0.0  ;;  %v5515_v57 = vadd.f32 %v5514_v0, %v5402_v22 }
 0x81f   : > { %v5518_v60 = vpop.f32.mrf.mxu0 }
 0x820   : > { %v5579_v56 = vpack.c.bf16 %v5559_v11, %v5557_v31  ;;  %v5560_v17 = vmax.f32 %v5515_v57, 0.0  ;;  %v5519_v53 = vadd.f32 %v5518_v60, %v5406_v25 }
 0x821   : > { %v5520_v38 = vpop.f32.mrf.mxu0 }
 0x822   : > { %v5580_v40 = vpack.c.bf16 %v5560_v17, %v5558_v43  ;;  %v5521_v32 = vadd.f32 %v5520_v38, %v5408_v35  ;;  %v5561_v15 = vmax.f32 %v5519_v53, 0.0 }
 0x823   : > { %v5522_v7 = vpop.f32.mrf.mxu0 }
 0x824   : > { %v5523_v13 = vadd.f32 %v5522_v7, %v5410_v63  ;;  %5792 = vmatprep.mubr.bf16.mxu1 %v5580_v40  ;;  %v5562_v9 = vmax.f32 %v5521_v32, 0.0 }
 0x825   : > { %v5524_v58 = vpop.f32.mrf.mxu0  ;;  %5793 = vmatmul.mubr.bf16.gmra.mxu1 %v5579_v56 }
 0x826   : > { %v5563_v37 = vmax.f32 %v5523_v13, 0.0  ;;  %v5525_v44 = vadd.f32 %v5524_v58, %v5412_v4 }
 0x827   : > { %v5528_v20 = vpop.f32.mrf.mxu0 }
 0x828   : > { %v5581_v5 = vpack.c.bf16 %v5563_v37, %v5561_v15  ;;  %v5564_v59 = vmax.f32 %v5525_v44, 0.0  ;;  %v5529_v12 = vadd.f32 %v5528_v20, %v5416_v8 }
 0x829   : > { %v5530_v28 = vpop.f32.mrf.mxu0 }
 0x82a   : > { %v5582_v33 = vpack.c.bf16 %v5564_v59, %v5562_v9  ;;  %v5531_v34 = vadd.f32 %v5530_v28, %v5418_v1  ;;  %v5565_v41 = vmax.f32 %v5529_v12, 0.0 }
 0x82b   : > { %v5532_v27 = vpop.f32.mrf.mxu0 }
 0x82c   : > { %v5533_v45 = vadd.f32 %v5532_v27, %v5420_v48  ;;  %5800 = vmatprep.mubr.bf16.mxu1 %v5582_v33  ;;  %v5566_v49 = vmax.f32 %v5531_v34, 0.0 }
 0x82d   : > { %v5534_v24 = vpop.f32.mrf.mxu0  ;;  %5801 = vmatmul.mubr.bf16.gmra.mxu1 %v5581_v5 }
 0x82e   : > { %v5567_v26 = vmax.f32 %v5533_v45, 0.0  ;;  %v5535_v46 = vadd.f32 %v5534_v24, %v5422_v39 }
 0x830   : > { %v5583_v10 = vpack.c.bf16 %v5567_v26, %v5565_v41  ;;  %v5568_v51 = vmax.f32 %v5535_v46, 0.0 }
 0x832   : > { %v5584_v30 = vpack.c.bf16 %v5568_v51, %v5566_v49 }
 0x834   : > { %5808 = vmatprep.mubr.bf16.mxu1 %v5584_v30 }
 0x835   : > { %5809 = vmatmul.mubr.bf16.gmra.mxu1 %v5583_v10 }
 0x8bd   : > { %v7226_v61 = vpop.f32.mrf.mxu1 }
 0x8bf   : > { %v7227_v52 = vpop.f32.mrf.mxu1 }
 0x8c0   : > { %v7228_v14 = vadd.f32 %v7227_v52, %v7226_v61 }
 0x8c1   : > { %v7229_v54 = vpop.f32.mrf.mxu1 }
 0x8c2   : > { %v9721_v3 = vadd.f32 %v7228_v14, %v9718_v50 }
 0x8c3   : > { %v7230_v18 = vpop.f32.mrf.mxu1 }
 0x8c4   : > { %v7231_v22 = vadd.f32 %v7230_v18, %v7229_v54  ;;  %v5818_v62 = vsel %vm5817_vm0, %v9721_v3, -inf }
 0x8c5   : > { %v7232_v36 = vpop.f32.mrf.mxu1  ;;  %5819 = vmax.xlane.f32.xlu0 %v5818_v62 }
 0x8c6   : > { %v9726_v0 = vadd.f32 %v7231_v22, %v9718_v50 }
 0x8c7   : > { %v7233_v6 = vpop.f32.mrf.mxu1 }
 0x8c8   : > { %v7234_v31 = vadd.f32 %v7233_v6, %v7232_v36  ;;  %v5821_v11 = vsel %vm5817_vm0, %v9726_v0, -inf }
 0x8c9   : > { %v7235_v57 = vpop.f32.mrf.mxu1  ;;  %5822 = vmax.xlane.f32.xlu1 %v5821_v11 }
 0x8ca   : > { %v9731_v25 = vadd.f32 %v7234_v31, %v9718_v50 }
 0x8cb   : > { %v7236_v23 = vpop.f32.mrf.mxu1 }
 0x8cc   : > { %v7237_v60 = vadd.f32 %v7236_v23, %v7235_v57  ;;  %v5824_v42 = vsel %vm5817_vm0, %v9731_v25, -inf }
 0x8cd   : > { %v7238_v43 = vpop.f32.mrf.mxu1  ;;  %5825 = vmax.xlane.f32.xlu0 %v5824_v42 }
 0x8ce   : > { %v9736_v56 = vadd.f32 %v7237_v60, %v9718_v50 }
 0x8cf   : > { %v7239_v17 = vpop.f32.mrf.mxu1 }
 0x8d0   : > { %v7240_v38 = vadd.f32 %v7239_v17, %v7238_v43  ;;  %v5827_v35 = vsel %vm5817_vm0, %v9736_v56, -inf }
 0x8d1   : > { %v7241_v63 = vpop.f32.mrf.mxu1  ;;  %5828 = vmax.xlane.f32.xlu0 %v5827_v35 }
 0x8d2   : > { %v9741_v40 = vadd.f32 %v7240_v38, %v9718_v50 }
 0x8d3   : > { %v7242_v53 = vpop.f32.mrf.mxu1 }
 0x8d4   : > { %v7243_v29 = vadd.f32 %v7242_v53, %v7241_v63  ;;  %v5830_v7 = vsel %vm5817_vm0, %v9741_v40, -inf }
 0x8d5   : > { %v7244_v4 = vpop.f32.mrf.mxu1  ;;  %5831 = vmax.xlane.f32.xlu1 %v5830_v7 }
 0x8d6   : > { %v9746_v32 = vadd.f32 %v7243_v29, %v9718_v50 }
 0x8d7   : > { %v7245_v13 = vpop.f32.mrf.mxu1 }
 0x8d8   : > { %v7246_v58 = vadd.f32 %v7245_v13, %v7244_v4  ;;  %v5833_v16 = vsel %vm5817_vm0, %v9746_v32, -inf }
 0x8d9   : > { %v7247_v15 = vpop.f32.mrf.mxu1  ;;  %5834 = vmax.xlane.f32.xlu0 %v5833_v16 }
 0x8da   : > { %v9751_v37 = vadd.f32 %v7246_v58, %v9718_v50 }
 0x8db   : > { %v7248_v44 = vpop.f32.mrf.mxu1 }
 0x8dc   : > { %v7249_v8 = vadd.f32 %v7248_v44, %v7247_v15  ;;  %v5836_v2 = vsel %vm5817_vm0, %v9751_v37, -inf }
 0x8dd   : > { %v7250_v20 = vpop.f32.mrf.mxu1  ;;  %5837 = vmax.xlane.f32.xlu1 %v5836_v2 }
 0x8de   : > { %v9756_v55 = vadd.f32 %v7249_v8, %v9718_v50 }
 0x8df   : > { %v7251_v47 = vpop.f32.mrf.mxu1 }
 0x8e0   : > { %v7252_v9 = vadd.f32 %v7251_v47, %v7250_v20  ;;  %v5839_v5 = vsel %vm5817_vm0, %v9756_v55, -inf }
 0x8e1   : > { %v7253_v59 = vpop.f32.mrf.mxu1  ;;  %5840 = vmax.xlane.f32.xlu0 %v5839_v5 }
 0x8e2   : > { %v9761_v28 = vadd.f32 %v7252_v9, %v9718_v50 }
 0x8e3   : > { %v7254_v21 = vpop.f32.mrf.mxu1 }
 0x8e4   : > { %v7255_v1 = vadd.f32 %v7254_v21, %v7253_v59  ;;  %v5842_v48 = vsel %vm5817_vm0, %v9761_v28, -inf }
 0x8e5   : > { %v7256_v33 = vpop.f32.mrf.mxu1  ;;  %5843 = vmax.xlane.f32.xlu1 %v5842_v48 }
 0x8e6   : > { %v9766_v12 = vadd.f32 %v7255_v1, %v9718_v50 }
 0x8e7   : > { %v7257_v19 = vpop.f32.mrf.mxu1 }
 0x8e8   : > { %v7258_v27 = vadd.f32 %v7257_v19, %v7256_v33  ;;  %v5845_v39 = vsel %vm5817_vm0, %v9766_v12, -inf }
 0x8e9   : > { %v7259_v34 = vpop.f32.mrf.mxu1  ;;  %5846 = vmax.xlane.f32.xlu0 %v5845_v39 }
 0x8ea   : > { %v9771_v45 = vadd.f32 %v7258_v27, %v9718_v50 }
 0x8eb   : > { %v7260_v24 = vpop.f32.mrf.mxu1 }
 0x8ec   : > { %v7261_v41 = vadd.f32 %v7260_v24, %v7259_v34  ;;  %v5848_v26 = vsel %vm5817_vm0, %v9771_v45, -inf }
 0x8ed   : > { %v7262_v46 = vpop.f32.mrf.mxu1  ;;  %5849 = vmax.xlane.f32.xlu1 %v5848_v26 }
 0x8ee   : > { %v9776_v49 = vadd.f32 %v7261_v41, %v9718_v50 }
 0x8ef   : > { %v7263_v10 = vpop.f32.mrf.mxu1 }
 0x8f0   : > { %v7264_v51 = vadd.f32 %v7263_v10, %v7262_v46  ;;  %v5851_v30 = vsel %vm5817_vm0, %v9776_v49, -inf }
 0x8f1   : > { %v7265_v61 = vpop.f32.mrf.mxu1  ;;  %5852 = vmax.xlane.f32.xlu0 %v5851_v30 }
 0x8f2   : > { %v9781_v52 = vadd.f32 %v7264_v51, %v9718_v50 }
 0x8f3   : > { %v7266_v14 = vpop.f32.mrf.mxu1 }
 0x8f4   : > { %v7267_v54 = vadd.f32 %v7266_v14, %v7265_v61  ;;  %v5854_v18 = vsel %vm5817_vm0, %v9781_v52, -inf }
 0x8f5   : > { %v7268_v22 = vpop.f32.mrf.mxu1  ;;  %5855 = vmax.xlane.f32.xlu1 %v5854_v18 }
 0x8f6   : > { %v9786_v62 = vadd.f32 %v7267_v54, %v9718_v50 }
 0x8f7   : > { %v7269_v36 = vpop.f32.mrf.mxu1 }
 0x8f8   : > { %v7270_v6 = vadd.f32 %v7269_v36, %v7268_v22  ;;  %v5857_v31 = vsel %vm5817_vm0, %v9786_v62, -inf }
 0x8f9   : > { %v7271_v11 = vpop.f32.mrf.mxu1  ;;  %5858 = vmax.xlane.f32.xlu0 %v5857_v31 }
 0x8fa   : > { %v9791_v57 = vadd.f32 %v7270_v6, %v9718_v50 }
 0x8fb   : > { %v7272_v23 = vpop.f32.mrf.mxu1 }
 0x8fc   : > { %v7273_v60 = vadd.f32 %v7272_v23, %v7271_v11  ;;  %v5860_v42 = vsel %vm5817_vm0, %v9791_v57, -inf }
 0x8fd   : > { %5861 = vmax.xlane.f32.xlu1 %v5860_v42 }
 0x8fe   : > { %v9796_v43 = vadd.f32 %v7273_v60, %v9718_v50 }
 0x900   : > { %v5863_v17 = vsel %vm5817_vm0, %v9796_v43, -inf }
 0x901   : > { %5864 = vmax.xlane.f32.xlu0 %v5863_v17 }
 0x94e   : > { %v9800_v38 = vpop.xlane.xlu0 %5819 }
 0x94f   : > { %v5866_v35 = vsub.f32 %v9721_v3, %v9800_v38 }
 0x951   : > { %v5882_v63 = vmul.f32 1.442695, %v5866_v35 }
 0x952   : > { %v9804_v53 = vpop.xlane.xlu1 %5822 }
 0x953   : > { %7853 = vpow2.f32 %v5882_v63  ;;  %v5867_v29 = vsub.f32 %v9726_v0, %v9804_v53 }
 0x955   : > { %v5884_v7 = vmul.f32 1.442695, %v5867_v29 }
 0x956   : > { %v9808_v4 = vpop.xlane.xlu0 %5825 }
 0x957   : > { %7855 = vpow2.f32 %v5884_v7  ;;  %v5868_v50 = vsub.f32 %v9731_v25, %v9808_v4 }
 0x959   : > { %v5886_v13 = vmul.f32 1.442695, %v5868_v50 }
 0x95a   : > { %v9812_v58 = vpop.xlane.xlu0 %5828 }
 0x95b   : > { %7857 = vpow2.f32 %v5886_v13  ;;  %v5869_v16 = vsub.f32 %v9736_v56, %v9812_v58 }
 0x95d   : > { %v5888_v15 = vmul.f32 1.442695, %v5869_v16 }
 0x95e   : > { %v9816_v44 = vpop.xlane.xlu1 %5831 }
 0x95f   : > { %7859 = vpow2.f32 %v5888_v15  ;;  %v5870_v8 = vsub.f32 %v9741_v40, %v9816_v44 }
 0x960   : > { %v7854_v2 = vpop.eup %7853 }
 0x961   : > { %v5890_v20 = vmul.f32 1.442695, %v5870_v8  ;;  %v5914_v47 = vsel %vm5817_vm0, %v7854_v2, 0.0 }
 0x962   : > { %5915 = vadd.xlane.f32.xlu1 %v5914_v47  ;;  %v9821_v9 = vpop.xlane.xlu0 %5834 }
 0x963   : > { %7861 = vpow2.f32 %v5890_v20  ;;  %v5871_v5 = vsub.f32 %v9746_v32, %v9821_v9 }
 0x964   : > { %v7856_v59 = vpop.eup %7855 }
 0x965   : > { %v5892_v21 = vmul.f32 1.442695, %v5871_v5  ;;  %v5917_v1 = vsel %vm5817_vm0, %v7856_v59, 0.0 }
 0x966   : > { %v9826_v48 = vpop.xlane.xlu1 %5837  ;;  %5918 = vadd.xlane.f32.xlu0 %v5917_v1 }
 0x967   : > { %7863 = vpow2.f32 %v5892_v21  ;;  %v5872_v33 = vsub.f32 %v9751_v37, %v9826_v48 }
 0x968   : > { %v7858_v19 = vpop.eup %7857 }
 0x969   : > { %v5894_v27 = vmul.f32 1.442695, %v5872_v33  ;;  %v5920_v39 = vsel %vm5817_vm0, %v7858_v19, 0.0 }
 0x96a   : > { %5921 = vadd.xlane.f32.xlu1 %v5920_v39  ;;  %v9831_v34 = vpop.xlane.xlu0 %5840 }
 0x96b   : > { %7865 = vpow2.f32 %v5894_v27  ;;  %v5873_v24 = vsub.f32 %v9756_v55, %v9831_v34 }
 0x96c   : > { %v7860_v41 = vpop.eup %7859 }
 0x96d   : > { %v5896_v26 = vmul.f32 1.442695, %v5873_v24  ;;  %v5923_v46 = vsel %vm5817_vm0, %v7860_v41, 0.0 }
 0x96e   : > { %v9836_v10 = vpop.xlane.xlu1 %5843  ;;  %5924 = vadd.xlane.f32.xlu0 %v5923_v46 }
 0x96f   : > { %7867 = vpow2.f32 %v5896_v26  ;;  %v5874_v51 = vsub.f32 %v9761_v28, %v9836_v10 }
 0x970   : > { %v7862_v30 = vpop.eup %7861 }
 0x971   : > { %v5898_v61 = vmul.f32 1.442695, %v5874_v51  ;;  %v5926_v14 = vsel %vm5817_vm0, %v7862_v30, 0.0 }
 0x972   : > { %5927 = vadd.xlane.f32.xlu1 %v5926_v14  ;;  %v9841_v54 = vpop.xlane.xlu0 %5846 }
 0x973   : > { %7869 = vpow2.f32 %v5898_v61  ;;  %v5875_v18 = vsub.f32 %v9766_v12, %v9841_v54 }
 0x974   : > { %v7864_v22 = vpop.eup %7863 }
 0x975   : > { %v5900_v36 = vmul.f32 1.442695, %v5875_v18  ;;  %v5929_v6 = vsel %vm5817_vm0, %v7864_v22, 0.0 }
 0x976   : > { %v9846_v31 = vpop.xlane.xlu1 %5849  ;;  %5930 = vadd.xlane.f32.xlu0 %v5929_v6 }
 0x977   : > { %7871 = vpow2.f32 %v5900_v36  ;;  %v5876_v11 = vsub.f32 %v9771_v45, %v9846_v31 }
 0x978   : > { %v7866_v23 = vpop.eup %7865 }
 0x979   : > { %v5902_v60 = vmul.f32 1.442695, %v5876_v11  ;;  %v5932_v42 = vsel %vm5817_vm0, %v7866_v23, 0.0 }
 0x97a   : > { %5933 = vadd.xlane.f32.xlu1 %v5932_v42  ;;  %v9851_v17 = vpop.xlane.xlu0 %5852 }
 0x97b   : > { %7873 = vpow2.f32 %v5902_v60  ;;  %v5877_v35 = vsub.f32 %v9776_v49, %v9851_v17 }
 0x97c   : > { %v7868_v63 = vpop.eup %7867 }
 0x97d   : > { %v5904_v29 = vmul.f32 1.442695, %v5877_v35  ;;  %v5935_v7 = vsel %vm5817_vm0, %v7868_v63, 0.0 }
 0x97e   : > { %v9856_v50 = vpop.xlane.xlu1 %5855  ;;  %5936 = vadd.xlane.f32.xlu0 %v5935_v7 }
 0x97f   : > { %7875 = vpow2.f32 %v5904_v29  ;;  %v5878_v13 = vsub.f32 %v9781_v52, %v9856_v50 }
 0x980   : > { %v7870_v16 = vpop.eup %7869 }
 0x981   : > { %v5906_v15 = vmul.f32 1.442695, %v5878_v13  ;;  %v5938_v8 = vsel %vm5817_vm0, %v7870_v16, 0.0 }
 0x982   : > { %5939 = vadd.xlane.f32.xlu1 %v5938_v8  ;;  %v9861_v2 = vpop.xlane.xlu0 %5858 }
 0x983   : > { %7877 = vpow2.f32 %v5906_v15  ;;  %v5879_v20 = vsub.f32 %v9786_v62, %v9861_v2 }
 0x984   : > { %v7872_v47 = vpop.eup %7871 }
 0x985   : > { %v5908_v5 = vmul.f32 1.442695, %v5879_v20  ;;  %v5941_v59 = vsel %vm5817_vm0, %v7872_v47, 0.0 }
 0x986   : > { %v9866_v21 = vpop.xlane.xlu1 %5861  ;;  %5942 = vadd.xlane.f32.xlu0 %v5941_v59 }
 0x987   : > { %7879 = vpow2.f32 %v5908_v5  ;;  %v5880_v1 = vsub.f32 %v9791_v57, %v9866_v21 }
 0x988   : > { %v7874_v33 = vpop.eup %7873 }
 0x989   : > { %v5910_v19 = vmul.f32 1.442695, %v5880_v1  ;;  %v5944_v27 = vsel %vm5817_vm0, %v7874_v33, 0.0 }
 0x98a   : > { %5945 = vadd.xlane.f32.xlu1 %v5944_v27  ;;  %v9871_v39 = vpop.xlane.xlu0 %5864 }
 0x98b   : > { %7881 = vpow2.f32 %v5910_v19  ;;  %v5881_v24 = vsub.f32 %v9796_v43, %v9871_v39 }
 0x98c   : > { %v7876_v41 = vpop.eup %7875 }
 0x98d   : > { %v5912_v26 = vmul.f32 1.442695, %v5881_v24  ;;  %v5947_v46 = vsel %vm5817_vm0, %v7876_v41, 0.0 }
 0x98e   : > { %5948 = vadd.xlane.f32.xlu0 %v5947_v46 }
 0x98f   : > { %7883 = vpow2.f32 %v5912_v26 }
 0x990   : > { %v7878_v51 = vpop.eup %7877 }
 0x991   : > { %v5950_v30 = vsel %vm5817_vm0, %v7878_v51, 0.0 }
 0x992   : > { %5951 = vadd.xlane.f32.xlu1 %v5950_v30 }
 0x994   : > { %v7880_v61 = vpop.eup %7879 }
 0x995   : > { %v5953_v14 = vsel %vm5817_vm0, %v7880_v61, 0.0 }
 0x996   : > { %5954 = vadd.xlane.f32.xlu0 %v5953_v14 }
 0x998   : > { %v7882_v18 = vpop.eup %7881 }
 0x999   : > { %v5956_v22 = vsel %vm5817_vm0, %v7882_v18, 0.0 }
 0x99a   : > { %5957 = vadd.xlane.f32.xlu1 %v5956_v22 }
 0x99c   : > { %v7884_v36 = vpop.eup %7883 }
 0x99d   : > { %v5959_v6 = vsel %vm5817_vm0, %v7884_v36, 0.0 }
 0x99e   : > { %5960 = vadd.xlane.f32.xlu0 %v5959_v6 }
 0x9eb   : > { %v5916_v11 = vpop.xlane.xlu1 %5915 }
 0x9ec   : > { %7885 = vlog2.f32 %v5916_v11 }
 0x9ef   : > { %v5919_v23 = vpop.xlane.xlu0 %5918 }
 0x9f0   : > { %7887 = vlog2.f32 %v5919_v23 }
 0x9f3   : > { %v5922_v60 = vpop.xlane.xlu1 %5921 }
 0x9f4   : > { %7889 = vlog2.f32 %v5922_v60 }
 0x9f7   : > { %v5925_v42 = vpop.xlane.xlu0 %5924 }
 0x9f8   : > { %7891 = vlog2.f32 %v5925_v42 }
 0x9f9   : > { %v7886_v35 = vpop.eup %7885 }
 0x9fa   : > { %v5963_v63 = vmul.f32 0.6931472, %v7886_v35 }
 0x9fb   : > { %v5928_v29 = vpop.xlane.xlu1 %5927 }
 0x9fc   : > { %v5994_v7 = vadd.f32 %v5963_v63, %v9800_v38  ;;  %7893 = vlog2.f32 %v5928_v29 }
 0x9fd   : > { %v7888_v13 = vpop.eup %7887 }
 0x9fe   : > { %v6010_v16 = vsub.f32 %v9721_v3, %v5994_v7  ;;  %v5965_v15 = vmul.f32 0.6931472, %v7888_v13 }
 0x9ff   : > { %v5931_v8 = vpop.xlane.xlu0 %5930 }
 0xa00   : > { %6026 = vst.msk [vmem:[%s9885_s14] sm:$0xff] %vm5817_vm0, %v6010_v16  ;;  %v5995_v20 = vadd.f32 %v5965_v15, %v9804_v53  ;;  %7895 = vlog2.f32 %v5931_v8 }
 0xa01   : > { %v7890_v38 = vpop.eup %7889 }
 0xa02   : > { %v6011_v47 = vsub.f32 %v9726_v0, %v5995_v20  ;;  %v5967_v5 = vmul.f32 0.6931472, %v7890_v38 }
 0xa03   : > { %v5934_v59 = vpop.xlane.xlu1 %5933 }
 0xa04   : > { %6027 = vst.msk [vmem:[%s9885_s14 + $0x8] sm:$0xff] %vm5817_vm0, %v6011_v47  ;;  %v5996_v1 = vadd.f32 %v5967_v5, %v9808_v4  ;;  %7897 = vlog2.f32 %v5934_v59 }
 0xa05   : > { %v7892_v3 = vpop.eup %7891 }
 0xa06   : > { %v6012_v33 = vsub.f32 %v9731_v25, %v5996_v1  ;;  %v5969_v19 = vmul.f32 0.6931472, %v7892_v3 }
 0xa07   : > { %v5937_v27 = vpop.xlane.xlu0 %5936 }
 0xa08   : > { %6028 = vst.msk [vmem:[%s9885_s14 + $0x10] sm:$0xff] %vm5817_vm0, %v6012_v33  ;;  %v5997_v53 = vadd.f32 %v5969_v19, %v9812_v58  ;;  %7899 = vlog2.f32 %v5937_v27 }
 0xa09   : > { %v7894_v0 = vpop.eup %7893 }
 0xa0a   : > { %v6013_v24 = vsub.f32 %v9736_v56, %v5997_v53  ;;  %v5971_v41 = vmul.f32 0.6931472, %v7894_v0 }
 0xa0b   : > { %v5940_v26 = vpop.xlane.xlu1 %5939 }
 0xa0c   : > { %6029 = vst.msk [vmem:[%s9885_s14 + $0x18] sm:$0xff] %vm5817_vm0, %v6013_v24  ;;  %v5998_v4 = vadd.f32 %v5971_v41, %v9816_v44  ;;  %7901 = vlog2.f32 %v5940_v26 }
 0xa0d   : > { %v7896_v25 = vpop.eup %7895 }
 0xa0e   : > { %v6014_v46 = vsub.f32 %v9741_v40, %v5998_v4  ;;  %v5973_v51 = vmul.f32 0.6931472, %v7896_v25 }
 0xa0f   : > { %v5943_v30 = vpop.xlane.xlu0 %5942 }
 0xa10   : > { %6030 = vst.msk [vmem:[%s9885_s14 + $0x20] sm:$0xff] %vm5817_vm0, %v6014_v46  ;;  %v5999_v58 = vadd.f32 %v5973_v51, %v9821_v9  ;;  %7903 = vlog2.f32 %v5943_v30 }
 0xa11   : > { %v7898_v56 = vpop.eup %7897 }
 0xa12   : > { %v6015_v61 = vsub.f32 %v9746_v32, %v5999_v58  ;;  %v5975_v14 = vmul.f32 0.6931472, %v7898_v56 }
 0xa13   : > { %v5946_v18 = vpop.xlane.xlu1 %5945 }
 0xa14   : > { %6031 = vst.msk [vmem:[%s9885_s14 + $0x28] sm:$0xff] %vm5817_vm0, %v6015_v61  ;;  %v6000_v44 = vadd.f32 %v5975_v14, %v9826_v48  ;;  %7905 = vlog2.f32 %v5946_v18 }
 0xa15   : > { %v7900_v40 = vpop.eup %7899 }
 0xa16   : > { %v6016_v22 = vsub.f32 %v9751_v37, %v6000_v44  ;;  %v5977_v36 = vmul.f32 0.6931472, %v7900_v40 }
 0xa17   : > { %v5949_v6 = vpop.xlane.xlu0 %5948 }
 0xa18   : > { %6032 = vst.msk [vmem:[%s9885_s14 + $0x30] sm:$0xff] %vm5817_vm0, %v6016_v22  ;;  %v6001_v9 = vadd.f32 %v5977_v36, %v9831_v34  ;;  %7907 = vlog2.f32 %v5949_v6 }
 0xa19   : > { %v7902_v32 = vpop.eup %7901 }
 0xa1a   : > { %v6017_v11 = vsub.f32 %v9756_v55, %v6001_v9  ;;  %v5979_v23 = vmul.f32 0.6931472, %v7902_v32 }
 0xa1b   : > { %v5952_v60 = vpop.xlane.xlu1 %5951 }
 0xa1c   : > { %6033 = vst.msk [vmem:[%s9885_s14 + $0x38] sm:$0xff] %vm5817_vm0, %v6017_v11  ;;  %v6002_v48 = vadd.f32 %v5979_v23, %v9836_v10  ;;  %7909 = vlog2.f32 %v5952_v60 }
 0xa1d   : > { %v7904_v37 = vpop.eup %7903 }
 0xa1e   : > { %v6018_v42 = vsub.f32 %v9761_v28, %v6002_v48  ;;  %v5981_v35 = vmul.f32 0.6931472, %v7904_v37 }
 0xa1f   : > { %v5955_v63 = vpop.xlane.xlu0 %5954 }
 0xa20   : > { %6034 = vst.msk [vmem:[%s9885_s14 + $0x40] sm:$0xff] %vm5817_vm0, %v6018_v42  ;;  %v6003_v34 = vadd.f32 %v5981_v35, %v9841_v54  ;;  %7911 = vlog2.f32 %v5955_v63 }
 0xa21   : > { %v7906_v55 = vpop.eup %7905 }
 0xa22   : > { %v6019_v29 = vsub.f32 %v9766_v12, %v6003_v34  ;;  %v5983_v7 = vmul.f32 0.6931472, %v7906_v55 }
 0xa23   : > { %v5958_v13 = vpop.xlane.xlu1 %5957 }
 0xa24   : > { %6035 = vst.msk [vmem:[%s9885_s14 + $0x48] sm:$0xff] %vm5817_vm0, %v6019_v29  ;;  %v6004_v10 = vadd.f32 %v5983_v7, %v9846_v31  ;;  %7913 = vlog2.f32 %v5958_v13 }
 0xa25   : > { %v7908_v28 = vpop.eup %7907 }
 0xa26   : > { %v6020_v16 = vsub.f32 %v9771_v45, %v6004_v10  ;;  %v5985_v15 = vmul.f32 0.6931472, %v7908_v28 }
 0xa27   : > { %v5961_v8 = vpop.xlane.xlu0 %5960 }
 0xa28   : > { %6036 = vst.msk [vmem:[%s9885_s14 + $0x50] sm:$0xff] %vm5817_vm0, %v6020_v16  ;;  %v6005_v54 = vadd.f32 %v5985_v15, %v9851_v17  ;;  %7915 = vlog2.f32 %v5961_v8 }
 0xa29   : > { %v7910_v12 = vpop.eup %7909 }
 0xa2a   : > { %v6021_v20 = vsub.f32 %v9776_v49, %v6005_v54  ;;  %v5987_v38 = vmul.f32 0.6931472, %v7910_v12 }
 0xa2c   : > { %6037 = vst.msk [vmem:[%s9885_s14 + $0x58] sm:$0xff] %vm5817_vm0, %v6021_v20  ;;  %v6006_v31 = vadd.f32 %v5987_v38, %v9856_v50 }
 0xa2d   : > { %v7912_v47 = vpop.eup %7911 }
 0xa2e   : > { %v6022_v45 = vsub.f32 %v9781_v52, %v6006_v31  ;;  %v5989_v5 = vmul.f32 0.6931472, %v7912_v47 }
 0xa30   : > { %6038 = vst.msk [vmem:[%s9885_s14 + $0x60] sm:$0xff] %vm5817_vm0, %v6022_v45  ;;  %v6007_v59 = vadd.f32 %v5989_v5, %v9861_v2 }
 0xa31   : > { %v7914_v17 = vpop.eup %7913 }
 0xa32   : > { %v6023_v1 = vsub.f32 %v9786_v62, %v6007_v59  ;;  %v5991_v3 = vmul.f32 0.6931472, %v7914_v17 }
 0xa34   : > { %6039 = vst.msk [vmem:[%s9885_s14 + $0x68] sm:$0xff] %vm5817_vm0, %v6023_v1  ;;  %v6008_v49 = vadd.f32 %v5991_v3, %v9866_v21 }
 0xa35   : > { %v7916_v33 = vpop.eup %7915 }
 0xa36   : > { %v6024_v50 = vsub.f32 %v9791_v57, %v6008_v49  ;;  %v5993_v19 = vmul.f32 0.6931472, %v7916_v33 }
 0xa38   : > { %6040 = vst.msk [vmem:[%s9885_s14 + $0x70] sm:$0xff] %vm5817_vm0, %v6024_v50  ;;  %v6009_v52 = vadd.f32 %v5993_v19, %v9871_v39 }
 0xa3a   : > { %v6025_v27 = vsub.f32 %v9796_v43, %v6009_v52 }
 0xa3c   : > { %6041 = vst.msk [vmem:[%s9885_s14 + $0x78] sm:$0xff] %vm5817_vm0, %v6025_v27 }
 0xa3d PF: > { %s22_s13 = sadd.s32 1, %s8010_s13  }
 0xa3e   : > { %p19_p3 = scmp.ge.s32.totalorder %s22_s13, 4  }
 0xa40   :  { %21 = sbr.rel (!%p19_p3) target bundleno = 2 (0x2), region = 109 }
 0xa45   :  { %6066 = vsyncpa [#allocation4], 1 }
 0xa46   :  { %6068 = vsyncpa [#allocation4 + $0x1], 1 }
 0xa47   :  { %6069 = vsyncpa [#allocation6], 1 }

</bundles_post_ra>
